<compile_context>
chip_gen: v6e
topology: v6e:2x2x1
jax: 0.10.0
libtpu: 0.0.40
codegen_flags: <defaults>
</compile_context>

<pallas_src>
import numpy as np
import jax
import jax.numpy as jnp
from jax import lax
from jax.experimental import pallas as pl
from jax.experimental.pallas import tpu as pltpu

# ---------------- model hyper-params (small, consistent with the module) ----
NUM_FRENCH_WORDS = 80
NUM_ENGLISH_WORDS = 96
NUM_LAYERS = 4
NUM_HEADS = 4
EMBEDDING_SIZE = 128          # d_model
HIDDEN_SIZE = 128             # dim_feedforward
HEAD_DIM = EMBEDDING_SIZE // NUM_HEADS
FC_OUT_PAD = 128              # fc_out padded lane width (>= NUM_ENGLISH_WORDS)
LN_EPS = 1e-5
NEG = -1e9                    # additive mask value (stand-in for -inf)
PADDING_TOKEN = 0
ATTN_SCALE = float(1.0 / np.sqrt(HEAD_DIM))

_ENC_KEYS = ("qkv_w", "qkv_b", "o_w", "o_b", "ln1_w", "ln1_b",
             "f1_w", "f1_b", "f2_w", "f2_b", "ln2_w", "ln2_b")

_DEC_KEYS = ("sqkv_w", "sqkv_b", "so_w", "so_b", "ln1_w", "ln1_b",
             "cq_w", "cq_b", "ckv_w", "ckv_b", "co_w", "co_b", "ln2_w", "ln2_b",
             "f1_w", "f1_b", "f2_w", "f2_b", "ln3_w", "ln3_b")


# --------------------------- in-kernel helpers -------------------------------

def _mm(a, w):
    """bf16 MXU matmul with f32 accumulation."""
    return jnp.dot(a.astype(jnp.bfloat16), w.astype(jnp.bfloat16),
                   preferred_element_type=jnp.float32)


def _softmax(s):
    s = s - jnp.max(s, axis=-1, keepdims=True)
    p = jnp.exp(s)
    return p * pl.reciprocal(jnp.sum(p, axis=-1, keepdims=True), approx=True)


def _add_ln(x, y, w, b):
    z = x + y                                          # residual add
    mu = jnp.mean(z, axis=-1, keepdims=True)
    var = jnp.mean((z - mu) ** 2, axis=-1, keepdims=True)
    return (z - mu) * lax.rsqrt(var + LN_EPS) * w + b


def _mha(q, k, v, bias, o_w, o_b):
    """Multi-head attention + output projection over flattened (batch*seq) rows.

    q:(Rq,D) k,v:(Rk,D); bias:(Rq,Rk) additive f32 (encodes key-padding, causal and
    block-diagonal batch structure, so cross-batch attention is masked out).
    Per-head outputs are accumulated directly into the out-projection
    (concat(heads) @ o_w == sum_h head_h @ o_w[h*Dh:(h+1)*Dh, :]) so the result stays
    a lane-dense (Rq, 128) slab with no in-kernel concat / transpose.
    """
    acc = jnp.zeros((q.shape[0], EMBEDDING_SIZE), jnp.float32)
    for h in range(NUM_HEADS):
        sl = slice(h * HEAD_DIM, (h + 1) * HEAD_DIM)
        s = lax.dot_general(
            q[:, sl].astype(jnp.bfloat16), k[:, sl].astype(jnp.bfloat16),
            (((1,), (1,)), ((), ())),            # contract on head_dim, no k.T
            preferred_element_type=jnp.float32)
        p = _softmax(s * ATTN_SCALE + bias)
        acc = acc + _mm(_mm(p, v[:, sl]), o_w[sl, :])
    return acc + o_b


# ------------------------------ fused stack kernels --------------------------

def _encoder_stack_kernel(x_ref, bias_ref, *rest):
    nw = len(_ENC_KEYS)
    (qkv_w, qkv_b, o_w, o_b, ln1_w, ln1_b,
     f1_w, f1_b, f2_w, f2_b, ln2_w, ln2_b) = rest[:nw]
    o_ref = rest[nw]
    x_scr = rest[nw + 1]

    l = pl.program_id(0)
    D = EMBEDDING_SIZE

    @pl.when(l == 0)
    def _():                                        # seed persistent activation
        x_scr[...] = x_ref[...]

    x = x_scr[...]                                  # (B*S, D) f32
    bias = bias_ref[...]                            # (B*S, B*S) additive mask

    # --- self attention (fused QKV projection) ---
    qkv = _mm(x, qkv_w[0]) + qkv_b[0]               # (B*S, 3D)
    a = _mha(qkv[:, :D], qkv[:, D:2 * D], qkv[:, 2 * D:], bias, o_w[0], o_b[0])
    x = _add_ln(x, a, ln1_w[0], ln1_b[0])
    # --- feed-forward ---
    h = jnp.maximum(_mm(x, f1_w[0]) + f1_b[0], 0.0)
    f = _mm(h, f2_w[0]) + f2_b[0]
    x = _add_ln(x, f, ln2_w[0], ln2_b[0])

    x_scr[...] = x                                  # carry to next layer

    @pl.when(l == pl.num_programs(0) - 1)
    def _():
        o_ref[...] = x


def _decoder_stack_kernel(y_ref, mem_ref, sbias_ref, cbias_ref, *rest):
    nw = len(_DEC_KEYS)
    (sqkv_w, sqkv_b, so_w, so_b, ln1_w, ln1_b,
     cq_w, cq_b, ckv_w, ckv_b, co_w, co_b, ln2_w, ln2_b,
     f1_w, f1_b, f2_w, f2_b, ln3_w, ln3_b) = rest[:nw]
    fco_w = rest[nw]
    fco_b = rest[nw + 1]
    logits_ref = rest[nw + 2]
    x_scr = rest[nw + 3]

    l = pl.program_id(0)
    D = EMBEDDING_SIZE

    @pl.when(l == 0)
    def _():
        x_scr[...] = y_ref[...]

    x = x_scr[...]                                  # (B*T, D)
    mem = mem_ref[...]                              # (B*S, D) resident across layers
    sbias = sbias_ref[...]                          # (B*T, B*T) causal + pad + batch
    cbias = cbias_ref[...]                          # (B*T, B*S) memory pad + batch

    # --- masked self attention ---
    qkv = _mm(x, sqkv_w[0]) + sqkv_b[0]
    a = _mha(qkv[:, :D], qkv[:, D:2 * D], qkv[:, 2 * D:], sbias, so_w[0], so_b[0])
    x = _add_ln(x, a, ln1_w[0], ln1_b[0])
    # --- cross attention (packed KV projection of memory) ---
    q = _mm(x, cq_w[0]) + cq_b[0]
    kv = _mm(mem, ckv_w[0]) + ckv_b[0]
    c = _mha(q, kv[:, :D], kv[:, D:], cbias, co_w[0], co_b[0])
    x = _add_ln(x, c, ln2_w[0], ln2_b[0])
    # --- feed-forward ---
    h = jnp.maximum(_mm(x, f1_w[0]) + f1_b[0], 0.0)
    f = _mm(h, f2_w[0]) + f2_b[0]
    x = _add_ln(x, f, ln3_w[0], ln3_b[0])

    x_scr[...] = x

    @pl.when(l == pl.num_programs(0) - 1)
    def _():                                        # fc_out fused into last step
        logits_ref[...] = _mm(x, fco_w[...]) + fco_b[...]


# ------------------------------ pallas wrappers ------------------------------

def _layer_spec(arr):
    """Stacked per-layer weight (L, ...): one layer's slab per grid step."""
    n = arr.ndim - 1
    return pl.BlockSpec((1,) + arr.shape[1:], lambda l, n=n: (l,) + (0,) * n)


def _const_spec(arr):
    """Whole array, same block every grid step (DMA'd once, VMEM-resident)."""
    nd = arr.ndim
    return pl.BlockSpec(arr.shape, lambda l, nd=nd: (0,) * nd)


def _cost_estimate(operands, out_bytes, flops, transcendentals):
    bytes_accessed = int(out_bytes) + sum(
        int(np.prod(a.shape)) * a.dtype.itemsize for a in operands)
    return pl.CostEstimate(flops=int(flops), transcendentals=int(transcendentals),
                           bytes_accessed=int(bytes_accessed))


def encoder_stack(x2d, bias, p):
    BS, D = x2d.shape
    weights = [p[k] for k in _ENC_KEYS]

    flops_layer = (2 * BS * D * 3 * D
                   + NUM_HEADS * (4 * BS * BS * HEAD_DIM + 2 * BS * HEAD_DIM * D)
                   + 4 * BS * D * HIDDEN_SIZE)
    ce = _cost_estimate([x2d, bias] + weights, BS * D * 4,
                        NUM_LAYERS * flops_layer,
                        NUM_LAYERS * (NUM_HEADS * BS * BS + 8 * BS))

    return pl.pallas_call(
        _encoder_stack_kernel,
        out_shape=jax.ShapeDtypeStruct((BS, D), jnp.float32),
        grid=(NUM_LAYERS,),
        in_specs=[_const_spec(x2d), _const_spec(bias)]
                 + [_layer_spec(w) for w in weights],
        out_specs=pl.BlockSpec((BS, D), lambda l: (0, 0)),
        scratch_shapes=[pltpu.VMEM((BS, D), jnp.float32)],
        compiler_params=pltpu.CompilerParams(dimension_semantics=("arbitrary",)),
        cost_estimate=ce,
    )(x2d, bias, *weights)


def decoder_stack(y2d, memory, sbias, cbias, p, fco_w, fco_b):
    BT, D = y2d.shape
    BS = memory.shape[0]
    weights = [p[k] for k in _DEC_KEYS]

    self_f = (2 * BT * D * 3 * D
              + NUM_HEADS * (4 * BT * BT * HEAD_DIM + 2 * BT * HEAD_DIM * D))
    cross_f = (2 * BT * D * D + 2 * BS * D * 2 * D
               + NUM_HEADS * (4 * BT * BS * HEAD_DIM + 2 * BT * HEAD_DIM * D))
    ffn_f = 4 * BT * D * HIDDEN_SIZE
    flops = NUM_LAYERS * (self_f + cross_f + ffn_f) + 2 * BT * D * FC_OUT_PAD
    ce = _cost_estimate([y2d, memory, sbias, cbias] + weights + [fco_w, fco_b],
                        BT * FC_OUT_PAD * 4, flops,
                        NUM_LAYERS * (NUM_HEADS * (BT * BT + BT * BS) + 12 * BT))

    return pl.pallas_call(
        _decoder_stack_kernel,
        out_shape=jax.ShapeDtypeStruct((BT, FC_OUT_PAD), jnp.float32),
        grid=(NUM_LAYERS,),
        in_specs=[_const_spec(y2d), _const_spec(memory),
                  _const_spec(sbias), _const_spec(cbias)]
                 + [_layer_spec(w) for w in weights]
                 + [_const_spec(fco_w), _const_spec(fco_b)],
        out_specs=pl.BlockSpec((BT, FC_OUT_PAD), lambda l: (0, 0)),
        scratch_shapes=[pltpu.VMEM((BT, D), jnp.float32)],
        compiler_params=pltpu.CompilerParams(dimension_semantics=("arbitrary",)),
        cost_estimate=ce,
    )(y2d, memory, sbias, cbias, *weights, fco_w, fco_b)


# ------------------------------ model pieces ---------------------------------

def positional_encoding(max_len, d):
    pos = np.arange(max_len, dtype=np.float32)[:, None]
    div = np.exp(np.arange(0, d, 2, dtype=np.float32) * (-np.log(10000.0) / d))
    pe = np.zeros((max_len, d), dtype=np.float32)
    pe[:, 0::2] = np.sin(pos * div)
    pe[:, 1::2] = np.cos(pos * div)
    return jnp.asarray(pe)


def transformer_forward(params, X, Y):
    B, S = X.shape
    T = Y.shape[1]
    D = EMBEDDING_SIZE

    # Combined additive biases over flattened (batch*seq) rows / keys.  The
    # block-diagonal batch term lets all batch elements share one attention matmul
    # while forbidding cross-batch attention.  Built once in JAX, tiny f32 arrays.
    bid_s = jnp.repeat(jnp.arange(B), S)                      # (B*S,)
    bid_t = jnp.repeat(jnp.arange(B), T)                      # (B*T,)
    x_pad = (X == PADDING_TOKEN).reshape(-1)                  # (B*S,)
    y_pad = (Y == PADDING_TOKEN).reshape(-1)                  # (B*T,)
    pos_t = jnp.tile(jnp.arange(T), B)                        # (B*T,)

    enc_bias = jnp.where((bid_s[:, None] == bid_s[None, :]) & ~x_pad[None, :],
                         0.0, NEG).astype(jnp.float32)        # (B*S, B*S)
    dec_bias = jnp.where((bid_t[:, None] == bid_t[None, :])
                         & (pos_t[None, :] <= pos_t[:, None])
                         & ~y_pad[None, :],
                         0.0, NEG).astype(jnp.float32)        # (B*T, B*T)
    cross_bias = jnp.where((bid_t[:, None] == bid_s[None, :]) & ~x_pad[None, :],
                           0.0, NEG).astype(jnp.float32)      # (B*T, B*S)

    pe = params["pos_enc"]
    # TODO(synk): dropout is identity here (eval-mode semantics of nn.Dropout).
    enc_in = (jnp.take(params["enc_emb"], X, axis=0) + pe[:S][None]).reshape(B * S, D)
    dec_in = (jnp.take(params["dec_emb"], Y, axis=0) + pe[:T][None]).reshape(B * T, D)

    memory = encoder_stack(enc_in, enc_bias, params["enc"])                 # 1 launch
    logits = decoder_stack(dec_in, memory, dec_bias, cross_bias,
                           params["dec"], params["fc_out_w"], params["fc_out_b"])
    return logits[:, :NUM_ENGLISH_WORDS].reshape(B, T, NUM_ENGLISH_WORDS)


# ------------------------------ parameter init -------------------------------

class KeyGen:
    def __init__(self, key):
        self.key = key

    def __call__(self):
        self.key, sub = jax.random.split(self.key)
        return sub


def _w(kg, din, dout):
    # bf16 weights: native MXU operand dtype, half the HBM->VMEM bytes
    return (jax.random.normal(kg(), (din, dout), jnp.float32) * 0.02).astype(jnp.bfloat16)


def _b(dout):
    return jnp.zeros((1, dout), jnp.float32)


def _ln(d):
    return jnp.ones((1, d), jnp.float32), jnp.zeros((1, d), jnp.float32)


def init_enc_layer(kg, d, hdim):
    ln1_w, ln1_b = _ln(d)
    ln2_w, ln2_b = _ln(d)
    return {"qkv_w": _w(kg, d, 3 * d), "qkv_b": _b(3 * d),
            "o_w": _w(kg, d, d), "o_b": _b(d),
            "ln1_w": ln1_w, "ln1_b": ln1_b,
            "f1_w": _w(kg, d, hdim), "f1_b": _b(hdim),
            "f2_w": _w(kg, hdim, d), "f2_b": _b(d),
            "ln2_w": ln2_w, "ln2_b": ln2_b}


def init_dec_layer(kg, d, hdim):
    ln1_w, ln1_b = _ln(d)
    ln2_w, ln2_b = _ln(d)
    ln3_w, ln3_b = _ln(d)
    return {"sqkv_w": _w(kg, d, 3 * d), "sqkv_b": _b(3 * d),
            "so_w": _w(kg, d, d), "so_b": _b(d),
            "ln1_w": ln1_w, "ln1_b": ln1_b,
            "cq_w": _w(kg, d, d), "cq_b": _b(d),
            "ckv_w": _w(kg, d, 2 * d), "ckv_b": _b(2 * d),
            "co_w": _w(kg, d, d), "co_b": _b(d),
            "ln2_w": ln2_w, "ln2_b": ln2_b,
            "f1_w": _w(kg, d, hdim), "f1_b": _b(hdim),
            "f2_w": _w(kg, hdim, d), "f2_b": _b(d),
            "ln3_w": ln3_w, "ln3_b": ln3_b}


def init_params(key, max_len=64):
    kg = KeyGen(key)
    d, hdim = EMBEDDING_SIZE, HIDDEN_SIZE
    enc_emb = jax.random.normal(kg(), (NUM_FRENCH_WORDS, d), jnp.float32) * 0.02
    dec_emb = jax.random.normal(kg(), (NUM_ENGLISH_WORDS, d), jnp.float32) * 0.02
    # padding_idx=0 -> zero embedding row
    enc_emb = enc_emb.at[PADDING_TOKEN].set(0.0)
    dec_emb = dec_emb.at[PADDING_TOKEN].set(0.0)

    enc_layers = [init_enc_layer(kg, d, hdim) for _ in range(NUM_LAYERS)]
    dec_layers = [init_dec_layer(kg, d, hdim) for _ in range(NUM_LAYERS)]
    # stack per-layer weights along a leading L axis for the fused-stack kernels
    enc = {k: jnp.stack([lp[k] for lp in enc_layers]) for k in _ENC_KEYS}
    dec = {k: jnp.stack([lp[k] for lp in dec_layers]) for k in _DEC_KEYS}

    # fc_out padded 96 -> 128 output lanes (zeros); logits sliced back in JAX
    fw = jax.random.normal(kg(), (d, NUM_ENGLISH_WORDS), jnp.float32) * 0.02
    fc_out_w = jnp.zeros((d, FC_OUT_PAD), jnp.float32).at[:, :NUM_ENGLISH_WORDS].set(fw)
    return {
        "enc_emb": enc_emb,
        "dec_emb": dec_emb,
        "pos_enc": positional_encoding(max_len, d),
        "enc": enc,
        "dec": dec,
        "fc_out_w": fc_out_w.astype(jnp.bfloat16),
        "fc_out_b": jnp.zeros((1, FC_OUT_PAD), jnp.float32),
    }


# ------------------------------------ main -----------------------------------

if __name__ == "__main__":
    key = jax.random.PRNGKey(0)
    k_par, k_x, k_y = jax.random.split(key, 3)

    B, S, T = 2, 8, 8
    params = init_params(k_par)

    X = jax.random.randint(k_x, (B, S), 1, NUM_FRENCH_WORDS, dtype=jnp.int32)
    Y = jax.random.randint(k_y, (B, T), 1, NUM_ENGLISH_WORDS, dtype=jnp.int32)
    # add some padding tokens (exercises the key-padding masks)
    X = X.at[1, S - 2:].set(PADDING_TOKEN)
    Y = Y.at[1, T - 1:].set(PADDING_TOKEN)

    fwd = jax.jit(transformer_forward)
    logits = jax.block_until_ready(fwd(params, X, Y))

    assert logits.shape == (B, T, NUM_ENGLISH_WORDS), logits.shape
    assert bool(jnp.all(jnp.isfinite(logits)))
    print("KERNEL_OK")
</pallas_src>

<mosaic_0001>
module attributes {stable_mosaic.version = 11 : i64} {
  func.func @_encoder_stack_kernel(%arg0: i32, %arg1: memref<16x128xf32, #tpu.memory_space<vmem>>, %arg2: memref<16x16xf32, #tpu.memory_space<vmem>>, %arg3: memref<1x128x384xbf16, #tpu.memory_space<vmem>>, %arg4: memref<1x1x384xf32, #tpu.memory_space<vmem>>, %arg5: memref<1x128x128xbf16, #tpu.memory_space<vmem>>, %arg6: memref<1x1x128xf32, #tpu.memory_space<vmem>>, %arg7: memref<1x1x128xf32, #tpu.memory_space<vmem>>, %arg8: memref<1x1x128xf32, #tpu.memory_space<vmem>>, %arg9: memref<1x128x128xbf16, #tpu.memory_space<vmem>>, %arg10: memref<1x1x128xf32, #tpu.memory_space<vmem>>, %arg11: memref<1x128x128xbf16, #tpu.memory_space<vmem>>, %arg12: memref<1x1x128xf32, #tpu.memory_space<vmem>>, %arg13: memref<1x1x128xf32, #tpu.memory_space<vmem>>, %arg14: memref<1x1x128xf32, #tpu.memory_space<vmem>>, %arg15: memref<16x128xf32, #tpu.memory_space<vmem>>, %arg16: memref<16x128xf32, #tpu.memory_space<vmem>>) attributes {dimension_semantics = [#tpu.dimension_semantics<arbitrary>], iteration_bounds = array<i64: 4>, scalar_prefetch = 0 : i64, scratch_operands = 1 : i64, tpu.core_type = #tpu.core_type<tc>, window_params = [{pipeline_mode = #tpu.pipeline_mode<synchronous>, transform_indices = @transform_0, window_bounds = array<i64: 16, 128>}, {pipeline_mode = #tpu.pipeline_mode<synchronous>, transform_indices = @transform_1, window_bounds = array<i64: 16, 16>}, {transform_indices = @transform_2, window_bounds = array<i64: 1, 128, 384>}, {transform_indices = @transform_3, window_bounds = array<i64: 1, 1, 384>}, {transform_indices = @transform_4, window_bounds = array<i64: 1, 128, 128>}, {transform_indices = @transform_5, window_bounds = array<i64: 1, 1, 128>}, {transform_indices = @transform_6, window_bounds = array<i64: 1, 1, 128>}, {transform_indices = @transform_7, window_bounds = array<i64: 1, 1, 128>}, {transform_indices = @transform_8, window_bounds = array<i64: 1, 128, 128>}, {transform_indices = @transform_9, window_bounds = array<i64: 1, 1, 128>}, {transform_indices = @transform_10, window_bounds = array<i64: 1, 128, 128>}, {transform_indices = @transform_11, window_bounds = array<i64: 1, 1, 128>}, {transform_indices = @transform_12, window_bounds = array<i64: 1, 1, 128>}, {transform_indices = @transform_13, window_bounds = array<i64: 1, 1, 128>}, {pipeline_mode = #tpu.pipeline_mode<synchronous>, transform_indices = @transform_14, window_bounds = array<i64: 16, 128>}]} {
    %c0_i32 = arith.constant 0 : i32
    %0 = arith.cmpi eq, %arg0, %c0_i32 : i32
    %1 = arith.extui %0 : i1 to i32
    %c0_i32_0 = arith.constant 0 : i32
    %2 = arith.cmpi ne, %1, %c0_i32_0 : i32
    scf.if %2 {
      %c0_81 = arith.constant 0 : index
      %c0_82 = arith.constant 0 : index
      %203 = vector.load %arg1[%c0_81, %c0_82] : memref<16x128xf32, #tpu.memory_space<vmem>>, vector<16x128xf32>
      %c0_83 = arith.constant 0 : index
      %c0_84 = arith.constant 0 : index
      %204 = vector.load %arg16[%c0_83, %c0_84] : memref<16x128xf32, #tpu.memory_space<vmem>>, vector<16x128xf32>
      tpu.vector_store %arg16[%c0_83, %c0_84], %203 {strides = array<i32>} : memref<16x128xf32, #tpu.memory_space<vmem>>, vector<16x128xf32>,
    } else {
    }
    %c0 = arith.constant 0 : index
    %c0_1 = arith.constant 0 : index
    %3 = vector.load %arg16[%c0, %c0_1] : memref<16x128xf32, #tpu.memory_space<vmem>>, vector<16x128xf32>
    %c0_2 = arith.constant 0 : index
    %c0_3 = arith.constant 0 : index
    %4 = vector.load %arg2[%c0_2, %c0_3] : memref<16x16xf32, #tpu.memory_space<vmem>>, vector<16x16xf32>
    %c0_4 = arith.constant 0 : index
    %c0_5 = arith.constant 0 : index
    %c0_6 = arith.constant 0 : index
    %5 = vector.load %arg3[%c0_4, %c0_5, %c0_6] : memref<1x128x384xbf16, #tpu.memory_space<vmem>>, vector<1x128x384xbf16>
    %6 = vector.shape_cast %5 : vector<1x128x384xbf16> to vector<128x384xbf16>
    %7 = arith.truncf %3 : vector<16x128xf32> to vector<16x128xbf16>
    %cst = arith.constant dense<0.000000e+00> : vector<16x384xf32>
    %8 = tpu.matmul %7, %6, %cst {dimension_numbers = #tpu.dot_dimension_numbers<[1], [0], [0], [1], [0, 0, 1, 1], [], []>} : vector<16x128xbf16>, vector<128x384xbf16>, vector<16x384xf32> -> vector<16x384xf32>
    %c0_7 = arith.constant 0 : index
    %c0_8 = arith.constant 0 : index
    %c0_9 = arith.constant 0 : index
    %9 = vector.load %arg4[%c0_7, %c0_8, %c0_9] : memref<1x1x384xf32, #tpu.memory_space<vmem>>, vector<1x1x384xf32>
    %10 = vector.shape_cast %9 : vector<1x1x384xf32> to vector<1x384xf32>
    %11 = vector.broadcast %10 : vector<1x384xf32> to vector<16x384xf32>
    %12 = arith.addf %8, %11 : vector<16x384xf32>
    %13 = vector.extract_strided_slice %12 {offsets = [0, 0], sizes = [16, 128], strides = [1, 1]} : vector<16x384xf32> to vector<16x128xf32>
    %14 = vector.extract_strided_slice %12 {offsets = [0, 128], sizes = [16, 128], strides = [1, 1]} : vector<16x384xf32> to vector<16x128xf32>
    %15 = vector.extract_strided_slice %12 {offsets = [0, 256], sizes = [16, 128], strides = [1, 1]} : vector<16x384xf32> to vector<16x128xf32>
    %c0_10 = arith.constant 0 : index
    %c0_11 = arith.constant 0 : index
    %c0_12 = arith.constant 0 : index
    %16 = vector.load %arg5[%c0_10, %c0_11, %c0_12] : memref<1x128x128xbf16, #tpu.memory_space<vmem>>, vector<1x128x128xbf16>
    %17 = vector.shape_cast %16 : vector<1x128x128xbf16> to vector<128x128xbf16>
    %c0_13 = arith.constant 0 : index
    %c0_14 = arith.constant 0 : index
    %c0_15 = arith.constant 0 : index
    %18 = vector.load %arg6[%c0_13, %c0_14, %c0_15] : memref<1x1x128xf32, #tpu.memory_space<vmem>>, vector<1x1x128xf32>
    %19 = vector.shape_cast %18 : vector<1x1x128xf32> to vector<1x128xf32>
    %cst_16 = arith.constant 0.000000e+00 : f32
    %20 = vector.broadcast %cst_16 : f32 to vector<16x128xf32>
    %21 = vector.extract_strided_slice %13 {offsets = [0, 0], sizes = [16, 32], strides = [1, 1]} : vector<16x128xf32> to vector<16x32xf32>
    %22 = arith.truncf %21 : vector<16x32xf32> to vector<16x32xbf16>
    %23 = vector.extract_strided_slice %14 {offsets = [0, 0], sizes = [16, 32], strides = [1, 1]} : vector<16x128xf32> to vector<16x32xf32>
    %24 = arith.truncf %23 : vector<16x32xf32> to vector<16x32xbf16>
    %cst_17 = arith.constant dense<0.000000e+00> : vector<16x16xf32>
    %25 = tpu.matmul %22, %24, %cst_17 {dimension_numbers = #tpu.dot_dimension_numbers<[1], [1], [0], [0], [0, 0, 1, 0], [], []>} : vector<16x32xbf16>, vector<16x32xbf16>, vector<16x16xf32> -> vector<16x16xf32>
    %cst_18 = arith.constant 0.176776692 : f32
    %26 = vector.broadcast %cst_18 : f32 to vector<16x16xf32>
    %27 = arith.mulf %25, %26 : vector<16x16xf32>
    %28 = arith.addf %27, %4 : vector<16x16xf32>
    %cst_19 = arith.constant dense<0xFF800000> : vector<16xf32>
    %29 = vector.multi_reduction <maximumf>, %28, %cst_19 [1] : vector<16x16xf32> to vector<16xf32>
    %30 = vector.shape_cast %29 : vector<16xf32> to vector<16x1xf32>
    %31 = vector.broadcast %30 : vector<16x1xf32> to vector<16x16xf32>
    %32 = arith.subf %28, %31 : vector<16x16xf32>
    %33 = math.exp %32 : vector<16x16xf32>
    %cst_20 = arith.constant dense<0.000000e+00> : vector<16xf32>
    %34 = vector.multi_reduction <add>, %33, %cst_20 [1] : vector<16x16xf32> to vector<16xf32>
    %35 = vector.shape_cast %34 : vector<16xf32> to vector<16x1xf32>
    %36 = tpu.reciprocal %35 {approx = true} : vector<16x1xf32> -> vector<16x1xf32>
    %37 = vector.broadcast %36 : vector<16x1xf32> to vector<16x16xf32>
    %38 = arith.mulf %33, %37 : vector<16x16xf32>
    %39 = vector.extract_strided_slice %15 {offsets = [0, 0], sizes = [16, 32], strides = [1, 1]} : vector<16x128xf32> to vector<16x32xf32>
    %40 = arith.truncf %38 : vector<16x16xf32> to vector<16x16xbf16>
    %41 = arith.truncf %39 : vector<16x32xf32> to vector<16x32xbf16>
    %cst_21 = arith.constant dense<0.000000e+00> : vector<16x32xf32>
    %42 = tpu.matmul %40, %41, %cst_21 {dimension_numbers = #tpu.dot_dimension_numbers<[1], [0], [0], [1], [0, 0, 1, 1], [], []>} : vector<16x16xbf16>, vector<16x32xbf16>, vector<16x32xf32> -> vector<16x32xf32>
    %43 = vector.extract_strided_slice %17 {offsets = [0, 0], sizes = [32, 128], strides = [1, 1]} : vector<128x128xbf16> to vector<32x128xbf16>
    %44 = arith.truncf %42 : vector<16x32xf32> to vector<16x32xbf16>
    %cst_22 = arith.constant dense<0.000000e+00> : vector<16x128xf32>
    %45 = tpu.matmul %44, %43, %cst_22 {dimension_numbers = #tpu.dot_dimension_numbers<[1], [0], [0], [1], [0, 0, 1, 1], [], []>} : vector<16x32xbf16>, vector<32x128xbf16>, vector<16x128xf32> -> vector<16x128xf32>
    %46 = arith.addf %20, %45 : vector<16x128xf32>
    %47 = vector.extract_strided_slice %13 {offsets = [0, 32], sizes = [16, 32], strides = [1, 1]} : vector<16x128xf32> to vector<16x32xf32>
    %48 = arith.truncf %47 : vector<16x32xf32> to vector<16x32xbf16>
    %49 = vector.extract_strided_slice %14 {offsets = [0, 32], sizes = [16, 32], strides = [1, 1]} : vector<16x128xf32> to vector<16x32xf32>
    %50 = arith.truncf %49 : vector<16x32xf32> to vector<16x32xbf16>
    %cst_23 = arith.constant dense<0.000000e+00> : vector<16x16xf32>
    %51 = tpu.matmul %48, %50, %cst_23 {dimension_numbers = #tpu.dot_dimension_numbers<[1], [1], [0], [0], [0, 0, 1, 0], [], []>} : vector<16x32xbf16>, vector<16x32xbf16>, vector<16x16xf32> -> vector<16x16xf32>
    %cst_24 = arith.constant 0.176776692 : f32
    %52 = vector.broadcast %cst_24 : f32 to vector<16x16xf32>
    %53 = arith.mulf %51, %52 : vector<16x16xf32>
    %54 = arith.addf %53, %4 : vector<16x16xf32>
    %cst_25 = arith.constant dense<0xFF800000> : vector<16xf32>
    %55 = vector.multi_reduction <maximumf>, %54, %cst_25 [1] : vector<16x16xf32> to vector<16xf32>
    %56 = vector.shape_cast %55 : vector<16xf32> to vector<16x1xf32>
    %57 = vector.broadcast %56 : vector<16x1xf32> to vector<16x16xf32>
    %58 = arith.subf %54, %57 : vector<16x16xf32>
    %59 = math.exp %58 : vector<16x16xf32>
    %cst_26 = arith.constant dense<0.000000e+00> : vector<16xf32>
    %60 = vector.multi_reduction <add>, %59, %cst_26 [1] : vector<16x16xf32> to vector<16xf32>
    %61 = vector.shape_cast %60 : vector<16xf32> to vector<16x1xf32>
    %62 = tpu.reciprocal %61 {approx = true} : vector<16x1xf32> -> vector<16x1xf32>
    %63 = vector.broadcast %62 : vector<16x1xf32> to vector<16x16xf32>
    %64 = arith.mulf %59, %63 : vector<16x16xf32>
    %65 = vector.extract_strided_slice %15 {offsets = [0, 32], sizes = [16, 32], strides = [1, 1]} : vector<16x128xf32> to vector<16x32xf32>
    %66 = arith.truncf %64 : vector<16x16xf32> to vector<16x16xbf16>
    %67 = arith.truncf %65 : vector<16x32xf32> to vector<16x32xbf16>
    %cst_27 = arith.constant dense<0.000000e+00> : vector<16x32xf32>
    %68 = tpu.matmul %66, %67, %cst_27 {dimension_numbers = #tpu.dot_dimension_numbers<[1], [0], [0], [1], [0, 0, 1, 1], [], []>} : vector<16x16xbf16>, vector<16x32xbf16>, vector<16x32xf32> -> vector<16x32xf32>
    %69 = vector.extract_strided_slice %17 {offsets = [32, 0], sizes = [32, 128], strides = [1, 1]} : vector<128x128xbf16> to vector<32x128xbf16>
    %70 = arith.truncf %68 : vector<16x32xf32> to vector<16x32xbf16>
    %cst_28 = arith.constant dense<0.000000e+00> : vector<16x128xf32>
    %71 = tpu.matmul %70, %69, %cst_28 {dimension_numbers = #tpu.dot_dimension_numbers<[1], [0], [0], [1], [0, 0, 1, 1], [], []>} : vector<16x32xbf16>, vector<32x128xbf16>, vector<16x128xf32> -> vector<16x128xf32>
    %72 = arith.addf %46, %71 : vector<16x128xf32>
    %73 = vector.extract_strided_slice %13 {offsets = [0, 64], sizes = [16, 32], strides = [1, 1]} : vector<16x128xf32> to vector<16x32xf32>
    %74 = arith.truncf %73 : vector<16x32xf32> to vector<16x32xbf16>
    %75 = vector.extract_strided_slice %14 {offsets = [0, 64], sizes = [16, 32], strides = [1, 1]} : vector<16x128xf32> to vector<16x32xf32>
    %76 = arith.truncf %75 : vector<16x32xf32> to vector<16x32xbf16>
    %cst_29 = arith.constant dense<0.000000e+00> : vector<16x16xf32>
    %77 = tpu.matmul %74, %76, %cst_29 {dimension_numbers = #tpu.dot_dimension_numbers<[1], [1], [0], [0], [0, 0, 1, 0], [], []>} : vector<16x32xbf16>, vector<16x32xbf16>, vector<16x16xf32> -> vector<16x16xf32>
    %cst_30 = arith.constant 0.176776692 : f32
    %78 = vector.broadcast %cst_30 : f32 to vector<16x16xf32>
    %79 = arith.mulf %77, %78 : vector<16x16xf32>
    %80 = arith.addf %79, %4 : vector<16x16xf32>
    %cst_31 = arith.constant dense<0xFF800000> : vector<16xf32>
    %81 = vector.multi_reduction <maximumf>, %80, %cst_31 [1] : vector<16x16xf32> to vector<16xf32>
    %82 = vector.shape_cast %81 : vector<16xf32> to vector<16x1xf32>
    %83 = vector.broadcast %82 : vector<16x1xf32> to vector<16x16xf32>
    %84 = arith.subf %80, %83 : vector<16x16xf32>
    %85 = math.exp %84 : vector<16x16xf32>
    %cst_32 = arith.constant dense<0.000000e+00> : vector<16xf32>
    %86 = vector.multi_reduction <add>, %85, %cst_32 [1] : vector<16x16xf32> to vector<16xf32>
    %87 = vector.shape_cast %86 : vector<16xf32> to vector<16x1xf32>
    %88 = tpu.reciprocal %87 {approx = true} : vector<16x1xf32> -> vector<16x1xf32>
    %89 = vector.broadcast %88 : vector<16x1xf32> to vector<16x16xf32>
    %90 = arith.mulf %85, %89 : vector<16x16xf32>
    %91 = vector.extract_strided_slice %15 {offsets = [0, 64], sizes = [16, 32], strides = [1, 1]} : vector<16x128xf32> to vector<16x32xf32>
    %92 = arith.truncf %90 : vector<16x16xf32> to vector<16x16xbf16>
    %93 = arith.truncf %91 : vector<16x32xf32> to vector<16x32xbf16>
    %cst_33 = arith.constant dense<0.000000e+00> : vector<16x32xf32>
    %94 = tpu.matmul %92, %93, %cst_33 {dimension_numbers = #tpu.dot_dimension_numbers<[1], [0], [0], [1], [0, 0, 1, 1], [], []>} : vector<16x16xbf16>, vector<16x32xbf16>, vector<16x32xf32> -> vector<16x32xf32>
    %95 = vector.extract_strided_slice %17 {offsets = [64, 0], sizes = [32, 128], strides = [1, 1]} : vector<128x128xbf16> to vector<32x128xbf16>
    %96 = arith.truncf %94 : vector<16x32xf32> to vector<16x32xbf16>
    %cst_34 = arith.constant dense<0.000000e+00> : vector<16x128xf32>
    %97 = tpu.matmul %96, %95, %cst_34 {dimension_numbers = #tpu.dot_dimension_numbers<[1], [0], [0], [1], [0, 0, 1, 1], [], []>} : vector<16x32xbf16>, vector<32x128xbf16>, vector<16x128xf32> -> vector<16x128xf32>
    %98 = arith.addf %72, %97 : vector<16x128xf32>
    %99 = vector.extract_strided_slice %13 {offsets = [0, 96], sizes = [16, 32], strides = [1, 1]} : vector<16x128xf32> to vector<16x32xf32>
    %100 = arith.truncf %99 : vector<16x32xf32> to vector<16x32xbf16>
    %101 = vector.extract_strided_slice %14 {offsets = [0, 96], sizes = [16, 32], strides = [1, 1]} : vector<16x128xf32> to vector<16x32xf32>
    %102 = arith.truncf %101 : vector<16x32xf32> to vector<16x32xbf16>
    %cst_35 = arith.constant dense<0.000000e+00> : vector<16x16xf32>
    %103 = tpu.matmul %100, %102, %cst_35 {dimension_numbers = #tpu.dot_dimension_numbers<[1], [1], [0], [0], [0, 0, 1, 0], [], []>} : vector<16x32xbf16>, vector<16x32xbf16>, vector<16x16xf32> -> vector<16x16xf32>
    %cst_36 = arith.constant 0.176776692 : f32
    %104 = vector.broadcast %cst_36 : f32 to vector<16x16xf32>
    %105 = arith.mulf %103, %104 : vector<16x16xf32>
    %106 = arith.addf %105, %4 : vector<16x16xf32>
    %cst_37 = arith.constant dense<0xFF800000> : vector<16xf32>
    %107 = vector.multi_reduction <maximumf>, %106, %cst_37 [1] : vector<16x16xf32> to vector<16xf32>
    %108 = vector.shape_cast %107 : vector<16xf32> to vector<16x1xf32>
    %109 = vector.broadcast %108 : vector<16x1xf32> to vector<16x16xf32>
    %110 = arith.subf %106, %109 : vector<16x16xf32>
    %111 = math.exp %110 : vector<16x16xf32>
    %cst_38 = arith.constant dense<0.000000e+00> : vector<16xf32>
    %112 = vector.multi_reduction <add>, %111, %cst_38 [1] : vector<16x16xf32> to vector<16xf32>
    %113 = vector.shape_cast %112 : vector<16xf32> to vector<16x1xf32>
    %114 = tpu.reciprocal %113 {approx = true} : vector<16x1xf32> -> vector<16x1xf32>
    %115 = vector.broadcast %114 : vector<16x1xf32> to vector<16x16xf32>
    %116 = arith.mulf %111, %115 : vector<16x16xf32>
    %117 = vector.extract_strided_slice %15 {offsets = [0, 96], sizes = [16, 32], strides = [1, 1]} : vector<16x128xf32> to vector<16x32xf32>
    %118 = arith.truncf %116 : vector<16x16xf32> to vector<16x16xbf16>
    %119 = arith.truncf %117 : vector<16x32xf32> to vector<16x32xbf16>
    %cst_39 = arith.constant dense<0.000000e+00> : vector<16x32xf32>
    %120 = tpu.matmul %118, %119, %cst_39 {dimension_numbers = #tpu.dot_dimension_numbers<[1], [0], [0], [1], [0, 0, 1, 1], [], []>} : vector<16x16xbf16>, vector<16x32xbf16>, vector<16x32xf32> -> vector<16x32xf32>
    %121 = vector.extract_strided_slice %17 {offsets = [96, 0], sizes = [32, 128], strides = [1, 1]} : vector<128x128xbf16> to vector<32x128xbf16>
    %122 = arith.truncf %120 : vector<16x32xf32> to vector<16x32xbf16>
    %cst_40 = arith.constant dense<0.000000e+00> : vector<16x128xf32>
    %123 = tpu.matmul %122, %121, %cst_40 {dimension_numbers = #tpu.dot_dimension_numbers<[1], [0], [0], [1], [0, 0, 1, 1], [], []>} : vector<16x32xbf16>, vector<32x128xbf16>, vector<16x128xf32> -> vector<16x128xf32>
    %124 = arith.addf %98, %123 : vector<16x128xf32>
    %125 = vector.broadcast %19 : vector<1x128xf32> to vector<16x128xf32>
    %126 = arith.addf %124, %125 : vector<16x128xf32>
    %c0_41 = arith.constant 0 : index
    %c0_42 = arith.constant 0 : index
    %c0_43 = arith.constant 0 : index
    %127 = vector.load %arg7[%c0_41, %c0_42, %c0_43] : memref<1x1x128xf32, #tpu.memory_space<vmem>>, vector<1x1x128xf32>
    %128 = vector.shape_cast %127 : vector<1x1x128xf32> to vector<1x128xf32>
    %c0_44 = arith.constant 0 : index
    %c0_45 = arith.constant 0 : index
    %c0_46 = arith.constant 0 : index
    %129 = vector.load %arg8[%c0_44, %c0_45, %c0_46] : memref<1x1x128xf32, #tpu.memory_space<vmem>>, vector<1x1x128xf32>
    %130 = vector.shape_cast %129 : vector<1x1x128xf32> to vector<1x128xf32>
    %131 = arith.addf %3, %126 : vector<16x128xf32>
    %cst_47 = arith.constant dense<0.000000e+00> : vector<16xf32>
    %132 = vector.multi_reduction <add>, %131, %cst_47 [1] : vector<16x128xf32> to vector<16xf32>
    %133 = vector.shape_cast %132 : vector<16xf32> to vector<16x1xf32>
    %cst_48 = arith.constant 1.280000e+02 : f32
    %134 = vector.broadcast %cst_48 : f32 to vector<16x1xf32>
    %135 = arith.divf %133, %134 : vector<16x1xf32>
    %136 = vector.broadcast %135 : vector<16x1xf32> to vector<16x128xf32>
    %137 = arith.subf %131, %136 : vector<16x128xf32>
    %138 = arith.mulf %137, %137 : vector<16x128xf32>
    %cst_49 = arith.constant dense<0.000000e+00> : vector<16xf32>
    %139 = vector.multi_reduction <add>, %138, %cst_49 [1] : vector<16x128xf32> to vector<16xf32>
    %140 = vector.shape_cast %139 : vector<16xf32> to vector<16x1xf32>
    %cst_50 = arith.constant 1.280000e+02 : f32
    %141 = vector.broadcast %cst_50 : f32 to vector<16x1xf32>
    %142 = arith.divf %140, %141 : vector<16x1xf32>
    %143 = vector.broadcast %135 : vector<16x1xf32> to vector<16x128xf32>
    %144 = arith.subf %131, %143 : vector<16x128xf32>
    %cst_51 = arith.constant 9.99999974E-6 : f32
    %145 = vector.broadcast %cst_51 : f32 to vector<16x1xf32>
    %146 = arith.addf %142, %145 : vector<16x1xf32>
    %147 = math.rsqrt %146 : vector<16x1xf32>
    %148 = vector.broadcast %147 : vector<16x1xf32> to vector<16x128xf32>
    %149 = arith.mulf %144, %148 : vector<16x128xf32>
    %150 = vector.broadcast %128 : vector<1x128xf32> to vector<16x128xf32>
    %151 = arith.mulf %149, %150 : vector<16x128xf32>
    %152 = vector.broadcast %130 : vector<1x128xf32> to vector<16x128xf32>
    %153 = arith.addf %151, %152 : vector<16x128xf32>
    %c0_52 = arith.constant 0 : index
    %c0_53 = arith.constant 0 : index
    %c0_54 = arith.constant 0 : index
    %154 = vector.load %arg9[%c0_52, %c0_53, %c0_54] : memref<1x128x128xbf16, #tpu.memory_space<vmem>>, vector<1x128x128xbf16>
    %155 = vector.shape_cast %154 : vector<1x128x128xbf16> to vector<128x128xbf16>
    %156 = arith.truncf %153 : vector<16x128xf32> to vector<16x128xbf16>
    %cst_55 = arith.constant dense<0.000000e+00> : vector<16x128xf32>
    %157 = tpu.matmul %156, %155, %cst_55 {dimension_numbers = #tpu.dot_dimension_numbers<[1], [0], [0], [1], [0, 0, 1, 1], [], []>} : vector<16x128xbf16>, vector<128x128xbf16>, vector<16x128xf32> -> vector<16x128xf32>
    %c0_56 = arith.constant 0 : index
    %c0_57 = arith.constant 0 : index
    %c0_58 = arith.constant 0 : index
    %158 = vector.load %arg10[%c0_56, %c0_57, %c0_58] : memref<1x1x128xf32, #tpu.memory_space<vmem>>, vector<1x1x128xf32>
    %159 = vector.shape_cast %158 : vector<1x1x128xf32> to vector<1x128xf32>
    %160 = vector.broadcast %159 : vector<1x128xf32> to vector<16x128xf32>
    %161 = arith.addf %157, %160 : vector<16x128xf32>
    %cst_59 = arith.constant 0.000000e+00 : f32
    %162 = vector.broadcast %cst_59 : f32 to vector<16x128xf32>
    %163 = arith.maximumf %161, %162 : vector<16x128xf32>
    %c0_60 = arith.constant 0 : index
    %c0_61 = arith.constant 0 : index
    %c0_62 = arith.constant 0 : index
    %164 = vector.load %arg11[%c0_60, %c0_61, %c0_62] : memref<1x128x128xbf16, #tpu.memory_space<vmem>>, vector<1x128x128xbf16>
    %165 = vector.shape_cast %164 : vector<1x128x128xbf16> to vector<128x128xbf16>
    %166 = arith.truncf %163 : vector<16x128xf32> to vector<16x128xbf16>
    %cst_63 = arith.constant dense<0.000000e+00> : vector<16x128xf32>
    %167 = tpu.matmul %166, %165, %cst_63 {dimension_numbers = #tpu.dot_dimension_numbers<[1], [0], [0], [1], [0, 0, 1, 1], [], []>} : vector<16x128xbf16>, vector<128x128xbf16>, vector<16x128xf32> -> vector<16x128xf32>
    %c0_64 = arith.constant 0 : index
    %c0_65 = arith.constant 0 : index
    %c0_66 = arith.constant 0 : index
    %168 = vector.load %arg12[%c0_64, %c0_65, %c0_66] : memref<1x1x128xf32, #tpu.memory_space<vmem>>, vector<1x1x128xf32>
    %169 = vector.shape_cast %168 : vector<1x1x128xf32> to vector<1x128xf32>
    %170 = vector.broadcast %169 : vector<1x128xf32> to vector<16x128xf32>
    %171 = arith.addf %167, %170 : vector<16x128xf32>
    %c0_67 = arith.constant 0 : index
    %c0_68 = arith.constant 0 : index
    %c0_69 = arith.constant 0 : index
    %172 = vector.load %arg13[%c0_67, %c0_68, %c0_69] : memref<1x1x128xf32, #tpu.memory_space<vmem>>, vector<1x1x128xf32>
    %173 = vector.shape_cast %172 : vector<1x1x128xf32> to vector<1x128xf32>
    %c0_70 = arith.constant 0 : index
    %c0_71 = arith.constant 0 : index
    %c0_72 = arith.constant 0 : index
    %174 = vector.load %arg14[%c0_70, %c0_71, %c0_72] : memref<1x1x128xf32, #tpu.memory_space<vmem>>, vector<1x1x128xf32>
    %175 = vector.shape_cast %174 : vector<1x1x128xf32> to vector<1x128xf32>
    %176 = arith.addf %153, %171 : vector<16x128xf32>
    %cst_73 = arith.constant dense<0.000000e+00> : vector<16xf32>
    %177 = vector.multi_reduction <add>, %176, %cst_73 [1] : vector<16x128xf32> to vector<16xf32>
    %178 = vector.shape_cast %177 : vector<16xf32> to vector<16x1xf32>
    %cst_74 = arith.constant 1.280000e+02 : f32
    %179 = vector.broadcast %cst_74 : f32 to vector<16x1xf32>
    %180 = arith.divf %178, %179 : vector<16x1xf32>
    %181 = vector.broadcast %180 : vector<16x1xf32> to vector<16x128xf32>
    %182 = arith.subf %176, %181 : vector<16x128xf32>
    %183 = arith.mulf %182, %182 : vector<16x128xf32>
    %cst_75 = arith.constant dense<0.000000e+00> : vector<16xf32>
    %184 = vector.multi_reduction <add>, %183, %cst_75 [1] : vector<16x128xf32> to vector<16xf32>
    %185 = vector.shape_cast %184 : vector<16xf32> to vector<16x1xf32>
    %cst_76 = arith.constant 1.280000e+02 : f32
    %186 = vector.broadcast %cst_76 : f32 to vector<16x1xf32>
    %187 = arith.divf %185, %186 : vector<16x1xf32>
    %188 = vector.broadcast %180 : vector<16x1xf32> to vector<16x128xf32>
    %189 = arith.subf %176, %188 : vector<16x128xf32>
    %cst_77 = arith.constant 9.99999974E-6 : f32
    %190 = vector.broadcast %cst_77 : f32 to vector<16x1xf32>
    %191 = arith.addf %187, %190 : vector<16x1xf32>
    %192 = math.rsqrt %191 : vector<16x1xf32>
    %193 = vector.broadcast %192 : vector<16x1xf32> to vector<16x128xf32>
    %194 = arith.mulf %189, %193 : vector<16x128xf32>
    %195 = vector.broadcast %173 : vector<1x128xf32> to vector<16x128xf32>
    %196 = arith.mulf %194, %195 : vector<16x128xf32>
    %197 = vector.broadcast %175 : vector<1x128xf32> to vector<16x128xf32>
    %198 = arith.addf %196, %197 : vector<16x128xf32>
    %c0_78 = arith.constant 0 : index
    %c0_79 = arith.constant 0 : index
    %199 = vector.load %arg16[%c0_78, %c0_79] : memref<16x128xf32, #tpu.memory_space<vmem>>, vector<16x128xf32>
    tpu.vector_store %arg16[%c0_78, %c0_79], %198 {strides = array<i32>} : memref<16x128xf32, #tpu.memory_space<vmem>>, vector<16x128xf32>,
    %c3_i32 = arith.constant 3 : i32
    %200 = arith.cmpi eq, %arg0, %c3_i32 : i32
    %201 = arith.extui %200 : i1 to i32
    %c0_i32_80 = arith.constant 0 : i32
    %202 = arith.cmpi ne, %201, %c0_i32_80 : i32
    scf.if %202 {
      %c0_81 = arith.constant 0 : index
      %c0_82 = arith.constant 0 : index
      %203 = vector.load %arg15[%c0_81, %c0_82] : memref<16x128xf32, #tpu.memory_space<vmem>>, vector<16x128xf32>
      tpu.vector_store %arg15[%c0_81, %c0_82], %198 {strides = array<i32>} : memref<16x128xf32, #tpu.memory_space<vmem>>, vector<16x128xf32>,
    } else {
    }
    return
  }
  func.func @transform_0(%arg0: i32) -> (i32, i32) {
    %c0_i32 = arith.constant 0 : i32
    %c0_i32_0 = arith.constant 0 : i32
    %c0_i32_1 = arith.constant 0 : i32
    return %c0_i32, %c0_i32_0 : i32, i32
  }
  func.func @transform_1(%arg0: i32) -> (i32, i32) {
    %c0_i32 = arith.constant 0 : i32
    %c0_i32_0 = arith.constant 0 : i32
    %c0_i32_1 = arith.constant 0 : i32
    return %c0_i32, %c0_i32_0 : i32, i32
  }
  func.func @transform_2(%arg0: i32) -> (i32, i32, i32) {
    %c0_i32 = arith.constant 0 : i32
    %c0_i32_0 = arith.constant 0 : i32
    %c0_i32_1 = arith.constant 0 : i32
    return %arg0, %c0_i32, %c0_i32_0 : i32, i32, i32
  }
  func.func @transform_3(%arg0: i32) -> (i32, i32, i32) {
    %c0_i32 = arith.constant 0 : i32
    %c0_i32_0 = arith.constant 0 : i32
    %c0_i32_1 = arith.constant 0 : i32
    return %arg0, %c0_i32, %c0_i32_0 : i32, i32, i32
  }
  func.func @transform_4(%arg0: i32) -> (i32, i32, i32) {
    %c0_i32 = arith.constant 0 : i32
    %c0_i32_0 = arith.constant 0 : i32
    %c0_i32_1 = arith.constant 0 : i32
    return %arg0, %c0_i32, %c0_i32_0 : i32, i32, i32
  }
  func.func @transform_5(%arg0: i32) -> (i32, i32, i32) {
    %c0_i32 = arith.constant 0 : i32
    %c0_i32_0 = arith.constant 0 : i32
    %c0_i32_1 = arith.constant 0 : i32
    return %arg0, %c0_i32, %c0_i32_0 : i32, i32, i32
  }
  func.func @transform_6(%arg0: i32) -> (i32, i32, i32) {
    %c0_i32 = arith.constant 0 : i32
    %c0_i32_0 = arith.constant 0 : i32
    %c0_i32_1 = arith.constant 0 : i32
    return %arg0, %c0_i32, %c0_i32_0 : i32, i32, i32
  }
  func.func @transform_7(%arg0: i32) -> (i32, i32, i32) {
    %c0_i32 = arith.constant 0 : i32
    %c0_i32_0 = arith.constant 0 : i32
    %c0_i32_1 = arith.constant 0 : i32
    return %arg0, %c0_i32, %c0_i32_0 : i32, i32, i32
  }
  func.func @transform_8(%arg0: i32) -> (i32, i32, i32) {
    %c0_i32 = arith.constant 0 : i32
    %c0_i32_0 = arith.constant 0 : i32
    %c0_i32_1 = arith.constant 0 : i32
    return %arg0, %c0_i32, %c0_i32_0 : i32, i32, i32
  }
  func.func @transform_9(%arg0: i32) -> (i32, i32, i32) {
    %c0_i32 = arith.constant 0 : i32
    %c0_i32_0 = arith.constant 0 : i32
    %c0_i32_1 = arith.constant 0 : i32
    return %arg0, %c0_i32, %c0_i32_0 : i32, i32, i32
  }
  func.func @transform_10(%arg0: i32) -> (i32, i32, i32) {
    %c0_i32 = arith.constant 0 : i32
    %c0_i32_0 = arith.constant 0 : i32
    %c0_i32_1 = arith.constant 0 : i32
    return %arg0, %c0_i32, %c0_i32_0 : i32, i32, i32
  }
  func.func @transform_11(%arg0: i32) -> (i32, i32, i32) {
    %c0_i32 = arith.constant 0 : i32
    %c0_i32_0 = arith.constant 0 : i32
    %c0_i32_1 = arith.constant 0 : i32
    return %arg0, %c0_i32, %c0_i32_0 : i32, i32, i32
  }
  func.func @transform_12(%arg0: i32) -> (i32, i32, i32) {
    %c0_i32 = arith.constant 0 : i32
    %c0_i32_0 = arith.constant 0 : i32
    %c0_i32_1 = arith.constant 0 : i32
    return %arg0, %c0_i32, %c0_i32_0 : i32, i32, i32
  }
  func.func @transform_13(%arg0: i32) -> (i32, i32, i32) {
    %c0_i32 = arith.constant 0 : i32
    %c0_i32_0 = arith.constant 0 : i32
    %c0_i32_1 = arith.constant 0 : i32
    return %arg0, %c0_i32, %c0_i32_0 : i32, i32, i32
  }
  func.func @transform_14(%arg0: i32) -> (i32, i32) {
    %c0_i32 = arith.constant 0 : i32
    %c0_i32_0 = arith.constant 0 : i32
    %c0_i32_1 = arith.constant 0 : i32
    return %c0_i32, %c0_i32_0 : i32, i32
  }
}

module attributes {stable_mosaic.version = 11 : i64} {
  func.func @_decoder_stack_kernel(%arg0: i32, %arg1: memref<16x128xf32, #tpu.memory_space<vmem>>, %arg2: memref<16x128xf32, #tpu.memory_space<vmem>>, %arg3: memref<16x16xf32, #tpu.memory_space<vmem>>, %arg4: memref<16x16xf32, #tpu.memory_space<vmem>>, %arg5: memref<1x128x384xbf16, #tpu.memory_space<vmem>>, %arg6: memref<1x1x384xf32, #tpu.memory_space<vmem>>, %arg7: memref<1x128x128xbf16, #tpu.memory_space<vmem>>, %arg8: memref<1x1x128xf32, #tpu.memory_space<vmem>>, %arg9: memref<1x1x128xf32, #tpu.memory_space<vmem>>, %arg10: memref<1x1x128xf32, #tpu.memory_space<vmem>>, %arg11: memref<1x128x128xbf16, #tpu.memory_space<vmem>>, %arg12: memref<1x1x128xf32, #tpu.memory_space<vmem>>, %arg13: memref<1x128x256xbf16, #tpu.memory_space<vmem>>, %arg14: memref<1x1x256xf32, #tpu.memory_space<vmem>>, %arg15: memref<1x128x128xbf16, #tpu.memory_space<vmem>>, %arg16: memref<1x1x128xf32, #tpu.memory_space<vmem>>, %arg17: memref<1x1x128xf32, #tpu.memory_space<vmem>>, %arg18: memref<1x1x128xf32, #tpu.memory_space<vmem>>, %arg19: memref<1x128x128xbf16, #tpu.memory_space<vmem>>, %arg20: memref<1x1x128xf32, #tpu.memory_space<vmem>>, %arg21: memref<1x128x128xbf16, #tpu.memory_space<vmem>>, %arg22: memref<1x1x128xf32, #tpu.memory_space<vmem>>, %arg23: memref<1x1x128xf32, #tpu.memory_space<vmem>>, %arg24: memref<1x1x128xf32, #tpu.memory_space<vmem>>, %arg25: memref<128x128xbf16, #tpu.memory_space<vmem>>, %arg26: memref<1x128xf32, #tpu.memory_space<vmem>>, %arg27: memref<16x128xf32, #tpu.memory_space<vmem>>, %arg28: memref<16x128xf32, #tpu.memory_space<vmem>>) attributes {dimension_semantics = [#tpu.dimension_semantics<arbitrary>], iteration_bounds = array<i64: 4>, scalar_prefetch = 0 : i64, scratch_operands = 1 : i64, tpu.core_type = #tpu.core_type<tc>, window_params = [{pipeline_mode = #tpu.pipeline_mode<synchronous>, transform_indices = @transform_0, window_bounds = array<i64: 16, 128>}, {pipeline_mode = #tpu.pipeline_mode<synchronous>, transform_indices = @transform_1, window_bounds = array<i64: 16, 128>}, {pipeline_mode = #tpu.pipeline_mode<synchronous>, transform_indices = @transform_2, window_bounds = array<i64: 16, 16>}, {pipeline_mode = #tpu.pipeline_mode<synchronous>, transform_indices = @transform_3, window_bounds = array<i64: 16, 16>}, {transform_indices = @transform_4, window_bounds = array<i64: 1, 128, 384>}, {transform_indices = @transform_5, window_bounds = array<i64: 1, 1, 384>}, {transform_indices = @transform_6, window_bounds = array<i64: 1, 128, 128>}, {transform_indices = @transform_7, window_bounds = array<i64: 1, 1, 128>}, {transform_indices = @transform_8, window_bounds = array<i64: 1, 1, 128>}, {transform_indices = @transform_9, window_bounds = array<i64: 1, 1, 128>}, {transform_indices = @transform_10, window_bounds = array<i64: 1, 128, 128>}, {transform_indices = @transform_11, window_bounds = array<i64: 1, 1, 128>}, {transform_indices = @transform_12, window_bounds = array<i64: 1, 128, 256>}, {transform_indices = @transform_13, window_bounds = array<i64: 1, 1, 256>}, {transform_indices = @transform_14, window_bounds = array<i64: 1, 128, 128>}, {transform_indices = @transform_15, window_bounds = array<i64: 1, 1, 128>}, {transform_indices = @transform_16, window_bounds = array<i64: 1, 1, 128>}, {transform_indices = @transform_17, window_bounds = array<i64: 1, 1, 128>}, {transform_indices = @transform_18, window_bounds = array<i64: 1, 128, 128>}, {transform_indices = @transform_19, window_bounds = array<i64: 1, 1, 128>}, {transform_indices = @transform_20, window_bounds = array<i64: 1, 128, 128>}, {transform_indices = @transform_21, window_bounds = array<i64: 1, 1, 128>}, {transform_indices = @transform_22, window_bounds = array<i64: 1, 1, 128>}, {transform_indices = @transform_23, window_bounds = array<i64: 1, 1, 128>}, {pipeline_mode = #tpu.pipeline_mode<synchronous>, transform_indices = @transform_24, window_bounds = array<i64: 128, 128>}, {pipeline_mode = #tpu.pipeline_mode<synchronous>, transform_indices = @transform_25, window_bounds = array<i64: 1, 128>}, {pipeline_mode = #tpu.pipeline_mode<synchronous>, transform_indices = @transform_26, window_bounds = array<i64: 16, 128>}]} {
    %c0_i32 = arith.constant 0 : i32
    %0 = arith.cmpi eq, %arg0, %c0_i32 : i32
    %1 = arith.extui %0 : i1 to i32
    %c0_i32_0 = arith.constant 0 : i32
    %2 = arith.cmpi ne, %1, %c0_i32_0 : i32
    scf.if %2 {
      %c0_141 = arith.constant 0 : index
      %c0_142 = arith.constant 0 : index
      %361 = vector.load %arg1[%c0_141, %c0_142] : memref<16x128xf32, #tpu.memory_space<vmem>>, vector<16x128xf32>
      %c0_143 = arith.constant 0 : index
      %c0_144 = arith.constant 0 : index
      %362 = vector.load %arg28[%c0_143, %c0_144] : memref<16x128xf32, #tpu.memory_space<vmem>>, vector<16x128xf32>
      tpu.vector_store %arg28[%c0_143, %c0_144], %361 {strides = array<i32>} : memref<16x128xf32, #tpu.memory_space<vmem>>, vector<16x128xf32>,
    } else {
    }
    %c0 = arith.constant 0 : index
    %c0_1 = arith.constant 0 : index
    %3 = vector.load %arg28[%c0, %c0_1] : memref<16x128xf32, #tpu.memory_space<vmem>>, vector<16x128xf32>
    %c0_2 = arith.constant 0 : index
    %c0_3 = arith.constant 0 : index
    %4 = vector.load %arg2[%c0_2, %c0_3] : memref<16x128xf32, #tpu.memory_space<vmem>>, vector<16x128xf32>
    %c0_4 = arith.constant 0 : index
    %c0_5 = arith.constant 0 : index
    %5 = vector.load %arg3[%c0_4, %c0_5] : memref<16x16xf32, #tpu.memory_space<vmem>>, vector<16x16xf32>
    %c0_6 = arith.constant 0 : index
    %c0_7 = arith.constant 0 : index
    %6 = vector.load %arg4[%c0_6, %c0_7] : memref<16x16xf32, #tpu.memory_space<vmem>>, vector<16x16xf32>
    %c0_8 = arith.constant 0 : index
    %c0_9 = arith.constant 0 : index
    %c0_10 = arith.constant 0 : index
    %7 = vector.load %arg5[%c0_8, %c0_9, %c0_10] : memref<1x128x384xbf16, #tpu.memory_space<vmem>>, vector<1x128x384xbf16>
    %8 = vector.shape_cast %7 : vector<1x128x384xbf16> to vector<128x384xbf16>
    %9 = arith.truncf %3 : vector<16x128xf32> to vector<16x128xbf16>
    %cst = arith.constant dense<0.000000e+00> : vector<16x384xf32>
    %10 = tpu.matmul %9, %8, %cst {dimension_numbers = #tpu.dot_dimension_numbers<[1], [0], [0], [1], [0, 0, 1, 1], [], []>} : vector<16x128xbf16>, vector<128x384xbf16>, vector<16x384xf32> -> vector<16x384xf32>
    %c0_11 = arith.constant 0 : index
    %c0_12 = arith.constant 0 : index
    %c0_13 = arith.constant 0 : index
    %11 = vector.load %arg6[%c0_11, %c0_12, %c0_13] : memref<1x1x384xf32, #tpu.memory_space<vmem>>, vector<1x1x384xf32>
    %12 = vector.shape_cast %11 : vector<1x1x384xf32> to vector<1x384xf32>
    %13 = vector.broadcast %12 : vector<1x384xf32> to vector<16x384xf32>
    %14 = arith.addf %10, %13 : vector<16x384xf32>
    %15 = vector.extract_strided_slice %14 {offsets = [0, 0], sizes = [16, 128], strides = [1, 1]} : vector<16x384xf32> to vector<16x128xf32>
    %16 = vector.extract_strided_slice %14 {offsets = [0, 128], sizes = [16, 128], strides = [1, 1]} : vector<16x384xf32> to vector<16x128xf32>
    %17 = vector.extract_strided_slice %14 {offsets = [0, 256], sizes = [16, 128], strides = [1, 1]} : vector<16x384xf32> to vector<16x128xf32>
    %c0_14 = arith.constant 0 : index
    %c0_15 = arith.constant 0 : index
    %c0_16 = arith.constant 0 : index
    %18 = vector.load %arg7[%c0_14, %c0_15, %c0_16] : memref<1x128x128xbf16, #tpu.memory_space<vmem>>, vector<1x128x128xbf16>
    %19 = vector.shape_cast %18 : vector<1x128x128xbf16> to vector<128x128xbf16>
    %c0_17 = arith.constant 0 : index
    %c0_18 = arith.constant 0 : index
    %c0_19 = arith.constant 0 : index
    %20 = vector.load %arg8[%c0_17, %c0_18, %c0_19] : memref<1x1x128xf32, #tpu.memory_space<vmem>>, vector<1x1x128xf32>
    %21 = vector.shape_cast %20 : vector<1x1x128xf32> to vector<1x128xf32>
    %cst_20 = arith.constant 0.000000e+00 : f32
    %22 = vector.broadcast %cst_20 : f32 to vector<16x128xf32>
    %23 = vector.extract_strided_slice %15 {offsets = [0, 0], sizes = [16, 32], strides = [1, 1]} : vector<16x128xf32> to vector<16x32xf32>
    %24 = arith.truncf %23 : vector<16x32xf32> to vector<16x32xbf16>
    %25 = vector.extract_strided_slice %16 {offsets = [0, 0], sizes = [16, 32], strides = [1, 1]} : vector<16x128xf32> to vector<16x32xf32>
    %26 = arith.truncf %25 : vector<16x32xf32> to vector<16x32xbf16>
    %cst_21 = arith.constant dense<0.000000e+00> : vector<16x16xf32>
    %27 = tpu.matmul %24, %26, %cst_21 {dimension_numbers = #tpu.dot_dimension_numbers<[1], [1], [0], [0], [0, 0, 1, 0], [], []>} : vector<16x32xbf16>, vector<16x32xbf16>, vector<16x16xf32> -> vector<16x16xf32>
    %cst_22 = arith.constant 0.176776692 : f32
    %28 = vector.broadcast %cst_22 : f32 to vector<16x16xf32>
    %29 = arith.mulf %27, %28 : vector<16x16xf32>
    %30 = arith.addf %29, %5 : vector<16x16xf32>
    %cst_23 = arith.constant dense<0xFF800000> : vector<16xf32>
    %31 = vector.multi_reduction <maximumf>, %30, %cst_23 [1] : vector<16x16xf32> to vector<16xf32>
    %32 = vector.shape_cast %31 : vector<16xf32> to vector<16x1xf32>
    %33 = vector.broadcast %32 : vector<16x1xf32> to vector<16x16xf32>
    %34 = arith.subf %30, %33 : vector<16x16xf32>
    %35 = math.exp %34 : vector<16x16xf32>
    %cst_24 = arith.constant dense<0.000000e+00> : vector<16xf32>
    %36 = vector.multi_reduction <add>, %35, %cst_24 [1] : vector<16x16xf32> to vector<16xf32>
    %37 = vector.shape_cast %36 : vector<16xf32> to vector<16x1xf32>
    %38 = tpu.reciprocal %37 {approx = true} : vector<16x1xf32> -> vector<16x1xf32>
    %39 = vector.broadcast %38 : vector<16x1xf32> to vector<16x16xf32>
    %40 = arith.mulf %35, %39 : vector<16x16xf32>
    %41 = vector.extract_strided_slice %17 {offsets = [0, 0], sizes = [16, 32], strides = [1, 1]} : vector<16x128xf32> to vector<16x32xf32>
    %42 = arith.truncf %40 : vector<16x16xf32> to vector<16x16xbf16>
    %43 = arith.truncf %41 : vector<16x32xf32> to vector<16x32xbf16>
    %cst_25 = arith.constant dense<0.000000e+00> : vector<16x32xf32>
    %44 = tpu.matmul %42, %43, %cst_25 {dimension_numbers = #tpu.dot_dimension_numbers<[1], [0], [0], [1], [0, 0, 1, 1], [], []>} : vector<16x16xbf16>, vector<16x32xbf16>, vector<16x32xf32> -> vector<16x32xf32>
    %45 = vector.extract_strided_slice %19 {offsets = [0, 0], sizes = [32, 128], strides = [1, 1]} : vector<128x128xbf16> to vector<32x128xbf16>
    %46 = arith.truncf %44 : vector<16x32xf32> to vector<16x32xbf16>
    %cst_26 = arith.constant dense<0.000000e+00> : vector<16x128xf32>
    %47 = tpu.matmul %46, %45, %cst_26 {dimension_numbers = #tpu.dot_dimension_numbers<[1], [0], [0], [1], [0, 0, 1, 1], [], []>} : vector<16x32xbf16>, vector<32x128xbf16>, vector<16x128xf32> -> vector<16x128xf32>
    %48 = arith.addf %22, %47 : vector<16x128xf32>
    %49 = vector.extract_strided_slice %15 {offsets = [0, 32], sizes = [16, 32], strides = [1, 1]} : vector<16x128xf32> to vector<16x32xf32>
    %50 = arith.truncf %49 : vector<16x32xf32> to vector<16x32xbf16>
    %51 = vector.extract_strided_slice %16 {offsets = [0, 32], sizes = [16, 32], strides = [1, 1]} : vector<16x128xf32> to vector<16x32xf32>
    %52 = arith.truncf %51 : vector<16x32xf32> to vector<16x32xbf16>
    %cst_27 = arith.constant dense<0.000000e+00> : vector<16x16xf32>
    %53 = tpu.matmul %50, %52, %cst_27 {dimension_numbers = #tpu.dot_dimension_numbers<[1], [1], [0], [0], [0, 0, 1, 0], [], []>} : vector<16x32xbf16>, vector<16x32xbf16>, vector<16x16xf32> -> vector<16x16xf32>
    %cst_28 = arith.constant 0.176776692 : f32
    %54 = vector.broadcast %cst_28 : f32 to vector<16x16xf32>
    %55 = arith.mulf %53, %54 : vector<16x16xf32>
    %56 = arith.addf %55, %5 : vector<16x16xf32>
    %cst_29 = arith.constant dense<0xFF800000> : vector<16xf32>
    %57 = vector.multi_reduction <maximumf>, %56, %cst_29 [1] : vector<16x16xf32> to vector<16xf32>
    %58 = vector.shape_cast %57 : vector<16xf32> to vector<16x1xf32>
    %59 = vector.broadcast %58 : vector<16x1xf32> to vector<16x16xf32>
    %60 = arith.subf %56, %59 : vector<16x16xf32>
    %61 = math.exp %60 : vector<16x16xf32>
    %cst_30 = arith.constant dense<0.000000e+00> : vector<16xf32>
    %62 = vector.multi_reduction <add>, %61, %cst_30 [1] : vector<16x16xf32> to vector<16xf32>
    %63 = vector.shape_cast %62 : vector<16xf32> to vector<16x1xf32>
    %64 = tpu.reciprocal %63 {approx = true} : vector<16x1xf32> -> vector<16x1xf32>
    %65 = vector.broadcast %64 : vector<16x1xf32> to vector<16x16xf32>
    %66 = arith.mulf %61, %65 : vector<16x16xf32>
    %67 = vector.extract_strided_slice %17 {offsets = [0, 32], sizes = [16, 32], strides = [1, 1]} : vector<16x128xf32> to vector<16x32xf32>
    %68 = arith.truncf %66 : vector<16x16xf32> to vector<16x16xbf16>
    %69 = arith.truncf %67 : vector<16x32xf32> to vector<16x32xbf16>
    %cst_31 = arith.constant dense<0.000000e+00> : vector<16x32xf32>
    %70 = tpu.matmul %68, %69, %cst_31 {dimension_numbers = #tpu.dot_dimension_numbers<[1], [0], [0], [1], [0, 0, 1, 1], [], []>} : vector<16x16xbf16>, vector<16x32xbf16>, vector<16x32xf32> -> vector<16x32xf32>
    %71 = vector.extract_strided_slice %19 {offsets = [32, 0], sizes = [32, 128], strides = [1, 1]} : vector<128x128xbf16> to vector<32x128xbf16>
    %72 = arith.truncf %70 : vector<16x32xf32> to vector<16x32xbf16>
    %cst_32 = arith.constant dense<0.000000e+00> : vector<16x128xf32>
    %73 = tpu.matmul %72, %71, %cst_32 {dimension_numbers = #tpu.dot_dimension_numbers<[1], [0], [0], [1], [0, 0, 1, 1], [], []>} : vector<16x32xbf16>, vector<32x128xbf16>, vector<16x128xf32> -> vector<16x128xf32>
    %74 = arith.addf %48, %73 : vector<16x128xf32>
    %75 = vector.extract_strided_slice %15 {offsets = [0, 64], sizes = [16, 32], strides = [1, 1]} : vector<16x128xf32> to vector<16x32xf32>
    %76 = arith.truncf %75 : vector<16x32xf32> to vector<16x32xbf16>
    %77 = vector.extract_strided_slice %16 {offsets = [0, 64], sizes = [16, 32], strides = [1, 1]} : vector<16x128xf32> to vector<16x32xf32>
    %78 = arith.truncf %77 : vector<16x32xf32> to vector<16x32xbf16>
    %cst_33 = arith.constant dense<0.000000e+00> : vector<16x16xf32>
    %79 = tpu.matmul %76, %78, %cst_33 {dimension_numbers = #tpu.dot_dimension_numbers<[1], [1], [0], [0], [0, 0, 1, 0], [], []>} : vector<16x32xbf16>, vector<16x32xbf16>, vector<16x16xf32> -> vector<16x16xf32>
    %cst_34 = arith.constant 0.176776692 : f32
    %80 = vector.broadcast %cst_34 : f32 to vector<16x16xf32>
    %81 = arith.mulf %79, %80 : vector<16x16xf32>
    %82 = arith.addf %81, %5 : vector<16x16xf32>
    %cst_35 = arith.constant dense<0xFF800000> : vector<16xf32>
    %83 = vector.multi_reduction <maximumf>, %82, %cst_35 [1] : vector<16x16xf32> to vector<16xf32>
    %84 = vector.shape_cast %83 : vector<16xf32> to vector<16x1xf32>
    %85 = vector.broadcast %84 : vector<16x1xf32> to vector<16x16xf32>
    %86 = arith.subf %82, %85 : vector<16x16xf32>
    %87 = math.exp %86 : vector<16x16xf32>
    %cst_36 = arith.constant dense<0.000000e+00> : vector<16xf32>
    %88 = vector.multi_reduction <add>, %87, %cst_36 [1] : vector<16x16xf32> to vector<16xf32>
    %89 = vector.shape_cast %88 : vector<16xf32> to vector<16x1xf32>
    %90 = tpu.reciprocal %89 {approx = true} : vector<16x1xf32> -> vector<16x1xf32>
    %91 = vector.broadcast %90 : vector<16x1xf32> to vector<16x16xf32>
    %92 = arith.mulf %87, %91 : vector<16x16xf32>
    %93 = vector.extract_strided_slice %17 {offsets = [0, 64], sizes = [16, 32], strides = [1, 1]} : vector<16x128xf32> to vector<16x32xf32>
    %94 = arith.truncf %92 : vector<16x16xf32> to vector<16x16xbf16>
    %95 = arith.truncf %93 : vector<16x32xf32> to vector<16x32xbf16>
    %cst_37 = arith.constant dense<0.000000e+00> : vector<16x32xf32>
    %96 = tpu.matmul %94, %95, %cst_37 {dimension_numbers = #tpu.dot_dimension_numbers<[1], [0], [0], [1], [0, 0, 1, 1], [], []>} : vector<16x16xbf16>, vector<16x32xbf16>, vector<16x32xf32> -> vector<16x32xf32>
    %97 = vector.extract_strided_slice %19 {offsets = [64, 0], sizes = [32, 128], strides = [1, 1]} : vector<128x128xbf16> to vector<32x128xbf16>
    %98 = arith.truncf %96 : vector<16x32xf32> to vector<16x32xbf16>
    %cst_38 = arith.constant dense<0.000000e+00> : vector<16x128xf32>
    %99 = tpu.matmul %98, %97, %cst_38 {dimension_numbers = #tpu.dot_dimension_numbers<[1], [0], [0], [1], [0, 0, 1, 1], [], []>} : vector<16x32xbf16>, vector<32x128xbf16>, vector<16x128xf32> -> vector<16x128xf32>
    %100 = arith.addf %74, %99 : vector<16x128xf32>
    %101 = vector.extract_strided_slice %15 {offsets = [0, 96], sizes = [16, 32], strides = [1, 1]} : vector<16x128xf32> to vector<16x32xf32>
    %102 = arith.truncf %101 : vector<16x32xf32> to vector<16x32xbf16>
    %103 = vector.extract_strided_slice %16 {offsets = [0, 96], sizes = [16, 32], strides = [1, 1]} : vector<16x128xf32> to vector<16x32xf32>
    %104 = arith.truncf %103 : vector<16x32xf32> to vector<16x32xbf16>
    %cst_39 = arith.constant dense<0.000000e+00> : vector<16x16xf32>
    %105 = tpu.matmul %102, %104, %cst_39 {dimension_numbers = #tpu.dot_dimension_numbers<[1], [1], [0], [0], [0, 0, 1, 0], [], []>} : vector<16x32xbf16>, vector<16x32xbf16>, vector<16x16xf32> -> vector<16x16xf32>
    %cst_40 = arith.constant 0.176776692 : f32
    %106 = vector.broadcast %cst_40 : f32 to vector<16x16xf32>
    %107 = arith.mulf %105, %106 : vector<16x16xf32>
    %108 = arith.addf %107, %5 : vector<16x16xf32>
    %cst_41 = arith.constant dense<0xFF800000> : vector<16xf32>
    %109 = vector.multi_reduction <maximumf>, %108, %cst_41 [1] : vector<16x16xf32> to vector<16xf32>
    %110 = vector.shape_cast %109 : vector<16xf32> to vector<16x1xf32>
    %111 = vector.broadcast %110 : vector<16x1xf32> to vector<16x16xf32>
    %112 = arith.subf %108, %111 : vector<16x16xf32>
    %113 = math.exp %112 : vector<16x16xf32>
    %cst_42 = arith.constant dense<0.000000e+00> : vector<16xf32>
    %114 = vector.multi_reduction <add>, %113, %cst_42 [1] : vector<16x16xf32> to vector<16xf32>
    %115 = vector.shape_cast %114 : vector<16xf32> to vector<16x1xf32>
    %116 = tpu.reciprocal %115 {approx = true} : vector<16x1xf32> -> vector<16x1xf32>
    %117 = vector.broadcast %116 : vector<16x1xf32> to vector<16x16xf32>
    %118 = arith.mulf %113, %117 : vector<16x16xf32>
    %119 = vector.extract_strided_slice %17 {offsets = [0, 96], sizes = [16, 32], strides = [1, 1]} : vector<16x128xf32> to vector<16x32xf32>
    %120 = arith.truncf %118 : vector<16x16xf32> to vector<16x16xbf16>
    %121 = arith.truncf %119 : vector<16x32xf32> to vector<16x32xbf16>
    %cst_43 = arith.constant dense<0.000000e+00> : vector<16x32xf32>
    %122 = tpu.matmul %120, %121, %cst_43 {dimension_numbers = #tpu.dot_dimension_numbers<[1], [0], [0], [1], [0, 0, 1, 1], [], []>} : vector<16x16xbf16>, vector<16x32xbf16>, vector<16x32xf32> -> vector<16x32xf32>
    %123 = vector.extract_strided_slice %19 {offsets = [96, 0], sizes = [32, 128], strides = [1, 1]} : vector<128x128xbf16> to vector<32x128xbf16>
    %124 = arith.truncf %122 : vector<16x32xf32> to vector<16x32xbf16>
    %cst_44 = arith.constant dense<0.000000e+00> : vector<16x128xf32>
    %125 = tpu.matmul %124, %123, %cst_44 {dimension_numbers = #tpu.dot_dimension_numbers<[1], [0], [0], [1], [0, 0, 1, 1], [], []>} : vector<16x32xbf16>, vector<32x128xbf16>, vector<16x128xf32> -> vector<16x128xf32>
    %126 = arith.addf %100, %125 : vector<16x128xf32>
    %127 = vector.broadcast %21 : vector<1x128xf32> to vector<16x128xf32>
    %128 = arith.addf %126, %127 : vector<16x128xf32>
    %c0_45 = arith.constant 0 : index
    %c0_46 = arith.constant 0 : index
    %c0_47 = arith.constant 0 : index
    %129 = vector.load %arg9[%c0_45, %c0_46, %c0_47] : memref<1x1x128xf32, #tpu.memory_space<vmem>>, vector<1x1x128xf32>
    %130 = vector.shape_cast %129 : vector<1x1x128xf32> to vector<1x128xf32>
    %c0_48 = arith.constant 0 : index
    %c0_49 = arith.constant 0 : index
    %c0_50 = arith.constant 0 : index
    %131 = vector.load %arg10[%c0_48, %c0_49, %c0_50] : memref<1x1x128xf32, #tpu.memory_space<vmem>>, vector<1x1x128xf32>
    %132 = vector.shape_cast %131 : vector<1x1x128xf32> to vector<1x128xf32>
    %133 = arith.addf %3, %128 : vector<16x128xf32>
    %cst_51 = arith.constant dense<0.000000e+00> : vector<16xf32>
    %134 = vector.multi_reduction <add>, %133, %cst_51 [1] : vector<16x128xf32> to vector<16xf32>
    %135 = vector.shape_cast %134 : vector<16xf32> to vector<16x1xf32>
    %cst_52 = arith.constant 1.280000e+02 : f32
    %136 = vector.broadcast %cst_52 : f32 to vector<16x1xf32>
    %137 = arith.divf %135, %136 : vector<16x1xf32>
    %138 = vector.broadcast %137 : vector<16x1xf32> to vector<16x128xf32>
    %139 = arith.subf %133, %138 : vector<16x128xf32>
    %140 = arith.mulf %139, %139 : vector<16x128xf32>
    %cst_53 = arith.constant dense<0.000000e+00> : vector<16xf32>
    %141 = vector.multi_reduction <add>, %140, %cst_53 [1] : vector<16x128xf32> to vector<16xf32>
    %142 = vector.shape_cast %141 : vector<16xf32> to vector<16x1xf32>
    %cst_54 = arith.constant 1.280000e+02 : f32
    %143 = vector.broadcast %cst_54 : f32 to vector<16x1xf32>
    %144 = arith.divf %142, %143 : vector<16x1xf32>
    %145 = vector.broadcast %137 : vector<16x1xf32> to vector<16x128xf32>
    %146 = arith.subf %133, %145 : vector<16x128xf32>
    %cst_55 = arith.constant 9.99999974E-6 : f32
    %147 = vector.broadcast %cst_55 : f32 to vector<16x1xf32>
    %148 = arith.addf %144, %147 : vector<16x1xf32>
    %149 = math.rsqrt %148 : vector<16x1xf32>
    %150 = vector.broadcast %149 : vector<16x1xf32> to vector<16x128xf32>
    %151 = arith.mulf %146, %150 : vector<16x128xf32>
    %152 = vector.broadcast %130 : vector<1x128xf32> to vector<16x128xf32>
    %153 = arith.mulf %151, %152 : vector<16x128xf32>
    %154 = vector.broadcast %132 : vector<1x128xf32> to vector<16x128xf32>
    %155 = arith.addf %153, %154 : vector<16x128xf32>
    %c0_56 = arith.constant 0 : index
    %c0_57 = arith.constant 0 : index
    %c0_58 = arith.constant 0 : index
    %156 = vector.load %arg11[%c0_56, %c0_57, %c0_58] : memref<1x128x128xbf16, #tpu.memory_space<vmem>>, vector<1x128x128xbf16>
    %157 = vector.shape_cast %156 : vector<1x128x128xbf16> to vector<128x128xbf16>
    %158 = arith.truncf %155 : vector<16x128xf32> to vector<16x128xbf16>
    %cst_59 = arith.constant dense<0.000000e+00> : vector<16x128xf32>
    %159 = tpu.matmul %158, %157, %cst_59 {dimension_numbers = #tpu.dot_dimension_numbers<[1], [0], [0], [1], [0, 0, 1, 1], [], []>} : vector<16x128xbf16>, vector<128x128xbf16>, vector<16x128xf32> -> vector<16x128xf32>
    %c0_60 = arith.constant 0 : index
    %c0_61 = arith.constant 0 : index
    %c0_62 = arith.constant 0 : index
    %160 = vector.load %arg12[%c0_60, %c0_61, %c0_62] : memref<1x1x128xf32, #tpu.memory_space<vmem>>, vector<1x1x128xf32>
    %161 = vector.shape_cast %160 : vector<1x1x128xf32> to vector<1x128xf32>
    %162 = vector.broadcast %161 : vector<1x128xf32> to vector<16x128xf32>
    %163 = arith.addf %159, %162 : vector<16x128xf32>
    %c0_63 = arith.constant 0 : index
    %c0_64 = arith.constant 0 : index
    %c0_65 = arith.constant 0 : index
    %164 = vector.load %arg13[%c0_63, %c0_64, %c0_65] : memref<1x128x256xbf16, #tpu.memory_space<vmem>>, vector<1x128x256xbf16>
    %165 = vector.shape_cast %164 : vector<1x128x256xbf16> to vector<128x256xbf16>
    %166 = arith.truncf %4 : vector<16x128xf32> to vector<16x128xbf16>
    %cst_66 = arith.constant dense<0.000000e+00> : vector<16x256xf32>
    %167 = tpu.matmul %166, %165, %cst_66 {dimension_numbers = #tpu.dot_dimension_numbers<[1], [0], [0], [1], [0, 0, 1, 1], [], []>} : vector<16x128xbf16>, vector<128x256xbf16>, vector<16x256xf32> -> vector<16x256xf32>
    %c0_67 = arith.constant 0 : index
    %c0_68 = arith.constant 0 : index
    %c0_69 = arith.constant 0 : index
    %168 = vector.load %arg14[%c0_67, %c0_68, %c0_69] : memref<1x1x256xf32, #tpu.memory_space<vmem>>, vector<1x1x256xf32>
    %169 = vector.shape_cast %168 : vector<1x1x256xf32> to vector<1x256xf32>
    %170 = vector.broadcast %169 : vector<1x256xf32> to vector<16x256xf32>
    %171 = arith.addf %167, %170 : vector<16x256xf32>
    %172 = vector.extract_strided_slice %171 {offsets = [0, 0], sizes = [16, 128], strides = [1, 1]} : vector<16x256xf32> to vector<16x128xf32>
    %173 = vector.extract_strided_slice %171 {offsets = [0, 128], sizes = [16, 128], strides = [1, 1]} : vector<16x256xf32> to vector<16x128xf32>
    %c0_70 = arith.constant 0 : index
    %c0_71 = arith.constant 0 : index
    %c0_72 = arith.constant 0 : index
    %174 = vector.load %arg15[%c0_70, %c0_71, %c0_72] : memref<1x128x128xbf16, #tpu.memory_space<vmem>>, vector<1x128x128xbf16>
    %175 = vector.shape_cast %174 : vector<1x128x128xbf16> to vector<128x128xbf16>
    %c0_73 = arith.constant 0 : index
    %c0_74 = arith.constant 0 : index
    %c0_75 = arith.constant 0 : index
    %176 = vector.load %arg16[%c0_73, %c0_74, %c0_75] : memref<1x1x128xf32, #tpu.memory_space<vmem>>, vector<1x1x128xf32>
    %177 = vector.shape_cast %176 : vector<1x1x128xf32> to vector<1x128xf32>
    %cst_76 = arith.constant 0.000000e+00 : f32
    %178 = vector.broadcast %cst_76 : f32 to vector<16x128xf32>
    %179 = vector.extract_strided_slice %163 {offsets = [0, 0], sizes = [16, 32], strides = [1, 1]} : vector<16x128xf32> to vector<16x32xf32>
    %180 = arith.truncf %179 : vector<16x32xf32> to vector<16x32xbf16>
    %181 = vector.extract_strided_slice %172 {offsets = [0, 0], sizes = [16, 32], strides = [1, 1]} : vector<16x128xf32> to vector<16x32xf32>
    %182 = arith.truncf %181 : vector<16x32xf32> to vector<16x32xbf16>
    %cst_77 = arith.constant dense<0.000000e+00> : vector<16x16xf32>
    %183 = tpu.matmul %180, %182, %cst_77 {dimension_numbers = #tpu.dot_dimension_numbers<[1], [1], [0], [0], [0, 0, 1, 0], [], []>} : vector<16x32xbf16>, vector<16x32xbf16>, vector<16x16xf32> -> vector<16x16xf32>
    %cst_78 = arith.constant 0.176776692 : f32
    %184 = vector.broadcast %cst_78 : f32 to vector<16x16xf32>
    %185 = arith.mulf %183, %184 : vector<16x16xf32>
    %186 = arith.addf %185, %6 : vector<16x16xf32>
    %cst_79 = arith.constant dense<0xFF800000> : vector<16xf32>
    %187 = vector.multi_reduction <maximumf>, %186, %cst_79 [1] : vector<16x16xf32> to vector<16xf32>
    %188 = vector.shape_cast %187 : vector<16xf32> to vector<16x1xf32>
    %189 = vector.broadcast %188 : vector<16x1xf32> to vector<16x16xf32>
    %190 = arith.subf %186, %189 : vector<16x16xf32>
    %191 = math.exp %190 : vector<16x16xf32>
    %cst_80 = arith.constant dense<0.000000e+00> : vector<16xf32>
    %192 = vector.multi_reduction <add>, %191, %cst_80 [1] : vector<16x16xf32> to vector<16xf32>
    %193 = vector.shape_cast %192 : vector<16xf32> to vector<16x1xf32>
    %194 = tpu.reciprocal %193 {approx = true} : vector<16x1xf32> -> vector<16x1xf32>
    %195 = vector.broadcast %194 : vector<16x1xf32> to vector<16x16xf32>
    %196 = arith.mulf %191, %195 : vector<16x16xf32>
    %197 = vector.extract_strided_slice %173 {offsets = [0, 0], sizes = [16, 32], strides = [1, 1]} : vector<16x128xf32> to vector<16x32xf32>
    %198 = arith.truncf %196 : vector<16x16xf32> to vector<16x16xbf16>
    %199 = arith.truncf %197 : vector<16x32xf32> to vector<16x32xbf16>
    %cst_81 = arith.constant dense<0.000000e+00> : vector<16x32xf32>
    %200 = tpu.matmul %198, %199, %cst_81 {dimension_numbers = #tpu.dot_dimension_numbers<[1], [0], [0], [1], [0, 0, 1, 1], [], []>} : vector<16x16xbf16>, vector<16x32xbf16>, vector<16x32xf32> -> vector<16x32xf32>
    %201 = vector.extract_strided_slice %175 {offsets = [0, 0], sizes = [32, 128], strides = [1, 1]} : vector<128x128xbf16> to vector<32x128xbf16>
    %202 = arith.truncf %200 : vector<16x32xf32> to vector<16x32xbf16>
    %cst_82 = arith.constant dense<0.000000e+00> : vector<16x128xf32>
    %203 = tpu.matmul %202, %201, %cst_82 {dimension_numbers = #tpu.dot_dimension_numbers<[1], [0], [0], [1], [0, 0, 1, 1], [], []>} : vector<16x32xbf16>, vector<32x128xbf16>, vector<16x128xf32> -> vector<16x128xf32>
    %204 = arith.addf %178, %203 : vector<16x128xf32>
    %205 = vector.extract_strided_slice %163 {offsets = [0, 32], sizes = [16, 32], strides = [1, 1]} : vector<16x128xf32> to vector<16x32xf32>
    %206 = arith.truncf %205 : vector<16x32xf32> to vector<16x32xbf16>
    %207 = vector.extract_strided_slice %172 {offsets = [0, 32], sizes = [16, 32], strides = [1, 1]} : vector<16x128xf32> to vector<16x32xf32>
    %208 = arith.truncf %207 : vector<16x32xf32> to vector<16x32xbf16>
    %cst_83 = arith.constant dense<0.000000e+00> : vector<16x16xf32>
    %209 = tpu.matmul %206, %208, %cst_83 {dimension_numbers = #tpu.dot_dimension_numbers<[1], [1], [0], [0], [0, 0, 1, 0], [], []>} : vector<16x32xbf16>, vector<16x32xbf16>, vector<16x16xf32> -> vector<16x16xf32>
    %cst_84 = arith.constant 0.176776692 : f32
    %210 = vector.broadcast %cst_84 : f32 to vector<16x16xf32>
    %211 = arith.mulf %209, %210 : vector<16x16xf32>
    %212 = arith.addf %211, %6 : vector<16x16xf32>
    %cst_85 = arith.constant dense<0xFF800000> : vector<16xf32>
    %213 = vector.multi_reduction <maximumf>, %212, %cst_85 [1] : vector<16x16xf32> to vector<16xf32>
    %214 = vector.shape_cast %213 : vector<16xf32> to vector<16x1xf32>
    %215 = vector.broadcast %214 : vector<16x1xf32> to vector<16x16xf32>
    %216 = arith.subf %212, %215 : vector<16x16xf32>
    %217 = math.exp %216 : vector<16x16xf32>
    %cst_86 = arith.constant dense<0.000000e+00> : vector<16xf32>
    %218 = vector.multi_reduction <add>, %217, %cst_86 [1] : vector<16x16xf32> to vector<16xf32>
    %219 = vector.shape_cast %218 : vector<16xf32> to vector<16x1xf32>
    %220 = tpu.reciprocal %219 {approx = true} : vector<16x1xf32> -> vector<16x1xf32>
    %221 = vector.broadcast %220 : vector<16x1xf32> to vector<16x16xf32>
    %222 = arith.mulf %217, %221 : vector<16x16xf32>
    %223 = vector.extract_strided_slice %173 {offsets = [0, 32], sizes = [16, 32], strides = [1, 1]} : vector<16x128xf32> to vector<16x32xf32>
    %224 = arith.truncf %222 : vector<16x16xf32> to vector<16x16xbf16>
    %225 = arith.truncf %223 : vector<16x32xf32> to vector<16x32xbf16>
    %cst_87 = arith.constant dense<0.000000e+00> : vector<16x32xf32>
    %226 = tpu.matmul %224, %225, %cst_87 {dimension_numbers = #tpu.dot_dimension_numbers<[1], [0], [0], [1], [0, 0, 1, 1], [], []>} : vector<16x16xbf16>, vector<16x32xbf16>, vector<16x32xf32> -> vector<16x32xf32>
    %227 = vector.extract_strided_slice %175 {offsets = [32, 0], sizes = [32, 128], strides = [1, 1]} : vector<128x128xbf16> to vector<32x128xbf16>
    %228 = arith.truncf %226 : vector<16x32xf32> to vector<16x32xbf16>
    %cst_88 = arith.constant dense<0.000000e+00> : vector<16x128xf32>
    %229 = tpu.matmul %228, %227, %cst_88 {dimension_numbers = #tpu.dot_dimension_numbers<[1], [0], [0], [1], [0, 0, 1, 1], [], []>} : vector<16x32xbf16>, vector<32x128xbf16>, vector<16x128xf32> -> vector<16x128xf32>
    %230 = arith.addf %204, %229 : vector<16x128xf32>
    %231 = vector.extract_strided_slice %163 {offsets = [0, 64], sizes = [16, 32], strides = [1, 1]} : vector<16x128xf32> to vector<16x32xf32>
    %232 = arith.truncf %231 : vector<16x32xf32> to vector<16x32xbf16>
    %233 = vector.extract_strided_slice %172 {offsets = [0, 64], sizes = [16, 32], strides = [1, 1]} : vector<16x128xf32> to vector<16x32xf32>
    %234 = arith.truncf %233 : vector<16x32xf32> to vector<16x32xbf16>
    %cst_89 = arith.constant dense<0.000000e+00> : vector<16x16xf32>
    %235 = tpu.matmul %232, %234, %cst_89 {dimension_numbers = #tpu.dot_dimension_numbers<[1], [1], [0], [0], [0, 0, 1, 0], [], []>} : vector<16x32xbf16>, vector<16x32xbf16>, vector<16x16xf32> -> vector<16x16xf32>
    %cst_90 = arith.constant 0.176776692 : f32
    %236 = vector.broadcast %cst_90 : f32 to vector<16x16xf32>
    %237 = arith.mulf %235, %236 : vector<16x16xf32>
    %238 = arith.addf %237, %6 : vector<16x16xf32>
    %cst_91 = arith.constant dense<0xFF800000> : vector<16xf32>
    %239 = vector.multi_reduction <maximumf>, %238, %cst_91 [1] : vector<16x16xf32> to vector<16xf32>
    %240 = vector.shape_cast %239 : vector<16xf32> to vector<16x1xf32>
    %241 = vector.broadcast %240 : vector<16x1xf32> to vector<16x16xf32>
    %242 = arith.subf %238, %241 : vector<16x16xf32>
    %243 = math.exp %242 : vector<16x16xf32>
    %cst_92 = arith.constant dense<0.000000e+00> : vector<16xf32>
    %244 = vector.multi_reduction <add>, %243, %cst_92 [1] : vector<16x16xf32> to vector<16xf32>
    %245 = vector.shape_cast %244 : vector<16xf32> to vector<16x1xf32>
    %246 = tpu.reciprocal %245 {approx = true} : vector<16x1xf32> -> vector<16x1xf32>
    %247 = vector.broadcast %246 : vector<16x1xf32> to vector<16x16xf32>
    %248 = arith.mulf %243, %247 : vector<16x16xf32>
    %249 = vector.extract_strided_slice %173 {offsets = [0, 64], sizes = [16, 32], strides = [1, 1]} : vector<16x128xf32> to vector<16x32xf32>
    %250 = arith.truncf %248 : vector<16x16xf32> to vector<16x16xbf16>
    %251 = arith.truncf %249 : vector<16x32xf32> to vector<16x32xbf16>
    %cst_93 = arith.constant dense<0.000000e+00> : vector<16x32xf32>
    %252 = tpu.matmul %250, %251, %cst_93 {dimension_numbers = #tpu.dot_dimension_numbers<[1], [0], [0], [1], [0, 0, 1, 1], [], []>} : vector<16x16xbf16>, vector<16x32xbf16>, vector<16x32xf32> -> vector<16x32xf32>
    %253 = vector.extract_strided_slice %175 {offsets = [64, 0], sizes = [32, 128], strides = [1, 1]} : vector<128x128xbf16> to vector<32x128xbf16>
    %254 = arith.truncf %252 : vector<16x32xf32> to vector<16x32xbf16>
    %cst_94 = arith.constant dense<0.000000e+00> : vector<16x128xf32>
    %255 = tpu.matmul %254, %253, %cst_94 {dimension_numbers = #tpu.dot_dimension_numbers<[1], [0], [0], [1], [0, 0, 1, 1], [], []>} : vector<16x32xbf16>, vector<32x128xbf16>, vector<16x128xf32> -> vector<16x128xf32>
    %256 = arith.addf %230, %255 : vector<16x128xf32>
    %257 = vector.extract_strided_slice %163 {offsets = [0, 96], sizes = [16, 32], strides = [1, 1]} : vector<16x128xf32> to vector<16x32xf32>
    %258 = arith.truncf %257 : vector<16x32xf32> to vector<16x32xbf16>
    %259 = vector.extract_strided_slice %172 {offsets = [0, 96], sizes = [16, 32], strides = [1, 1]} : vector<16x128xf32> to vector<16x32xf32>
    %260 = arith.truncf %259 : vector<16x32xf32> to vector<16x32xbf16>
    %cst_95 = arith.constant dense<0.000000e+00> : vector<16x16xf32>
    %261 = tpu.matmul %258, %260, %cst_95 {dimension_numbers = #tpu.dot_dimension_numbers<[1], [1], [0], [0], [0, 0, 1, 0], [], []>} : vector<16x32xbf16>, vector<16x32xbf16>, vector<16x16xf32> -> vector<16x16xf32>
    %cst_96 = arith.constant 0.176776692 : f32
    %262 = vector.broadcast %cst_96 : f32 to vector<16x16xf32>
    %263 = arith.mulf %261, %262 : vector<16x16xf32>
    %264 = arith.addf %263, %6 : vector<16x16xf32>
    %cst_97 = arith.constant dense<0xFF800000> : vector<16xf32>
    %265 = vector.multi_reduction <maximumf>, %264, %cst_97 [1] : vector<16x16xf32> to vector<16xf32>
    %266 = vector.shape_cast %265 : vector<16xf32> to vector<16x1xf32>
    %267 = vector.broadcast %266 : vector<16x1xf32> to vector<16x16xf32>
    %268 = arith.subf %264, %267 : vector<16x16xf32>
    %269 = math.exp %268 : vector<16x16xf32>
    %cst_98 = arith.constant dense<0.000000e+00> : vector<16xf32>
    %270 = vector.multi_reduction <add>, %269, %cst_98 [1] : vector<16x16xf32> to vector<16xf32>
    %271 = vector.shape_cast %270 : vector<16xf32> to vector<16x1xf32>
    %272 = tpu.reciprocal %271 {approx = true} : vector<16x1xf32> -> vector<16x1xf32>
    %273 = vector.broadcast %272 : vector<16x1xf32> to vector<16x16xf32>
    %274 = arith.mulf %269, %273 : vector<16x16xf32>
    %275 = vector.extract_strided_slice %173 {offsets = [0, 96], sizes = [16, 32], strides = [1, 1]} : vector<16x128xf32> to vector<16x32xf32>
    %276 = arith.truncf %274 : vector<16x16xf32> to vector<16x16xbf16>
    %277 = arith.truncf %275 : vector<16x32xf32> to vector<16x32xbf16>
    %cst_99 = arith.constant dense<0.000000e+00> : vector<16x32xf32>
    %278 = tpu.matmul %276, %277, %cst_99 {dimension_numbers = #tpu.dot_dimension_numbers<[1], [0], [0], [1], [0, 0, 1, 1], [], []>} : vector<16x16xbf16>, vector<16x32xbf16>, vector<16x32xf32> -> vector<16x32xf32>
    %279 = vector.extract_strided_slice %175 {offsets = [96, 0], sizes = [32, 128], strides = [1, 1]} : vector<128x128xbf16> to vector<32x128xbf16>
    %280 = arith.truncf %278 : vector<16x32xf32> to vector<16x32xbf16>
    %cst_100 = arith.constant dense<0.000000e+00> : vector<16x128xf32>
    %281 = tpu.matmul %280, %279, %cst_100 {dimension_numbers = #tpu.dot_dimension_numbers<[1], [0], [0], [1], [0, 0, 1, 1], [], []>} : vector<16x32xbf16>, vector<32x128xbf16>, vector<16x128xf32> -> vector<16x128xf32>
    %282 = arith.addf %256, %281 : vector<16x128xf32>
    %283 = vector.broadcast %177 : vector<1x128xf32> to vector<16x128xf32>
    %284 = arith.addf %282, %283 : vector<16x128xf32>
    %c0_101 = arith.constant 0 : index
    %c0_102 = arith.constant 0 : index
    %c0_103 = arith.constant 0 : index
    %285 = vector.load %arg17[%c0_101, %c0_102, %c0_103] : memref<1x1x128xf32, #tpu.memory_space<vmem>>, vector<1x1x128xf32>
    %286 = vector.shape_cast %285 : vector<1x1x128xf32> to vector<1x128xf32>
    %c0_104 = arith.constant 0 : index
    %c0_105 = arith.constant 0 : index
    %c0_106 = arith.constant 0 : index
    %287 = vector.load %arg18[%c0_104, %c0_105, %c0_106] : memref<1x1x128xf32, #tpu.memory_space<vmem>>, vector<1x1x128xf32>
    %288 = vector.shape_cast %287 : vector<1x1x128xf32> to vector<1x128xf32>
    %289 = arith.addf %155, %284 : vector<16x128xf32>
    %cst_107 = arith.constant dense<0.000000e+00> : vector<16xf32>
    %290 = vector.multi_reduction <add>, %289, %cst_107 [1] : vector<16x128xf32> to vector<16xf32>
    %291 = vector.shape_cast %290 : vector<16xf32> to vector<16x1xf32>
    %cst_108 = arith.constant 1.280000e+02 : f32
    %292 = vector.broadcast %cst_108 : f32 to vector<16x1xf32>
    %293 = arith.divf %291, %292 : vector<16x1xf32>
    %294 = vector.broadcast %293 : vector<16x1xf32> to vector<16x128xf32>
    %295 = arith.subf %289, %294 : vector<16x128xf32>
    %296 = arith.mulf %295, %295 : vector<16x128xf32>
    %cst_109 = arith.constant dense<0.000000e+00> : vector<16xf32>
    %297 = vector.multi_reduction <add>, %296, %cst_109 [1] : vector<16x128xf32> to vector<16xf32>
    %298 = vector.shape_cast %297 : vector<16xf32> to vector<16x1xf32>
    %cst_110 = arith.constant 1.280000e+02 : f32
    %299 = vector.broadcast %cst_110 : f32 to vector<16x1xf32>
    %300 = arith.divf %298, %299 : vector<16x1xf32>
    %301 = vector.broadcast %293 : vector<16x1xf32> to vector<16x128xf32>
    %302 = arith.subf %289, %301 : vector<16x128xf32>
    %cst_111 = arith.constant 9.99999974E-6 : f32
    %303 = vector.broadcast %cst_111 : f32 to vector<16x1xf32>
    %304 = arith.addf %300, %303 : vector<16x1xf32>
    %305 = math.rsqrt %304 : vector<16x1xf32>
    %306 = vector.broadcast %305 : vector<16x1xf32> to vector<16x128xf32>
    %307 = arith.mulf %302, %306 : vector<16x128xf32>
    %308 = vector.broadcast %286 : vector<1x128xf32> to vector<16x128xf32>
    %309 = arith.mulf %307, %308 : vector<16x128xf32>
    %310 = vector.broadcast %288 : vector<1x128xf32> to vector<16x128xf32>
    %311 = arith.addf %309, %310 : vector<16x128xf32>
    %c0_112 = arith.constant 0 : index
    %c0_113 = arith.constant 0 : index
    %c0_114 = arith.constant 0 : index
    %312 = vector.load %arg19[%c0_112, %c0_113, %c0_114] : memref<1x128x128xbf16, #tpu.memory_space<vmem>>, vector<1x128x128xbf16>
    %313 = vector.shape_cast %312 : vector<1x128x128xbf16> to vector<128x128xbf16>
    %314 = arith.truncf %311 : vector<16x128xf32> to vector<16x128xbf16>
    %cst_115 = arith.constant dense<0.000000e+00> : vector<16x128xf32>
    %315 = tpu.matmul %314, %313, %cst_115 {dimension_numbers = #tpu.dot_dimension_numbers<[1], [0], [0], [1], [0, 0, 1, 1], [], []>} : vector<16x128xbf16>, vector<128x128xbf16>, vector<16x128xf32> -> vector<16x128xf32>
    %c0_116 = arith.constant 0 : index
    %c0_117 = arith.constant 0 : index
    %c0_118 = arith.constant 0 : index
    %316 = vector.load %arg20[%c0_116, %c0_117, %c0_118] : memref<1x1x128xf32, #tpu.memory_space<vmem>>, vector<1x1x128xf32>
    %317 = vector.shape_cast %316 : vector<1x1x128xf32> to vector<1x128xf32>
    %318 = vector.broadcast %317 : vector<1x128xf32> to vector<16x128xf32>
    %319 = arith.addf %315, %318 : vector<16x128xf32>
    %cst_119 = arith.constant 0.000000e+00 : f32
    %320 = vector.broadcast %cst_119 : f32 to vector<16x128xf32>
    %321 = arith.maximumf %319, %320 : vector<16x128xf32>
    %c0_120 = arith.constant 0 : index
    %c0_121 = arith.constant 0 : index
    %c0_122 = arith.constant 0 : index
    %322 = vector.load %arg21[%c0_120, %c0_121, %c0_122] : memref<1x128x128xbf16, #tpu.memory_space<vmem>>, vector<1x128x128xbf16>
    %323 = vector.shape_cast %322 : vector<1x128x128xbf16> to vector<128x128xbf16>
    %324 = arith.truncf %321 : vector<16x128xf32> to vector<16x128xbf16>
    %cst_123 = arith.constant dense<0.000000e+00> : vector<16x128xf32>
    %325 = tpu.matmul %324, %323, %cst_123 {dimension_numbers = #tpu.dot_dimension_numbers<[1], [0], [0], [1], [0, 0, 1, 1], [], []>} : vector<16x128xbf16>, vector<128x128xbf16>, vector<16x128xf32> -> vector<16x128xf32>
    %c0_124 = arith.constant 0 : index
    %c0_125 = arith.constant 0 : index
    %c0_126 = arith.constant 0 : index
    %326 = vector.load %arg22[%c0_124, %c0_125, %c0_126] : memref<1x1x128xf32, #tpu.memory_space<vmem>>, vector<1x1x128xf32>
    %327 = vector.shape_cast %326 : vector<1x1x128xf32> to vector<1x128xf32>
    %328 = vector.broadcast %327 : vector<1x128xf32> to vector<16x128xf32>
    %329 = arith.addf %325, %328 : vector<16x128xf32>
    %c0_127 = arith.constant 0 : index
    %c0_128 = arith.constant 0 : index
    %c0_129 = arith.constant 0 : index
    %330 = vector.load %arg23[%c0_127, %c0_128, %c0_129] : memref<1x1x128xf32, #tpu.memory_space<vmem>>, vector<1x1x128xf32>
    %331 = vector.shape_cast %330 : vector<1x1x128xf32> to vector<1x128xf32>
    %c0_130 = arith.constant 0 : index
    %c0_131 = arith.constant 0 : index
    %c0_132 = arith.constant 0 : index
    %332 = vector.load %arg24[%c0_130, %c0_131, %c0_132] : memref<1x1x128xf32, #tpu.memory_space<vmem>>, vector<1x1x128xf32>
    %333 = vector.shape_cast %332 : vector<1x1x128xf32> to vector<1x128xf32>
    %334 = arith.addf %311, %329 : vector<16x128xf32>
    %cst_133 = arith.constant dense<0.000000e+00> : vector<16xf32>
    %335 = vector.multi_reduction <add>, %334, %cst_133 [1] : vector<16x128xf32> to vector<16xf32>
    %336 = vector.shape_cast %335 : vector<16xf32> to vector<16x1xf32>
    %cst_134 = arith.constant 1.280000e+02 : f32
    %337 = vector.broadcast %cst_134 : f32 to vector<16x1xf32>
    %338 = arith.divf %336, %337 : vector<16x1xf32>
    %339 = vector.broadcast %338 : vector<16x1xf32> to vector<16x128xf32>
    %340 = arith.subf %334, %339 : vector<16x128xf32>
    %341 = arith.mulf %340, %340 : vector<16x128xf32>
    %cst_135 = arith.constant dense<0.000000e+00> : vector<16xf32>
    %342 = vector.multi_reduction <add>, %341, %cst_135 [1] : vector<16x128xf32> to vector<16xf32>
    %343 = vector.shape_cast %342 : vector<16xf32> to vector<16x1xf32>
    %cst_136 = arith.constant 1.280000e+02 : f32
    %344 = vector.broadcast %cst_136 : f32 to vector<16x1xf32>
    %345 = arith.divf %343, %344 : vector<16x1xf32>
    %346 = vector.broadcast %338 : vector<16x1xf32> to vector<16x128xf32>
    %347 = arith.subf %334, %346 : vector<16x128xf32>
    %cst_137 = arith.constant 9.99999974E-6 : f32
    %348 = vector.broadcast %cst_137 : f32 to vector<16x1xf32>
    %349 = arith.addf %345, %348 : vector<16x1xf32>
    %350 = math.rsqrt %349 : vector<16x1xf32>
    %351 = vector.broadcast %350 : vector<16x1xf32> to vector<16x128xf32>
    %352 = arith.mulf %347, %351 : vector<16x128xf32>
    %353 = vector.broadcast %331 : vector<1x128xf32> to vector<16x128xf32>
    %354 = arith.mulf %352, %353 : vector<16x128xf32>
    %355 = vector.broadcast %333 : vector<1x128xf32> to vector<16x128xf32>
    %356 = arith.addf %354, %355 : vector<16x128xf32>
    %c0_138 = arith.constant 0 : index
    %c0_139 = arith.constant 0 : index
    %357 = vector.load %arg28[%c0_138, %c0_139] : memref<16x128xf32, #tpu.memory_space<vmem>>, vector<16x128xf32>
    tpu.vector_store %arg28[%c0_138, %c0_139], %356 {strides = array<i32>} : memref<16x128xf32, #tpu.memory_space<vmem>>, vector<16x128xf32>,
    %c3_i32 = arith.constant 3 : i32
    %358 = arith.cmpi eq, %arg0, %c3_i32 : i32
    %359 = arith.extui %358 : i1 to i32
    %c0_i32_140 = arith.constant 0 : i32
    %360 = arith.cmpi ne, %359, %c0_i32_140 : i32
    scf.if %360 {
      %c0_141 = arith.constant 0 : index
      %c0_142 = arith.constant 0 : index
      %361 = vector.load %arg25[%c0_141, %c0_142] : memref<128x128xbf16, #tpu.memory_space<vmem>>, vector<128x128xbf16>
      %362 = arith.truncf %356 : vector<16x128xf32> to vector<16x128xbf16>
      %cst_143 = arith.constant dense<0.000000e+00> : vector<16x128xf32>
      %363 = tpu.matmul %362, %361, %cst_143 {dimension_numbers = #tpu.dot_dimension_numbers<[1], [0], [0], [1], [0, 0, 1, 1], [], []>} : vector<16x128xbf16>, vector<128x128xbf16>, vector<16x128xf32> -> vector<16x128xf32>
      %c0_144 = arith.constant 0 : index
      %c0_145 = arith.constant 0 : index
      %364 = vector.load %arg26[%c0_144, %c0_145] : memref<1x128xf32, #tpu.memory_space<vmem>>, vector<1x128xf32>
      %365 = vector.broadcast %364 : vector<1x128xf32> to vector<16x128xf32>
      %366 = arith.addf %363, %365 : vector<16x128xf32>
      %c0_146 = arith.constant 0 : index
      %c0_147 = arith.constant 0 : index
      %367 = vector.load %arg27[%c0_146, %c0_147] : memref<16x128xf32, #tpu.memory_space<vmem>>, vector<16x128xf32>
      tpu.vector_store %arg27[%c0_146, %c0_147], %366 {strides = array<i32>} : memref<16x128xf32, #tpu.memory_space<vmem>>, vector<16x128xf32>,
    } else {
    }
    return
  }
  func.func @transform_0(%arg0: i32) -> (i32, i32) {
    %c0_i32 = arith.constant 0 : i32
    %c0_i32_0 = arith.constant 0 : i32
    %c0_i32_1 = arith.constant 0 : i32
    return %c0_i32, %c0_i32_0 : i32, i32
  }
  func.func @transform_1(%arg0: i32) -> (i32, i32) {
    %c0_i32 = arith.constant 0 : i32
    %c0_i32_0 = arith.constant 0 : i32
    %c0_i32_1 = arith.constant 0 : i32
    return %c0_i32, %c0_i32_0 : i32, i32
  }
  func.func @transform_2(%arg0: i32) -> (i32, i32) {
    %c0_i32 = arith.constant 0 : i32
    %c0_i32_0 = arith.constant 0 : i32
    %c0_i32_1 = arith.constant 0 : i32
    return %c0_i32, %c0_i32_0 : i32, i32
  }
  func.func @transform_3(%arg0: i32) -> (i32, i32) {
    %c0_i32 = arith.constant 0 : i32
    %c0_i32_0 = arith.constant 0 : i32
    %c0_i32_1 = arith.constant 0 : i32
    return %c0_i32, %c0_i32_0 : i32, i32
  }
  func.func @transform_4(%arg0: i32) -> (i32, i32, i32) {
    %c0_i32 = arith.constant 0 : i32
    %c0_i32_0 = arith.constant 0 : i32
    %c0_i32_1 = arith.constant 0 : i32
    return %arg0, %c0_i32, %c0_i32_0 : i32, i32, i32
  }
  func.func @transform_5(%arg0: i32) -> (i32, i32, i32) {
    %c0_i32 = arith.constant 0 : i32
    %c0_i32_0 = arith.constant 0 : i32
    %c0_i32_1 = arith.constant 0 : i32
    return %arg0, %c0_i32, %c0_i32_0 : i32, i32, i32
  }
  func.func @transform_6(%arg0: i32) -> (i32, i32, i32) {
    %c0_i32 = arith.constant 0 : i32
    %c0_i32_0 = arith.constant 0 : i32
    %c0_i32_1 = arith.constant 0 : i32
    return %arg0, %c0_i32, %c0_i32_0 : i32, i32, i32
  }
  func.func @transform_7(%arg0: i32) -> (i32, i32, i32) {
    %c0_i32 = arith.constant 0 : i32
    %c0_i32_0 = arith.constant 0 : i32
    %c0_i32_1 = arith.constant 0 : i32
    return %arg0, %c0_i32, %c0_i32_0 : i32, i32, i32
  }
  func.func @transform_8(%arg0: i32) -> (i32, i32, i32) {
    %c0_i32 = arith.constant 0 : i32
    %c0_i32_0 = arith.constant 0 : i32
    %c0_i32_1 = arith.constant 0 : i32
    return %arg0, %c0_i32, %c0_i32_0 : i32, i32, i32
  }
  func.func @transform_9(%arg0: i32) -> (i32, i32, i32) {
    %c0_i32 = arith.constant 0 : i32
    %c0_i32_0 = arith.constant 0 : i32
    %c0_i32_1 = arith.constant 0 : i32
    return %arg0, %c0_i32, %c0_i32_0 : i32, i32, i32
  }
  func.func @transform_10(%arg0: i32) -> (i32, i32, i32) {
    %c0_i32 = arith.constant 0 : i32
    %c0_i32_0 = arith.constant 0 : i32
    %c0_i32_1 = arith.constant 0 : i32
    return %arg0, %c0_i32, %c0_i32_0 : i32, i32, i32
  }
  func.func @transform_11(%arg0: i32) -> (i32, i32, i32) {
    %c0_i32 = arith.constant 0 : i32
    %c0_i32_0 = arith.constant 0 : i32
    %c0_i32_1 = arith.constant 0 : i32
    return %arg0, %c0_i32, %c0_i32_0 : i32, i32, i32
  }
  func.func @transform_12(%arg0: i32) -> (i32, i32, i32) {
    %c0_i32 = arith.constant 0 : i32
    %c0_i32_0 = arith.constant 0 : i32
    %c0_i32_1 = arith.constant 0 : i32
    return %arg0, %c0_i32, %c0_i32_0 : i32, i32, i32
  }
  func.func @transform_13(%arg0: i32) -> (i32, i32, i32) {
    %c0_i32 = arith.constant 0 : i32
    %c0_i32_0 = arith.constant 0 : i32
    %c0_i32_1 = arith.constant 0 : i32
    return %arg0, %c0_i32, %c0_i32_0 : i32, i32, i32
  }
  func.func @transform_14(%arg0: i32) -> (i32, i32, i32) {
    %c0_i32 = arith.constant 0 : i32
    %c0_i32_0 = arith.constant 0 : i32
    %c0_i32_1 = arith.constant 0 : i32
    return %arg0, %c0_i32, %c0_i32_0 : i32, i32, i32
  }
  func.func @transform_15(%arg0: i32) -> (i32, i32, i32) {
    %c0_i32 = arith.constant 0 : i32
    %c0_i32_0 = arith.constant 0 : i32
    %c0_i32_1 = arith.constant 0 : i32
    return %arg0, %c0_i32, %c0_i32_0 : i32, i32, i32
  }
  func.func @transform_16(%arg0: i32) -> (i32, i32, i32) {
    %c0_i32 = arith.constant 0 : i32
    %c0_i32_0 = arith.constant 0 : i32
    %c0_i32_1 = arith.constant 0 : i32
    return %arg0, %c0_i32, %c0_i32_0 : i32, i32, i32
  }
  func.func @transform_17(%arg0: i32) -> (i32, i32, i32) {
    %c0_i32 = arith.constant 0 : i32
    %c0_i32_0 = arith.constant 0 : i32
    %c0_i32_1 = arith.constant 0 : i32
    return %arg0, %c0_i32, %c0_i32_0 : i32, i32, i32
  }
  func.func @transform_18(%arg0: i32) -> (i32, i32, i32) {
    %c0_i32 = arith.constant 0 : i32
    %c0_i32_0 = arith.constant 0 : i32
    %c0_i32_1 = arith.constant 0 : i32
    return %arg0, %c0_i32, %c0_i32_0 : i32, i32, i32
  }
  func.func @transform_19(%arg0: i32) -> (i32, i32, i32) {
    %c0_i32 = arith.constant 0 : i32
    %c0_i32_0 = arith.constant 0 : i32
    %c0_i32_1 = arith.constant 0 : i32
    return %arg0, %c0_i32, %c0_i32_0 : i32, i32, i32
  }
  func.func @transform_20(%arg0: i32) -> (i32, i32, i32) {
    %c0_i32 = arith.constant 0 : i32
    %c0_i32_0 = arith.constant 0 : i32
    %c0_i32_1 = arith.constant 0 : i32
    return %arg0, %c0_i32, %c0_i32_0 : i32, i32, i32
  }
  func.func @transform_21(%arg0: i32) -> (i32, i32, i32) {
    %c0_i32 = arith.constant 0 : i32
    %c0_i32_0 = arith.constant 0 : i32
    %c0_i32_1 = arith.constant 0 : i32
    return %arg0, %c0_i32, %c0_i32_0 : i32, i32, i32
  }
  func.func @transform_22(%arg0: i32) -> (i32, i32, i32) {
    %c0_i32 = arith.constant 0 : i32
    %c0_i32_0 = arith.constant 0 : i32
    %c0_i32_1 = arith.constant 0 : i32
    return %arg0, %c0_i32, %c0_i32_0 : i32, i32, i32
  }
  func.func @transform_23(%arg0: i32) -> (i32, i32, i32) {
    %c0_i32 = arith.constant 0 : i32
    %c0_i32_0 = arith.constant 0 : i32
    %c0_i32_1 = arith.constant 0 : i32
    return %arg0, %c0_i32, %c0_i32_0 : i32, i32, i32
  }
  func.func @transform_24(%arg0: i32) -> (i32, i32) {
    %c0_i32 = arith.constant 0 : i32
    %c0_i32_0 = arith.constant 0 : i32
    %c0_i32_1 = arith.constant 0 : i32
    return %c0_i32, %c0_i32_0 : i32, i32
  }
  func.func @transform_25(%arg0: i32) -> (i32, i32) {
    %c0_i32 = arith.constant 0 : i32
    %c0_i32_0 = arith.constant 0 : i32
    %c0_i32_1 = arith.constant 0 : i32
    return %c0_i32, %c0_i32_0 : i32, i32
  }
  func.func @transform_26(%arg0: i32) -> (i32, i32) {
    %c0_i32 = arith.constant 0 : i32
    %c0_i32_0 = arith.constant 0 : i32
    %c0_i32_1 = arith.constant 0 : i32
    return %c0_i32, %c0_i32_0 : i32, i32
  }
}

</mosaic_0001>

<bundles_post_ra>
// kernel: transformer_forward.2
= control target key start
LH: loop header
LB: loop body
LE: loop exit
PB: predicated region body
PF: predicated region fallthrough
CT: control target
= control target key end

     0   :  { %s3803_s0 = inlined_call_operand.vmem [shape: f32[16,128], index: 0, kind: input, shape index: {}]   ;;  %s3804_s1 = inlined_call_operand.vmem [shape: f32[16,16], index: 1, kind: input, shape index: {}]   ;;  %s3805_s2 = inlined_call_operand.hbm [shape: bf16[4,128,384], index: 2, kind: input, shape index: {}]   ;;  %s3806_s3 = inlined_call_operand.vmem [shape: f32[4,1,384], index: 3, kind: input, shape index: {}]   ;;  %s3807_s4 = inlined_call_operand.vmem [shape: bf16[4,128,128], index: 4, kind: input, shape index: {}]   ;;  %s3808_s5 = inlined_call_operand.vmem [shape: f32[4,1,128], index: 5, kind: input, shape index: {}]   ;;  %s3809_s6 = inlined_call_operand.hbm [shape: f32[4,1,128], index: 6, kind: input, shape index: {}]   ;;  %s3810_s7 = inlined_call_operand.hbm [shape: f32[4,1,128], index: 7, kind: input, shape index: {}]   ;;  %s3811_s8 = inlined_call_operand.vmem [shape: bf16[4,128,128], index: 8, kind: input, shape index: {}]   ;;  %s3812_s9 = inlined_call_operand.hbm [shape: f32[4,1,128], index: 9, kind: input, shape index: {}]   ;;  %s3813_s10 = inlined_call_operand.hbm [shape: bf16[4,128,128], index: 10, kind: input, shape index: {}]   ;;  %s3814_s11 = inlined_call_operand.hbm [shape: f32[4,1,128], index: 11, kind: input, shape index: {}]   ;;  %s3815_s12 = inlined_call_operand.hbm [shape: f32[4,1,128], index: 12, kind: input, shape index: {}]   ;;  %s3816_s13 = inlined_call_operand.hbm [shape: f32[4,1,128], index: 13, kind: input, shape index: {}]   ;;  %s3817_s14 = inlined_call_operand.vmem [shape: f32[16,128], index: 14, kind: output, shape index: {}]  }
   0x1   :  { %3825 = sst [smem:[#allocation24_spill]] %s3803_s0 }
   0x2   :  { %3826 = sst [smem:[#allocation25_spill]] %s3804_s1 }
   0x3   :  { %3827 = sst [smem:[#allocation26_spill]] %s3805_s2 }
   0x4   :  { %3828 = sst [smem:[#allocation27_spill]] %s3806_s3 }
   0x5   :  { %3829 = sst [smem:[#allocation28_spill]] %s3809_s6 }
   0x6   :  { %3830 = sst [smem:[#allocation29_spill]] %s3810_s7 }
   0x7   :  { %3831 = sst [smem:[#allocation30_spill]] %s3811_s8 }
   0x8   :  { %3832 = sst [smem:[#allocation31_spill]] %s3812_s9 }
   0x9   :  { %3833 = sst [smem:[#allocation32_spill]] %s3817_s14 }
   0xa   :  { %19 = vsyncpa [#allocation4], 0 }
   0xb   :  { %21 = vsyncpa [#allocation4 + $0x1], 0 }
   0xc   :  { %22 = vsyncpa [#allocation6], 0 }
   0xd   :  { %24 = vsyncpa [#allocation6 + $0x1], 0 }
   0xe   :  { %25 = vsyncpa [#allocation9], 0 }
   0xf   :  { %27 = vsyncpa [#allocation9 + $0x1], 0 }
  0x10   :  { %28 = vsyncpa [#allocation12], 0 }
  0x11   :  { %30 = vsyncpa [#allocation12 + $0x1], 0 }
  0x12   :  { %31 = vsyncpa [#allocation15], 0 }
  0x13   :  { %33 = vsyncpa [#allocation15 + $0x1], 0  ;;  %s3192_s29 = smov 0   ;;  %s3194_s30 = smov 0  }
  0x14   :  { %s3196_s15 = smov 0   ;;  %s3198_s16 = smov 0  }
  0x15 LB: > { %3834 = sst [smem:[#allocation21_spill]] %s3093_s15  ;;  %s3211_s17 = sadd.s32 4294967295, %s3097_s16   ;;  %s3097_s16 = sphi %s3198_s16, %s3866_s16   ;;  %s3093_s15 = sphi %s3196_s15, %s3868_s15   ;;  %s3089_s30 = sphi %s3194_s30, %s3870_s30   ;;  %s3085_s29 = sphi %s3192_s29, %s3869_s29  }
  0x16   : > { %s3214_s18 = sadd.s32 1, %s3097_s16   ;;  %s88_s20 = sadd.s32 1, %s3093_s15 }
  0x17   : > { %3835 = sst [smem:[#allocation22_spill]] %s3214_s18  ;;  %s85_s19 = ssub.s32 %s3097_s16, %s3214_s18 }
  0x18   : > { %p86_p0 = scmp.eq.s32.totalorder %s85_s19, 0  ;;  %p95_p1 = scmp.ne.s32.totalorder %s3093_s15, %s3089_s30 }
  0x19   : > { %p96_p2 = scmp.eq.s32.totalorder %s3097_s16, 0  ;;  %p101_p3 = scmp.ne.s32.totalorder %s3089_s30, %s3085_s29 }
  0x1a   : > { %s3224_s21 = scalar_select %p86_p0, %s3093_s15, %s88_s20  }
  0x1b   : > { %p97_p4 = por %p96_p2, %p95_p1  ;;  %p102_p5 = scmp.eq.s32.totalorder %s3211_s17, 0 }
  0x1c   : > { %3836 = sst [smem:[#allocation23_spill]] %s3224_s21  ;;  %p2684_p6 = scmp.lt.s32.totalorder %s3097_s16, 4 }
  0x1d   : > { %p3228_p7 = por %p102_p5, %p101_p3  ;;  %s3233_s23 = sand.u32 1, %s3093_s15  }
  0x1e   : > { %p3235_p8 = pnand %p2684_p6, %p97_p4  ;;  %s3240_s25 = sand.u32 1, %s3097_s16  }
  0x1f   : > { %s3837_s22 = scalar_select %p3228_p7, 1, 0 }
  0x20   : > { %s3243_s26 = sshll.u32 %s3097_s16, 4  ;;  %s3839_s6 = sld [smem:[#allocation28_spill]] }
  0x21   : > { %s483_s19 = scalar_lea.vmem [#allocation5], %s3233_s23  ;;  %p3258_p11 = pneg %p3235_p8 }
  0x22   : > { %s490_s20 = sshll.u32 %s483_s19, 4  ;;  %s491_s20 = int_to_ptr.vmem [resolvable:$true] %s490_s20 }
  0x26   : > { %s3249_s29 = scalar_lea.hbm %s3839_s6, %s3243_s26  ;;  %s2828_s14 = scalar_lea.hbm %s3839_s6, 64 }
  0x27   : > { %s2823_s15 = scalar_lea.hbm %s3249_s29, 16  ;;  %p2829_p0 = scmp.lt.s32.totalorder %s3249_s29, %s3839_s6 }
  0x28   : > { %p2824_p10 = scmp.ne.s32.totalorder %s3249_s29, %s2823_s15  ;;  %p2830_p1 = scmp.lt.s32.totalorder %s2828_s14, %s2823_s15 }
  0x2a   : > { %p2826_p12 = pnand %p3258_p11, %p2824_p10  ;;  %p2831_p2 = por %p2830_p1, %p2829_p0 }
  0x2c   : > { %p2827_p13 = pneg %p2826_p12 }
  0x2e   : > { %p2832_p3 = pnand %p2831_p2, %p2827_p13 }
  0x30   : > { %2835 = shalt.err (!%p2832_p3)
}
  0x31   : > { %s2836_s21 = scalar_lea.vmem %s491_s20, 16  ;;  %s3099_s0 = smov [#allocation5]  }
  0x32   : > { %p2837_p4 = scmp.ne.s32.totalorder %s491_s20, %s2836_s21  ;;  %s2841_s8 = sshll.u32 %s3099_s0, 4  ;;  %s2842_s8 = int_to_ptr.vmem [resolvable:$false] %s2841_s8 }
  0x33   : > { %s2843_s3 = scalar_lea.vmem %s2842_s8, 32  ;;  %p2844_p10 = scmp.lt.s32.totalorder %s491_s20, %s2842_s8 }
  0x34   : > { %p2839_p5 = pnand %p2837_p4, %p3258_p11  ;;  %p2845_p12 = scmp.lt.s32.totalorder %s2843_s3, %s2836_s21 }
  0x36   : > { %p2840_p6 = pneg %p2839_p5  ;;  %p2846_p9 = por %p2845_p12, %p2844_p10 }
  0x38   : > { %p2847_p7 = pnand %p2846_p9, %p2840_p6 }
  0x3a   : > { %2850 = shalt.err (!%p2847_p7)
}
  0x3b   : > { %s3841_s1 = scalar_lea.sflag [#allocation6], %s3240_s25  ;;  %p609_p13 = scmp.lt.s32.totalorder %s3097_s16, 5 }
  0x3c   : > { %2665 = dma.hbm_to_vmem [thread:$0]  (!%p3235_p8), %s3249_s29, 16, %s491_s20, %s3841_s1  }
  0x3d   : > { %s3842_s9 = sld [smem:[#allocation31_spill]]  ;;  %p3843_p9 = scmp.ge.s32.totalorder %s3097_s16, 1 }
  0x3e   : > { %s525_s15 = scalar_lea.vmem [#allocation8], %s3233_s23 }
  0x3f   : > { %p3287_p7 = pnand %p3843_p9, %p609_p13  ;;  %s532_s21 = sshll.u32 %s525_s15, 4  ;;  %s533_s21 = int_to_ptr.vmem [resolvable:$true] %s532_s21 }
  0x41   : > { %s3844_s8 = scalar_select %p3287_p7, 1, 0 }
  0x43   : > { %s3283_s3 = scalar_lea.hbm %s3842_s9, %s3243_s26  ;;  %s2856_s19 = scalar_lea.hbm %s3842_s9, 64 }
  0x44   : > { %s2851_s28 = scalar_lea.hbm %s3283_s3, 16  ;;  %p2857_p3 = scmp.lt.s32.totalorder %s3283_s3, %s3842_s9 }
  0x45   : > { %p2852_p0 = scmp.ne.s32.totalorder %s3283_s3, %s2851_s28  ;;  %p2858_p4 = scmp.lt.s32.totalorder %s2856_s19, %s2851_s28 }
  0x47   : > { %p2854_p1 = pnand %p2852_p0, %p3258_p11  ;;  %p2859_p5 = por %p2858_p4, %p2857_p3 }
  0x49   : > { %p2855_p2 = pneg %p2854_p1 }
  0x4b   : > { %p2860_p6 = pnand %p2859_p5, %p2855_p2 }
  0x4d   : > { %2863 = shalt.err (!%p2860_p6)
}
  0x4e   : > { %s2864_s14 = scalar_lea.vmem %s533_s21, 16  ;;  %s3100_s15 = smov [#allocation8]  }
  0x4f   : > { %p2865_p10 = scmp.ne.s32.totalorder %s533_s21, %s2864_s14  ;;  %s2869_s27 = sshll.u32 %s3100_s15, 4  ;;  %s2870_s27 = int_to_ptr.vmem [resolvable:$false] %s2869_s27 }
  0x50   : > { %s2871_s6 = scalar_lea.vmem %s2870_s27, 32  ;;  %p2872_p9 = scmp.lt.s32.totalorder %s533_s21, %s2870_s27 }
  0x51   : > { %p2867_p12 = pnand %p2865_p10, %p3258_p11  ;;  %p2873_p0 = scmp.lt.s32.totalorder %s2871_s6, %s2864_s14 }
  0x53   : > { %p2868_p13 = pneg %p2867_p12  ;;  %p2874_p1 = por %p2873_p0, %p2872_p9 }
  0x55   : > { %p2875_p7 = pnand %p2874_p1, %p2868_p13 }
  0x57   : > { %2878 = shalt.err (!%p2875_p7)
}
  0x58   : > { %s3845_s28 = scalar_lea.sflag [#allocation9], %s3240_s25  ;;  %s3315_s19 = scalar_lea.hbm %s3814_s11, %s3243_s26 }
  0x59   : > { %2671 = dma.hbm_to_vmem [thread:$0]  (!%p3235_p8), %s3283_s3, 16, %s533_s21, %s3845_s28  }
  0x5a   : > { %s563_s6 = scalar_lea.vmem [#allocation11], %s3233_s23  ;;  %s2639_s1 = smul.u32 192, %s3233_s23 }
  0x5b   : > { %s570_s27 = sshll.u32 %s563_s6, 4  ;;  %s2879_s14 = scalar_lea.hbm %s3315_s19, 16  ;;  %s571_s27 = int_to_ptr.vmem [resolvable:$true] %s570_s27 }
  0x5c   : > { %p2880_p7 = scmp.ne.s32.totalorder %s3315_s19, %s2879_s14  ;;  %s2884_s21 = scalar_lea.hbm %s3814_s11, 64 }
  0x5d   : > { %p2885_p4 = scmp.lt.s32.totalorder %s3315_s19, %s3814_s11  ;;  %p2886_p5 = scmp.lt.s32.totalorder %s2884_s21, %s2879_s14 }
  0x5e   : > { %p2882_p2 = pnand %p2880_p7, %p3258_p11 }
  0x5f   : > { %p2887_p6 = por %p2886_p5, %p2885_p4 }
  0x60   : > { %p2883_p3 = pneg %p2882_p2 }
  0x62   : > { %p2888_p10 = pnand %p2887_p6, %p2883_p3 }
  0x64   : > { %2891 = shalt.err (!%p2888_p10)
}
  0x65   : > { %s2892_s20 = scalar_lea.vmem %s571_s27, 16  ;;  %s3101_s6 = smov [#allocation11]  }
  0x66   : > { %p2893_p12 = scmp.ne.s32.totalorder %s571_s27, %s2892_s20  ;;  %s2897_s0 = sshll.u32 %s3101_s6, 4  ;;  %s2898_s0 = int_to_ptr.vmem [resolvable:$false] %s2897_s0 }
  0x67   : > { %s2899_s9 = scalar_lea.vmem %s2898_s0, 32  ;;  %p2900_p0 = scmp.lt.s32.totalorder %s571_s27, %s2898_s0 }
  0x68   : > { %p2895_p13 = pnand %p2893_p12, %p3258_p11  ;;  %p2901_p1 = scmp.lt.s32.totalorder %s2899_s9, %s2892_s20 }
  0x6a   : > { %p2896_p9 = pneg %p2895_p13  ;;  %p2902_p7 = por %p2901_p1, %p2900_p0 }
  0x6c   : > { %p2903_p2 = pnand %p2902_p7, %p2896_p9 }
  0x6e   : > { %2906 = shalt.err (!%p2903_p2)
}
  0x6f   : > { %s3846_s14 = scalar_lea.sflag [#allocation12], %s3240_s25  ;;  %s2640_s15 = smul.u32 3072, %s3097_s16 }
  0x70   : > { %2677 = dma.hbm_to_vmem [thread:$0]  (!%p3235_p8), %s3315_s19, 16, %s571_s27, %s3846_s14  }
  0x71   : > { %s442_s3 = scalar_lea.vmem [#allocation3], %s2639_s1  ;;  %s3847_s2 = sld [smem:[#allocation26_spill]] }
  0x72   : > { %s449_s21 = sshll.u32 %s442_s3, 4  ;;  %s439_s9 = scalar_lea.sflag [#allocation4], %s3233_s23  ;;  %s3344_s21 = int_to_ptr.vmem [resolvable:$true] %s449_s21 }
  0x77   : > { %s3342_s0 = scalar_lea.hbm %s3847_s2, %s2640_s15  ;;  %s2912_s1 = scalar_lea.hbm %s3847_s2, 12288 }
  0x78   : > { %s2907_s20 = scalar_lea.hbm %s3342_s0, 3072  ;;  %p2913_p6 = scmp.lt.s32.totalorder %s3342_s0, %s3847_s2 }
  0x79   : > { %p2908_p3 = scmp.ne.s32.totalorder %s3342_s0, %s2907_s20  ;;  %p2914_p10 = scmp.lt.s32.totalorder %s2912_s1, %s2907_s20 }
  0x7b   : > { %p2910_p4 = pnand %p2908_p3, %p3258_p11  ;;  %p2915_p12 = por %p2914_p10, %p2913_p6 }
  0x7d   : > { %p2911_p5 = pneg %p2910_p4 }
  0x7f   : > { %p2916_p13 = pnand %p2915_p12, %p2911_p5 }
  0x81   : > { %2919 = shalt.err (!%p2916_p13)
}
  0x82   : > { %s2920_s15 = scalar_lea.vmem %s3344_s21, 3072  ;;  %s3102_s3 = smov [#allocation3]  }
  0x83   : > { %p2921_p9 = scmp.ne.s32.totalorder %s3344_s21, %s2920_s15  ;;  %s2925_s28 = sshll.u32 %s3102_s3, 4  ;;  %s2926_s28 = int_to_ptr.vmem [resolvable:$false] %s2925_s28 }
  0x84   : > { %s2927_s29 = scalar_lea.vmem %s2926_s28, 6144  ;;  %p2928_p7 = scmp.lt.s32.totalorder %s3344_s21, %s2926_s28 }
  0x85   : > { %p2923_p0 = pnand %p2921_p9, %p3258_p11  ;;  %p2929_p2 = scmp.lt.s32.totalorder %s2927_s29, %s2920_s15 }
  0x87   : > { %p2924_p1 = pneg %p2923_p0  ;;  %p2930_p3 = por %p2929_p2, %p2928_p7 }
  0x89   : > { %p2931_p4 = pnand %p2930_p3, %p2924_p1 }
  0x8b   : > { %2934 = shalt.err (!%p2931_p4)
}
  0x8c   : > { %s3103_s20 = smov 192   ;;  %s3104_s19 = smov 12  }
  0x8d   : > { %2662 = dma.hbm_to_vmem [thread:$0]  (!%p3235_p8), %s3342_s0, 3072, %s3344_s21, %s439_s9, %s3103_s20, %s3103_s20, %s3104_s19  }
  0x8e   : > { %s3848_s7 = sld [smem:[#allocation29_spill]]  ;;  %s500_s14 = scalar_lea.vmem [#allocation7], %s3233_s23 }
  0x8f   : > { %s507_s15 = sshll.u32 %s500_s14, 4  ;;  %s2358_s3 = sshll.u32 %s3233_s23, 6  ;;  %s508_s15 = int_to_ptr.vmem [resolvable:$true] %s507_s15 }
  0x94   : > { %s3373_s6 = scalar_lea.hbm %s3848_s7, %s3243_s26  ;;  %s2940_s21 = scalar_lea.hbm %s3848_s7, 64 }
  0x95   : > { %s2935_s28 = scalar_lea.hbm %s3373_s6, 16  ;;  %p2941_p12 = scmp.lt.s32.totalorder %s3373_s6, %s3848_s7 }
  0x96   : > { %p2936_p5 = scmp.ne.s32.totalorder %s3373_s6, %s2935_s28  ;;  %p2942_p13 = scmp.lt.s32.totalorder %s2940_s21, %s2935_s28 }
  0x98   : > { %p2938_p6 = pnand %p2936_p5, %p3258_p11  ;;  %p2943_p9 = por %p2942_p13, %p2941_p12 }
  0x9a   : > { %p2939_p10 = pneg %p2938_p6 }
  0x9c   : > { %p2944_p0 = pnand %p2943_p9, %p2939_p10 }
  0x9e   : > { %2947 = shalt.err (!%p2944_p0)
}
  0x9f   : > { %s2948_s20 = scalar_lea.vmem %s508_s15, 16  ;;  %s3105_s19 = smov [#allocation7]  }
  0xa0   : > { %p2949_p1 = scmp.ne.s32.totalorder %s508_s15, %s2948_s20  ;;  %s2953_s27 = sshll.u32 %s3105_s19, 4  ;;  %s2954_s27 = int_to_ptr.vmem [resolvable:$false] %s2953_s27 }
  0xa1   : > { %s2955_s1 = scalar_lea.vmem %s2954_s27, 32  ;;  %p2956_p3 = scmp.lt.s32.totalorder %s508_s15, %s2954_s27 }
  0xa2   : > { %p2951_p7 = pnand %p2949_p1, %p3258_p11  ;;  %p2957_p4 = scmp.lt.s32.totalorder %s2955_s1, %s2948_s20 }
  0xa4   : > { %p2952_p2 = pneg %p2951_p7  ;;  %p2958_p5 = por %p2957_p4, %p2956_p3 }
  0xa6   : > { %p2959_p6 = pnand %p2958_p5, %p2952_p2 }
  0xa8   : > { %2962 = shalt.err (!%p2959_p6)
}
  0xa9   : > { %s3849_s2 = scalar_lea.sflag [#allocation6], %s3240_s25  ;;  %s2441_s14 = sshll.u32 %s3097_s16, 10 }
  0xaa   : > { %2668 = dma.hbm_to_vmem [thread:$0]  (!%p3235_p8), %s3373_s6, 16, %s508_s15, %s3849_s2  }
  0xab   : > { %s3399_s21 = scalar_lea.hbm %s3813_s10, %s2441_s14  ;;  %s543_s0 = scalar_lea.vmem [#allocation10], %s2358_s3 }
  0xac   : > { %s550_s9 = sshll.u32 %s543_s0, 4  ;;  %s2963_s20 = scalar_lea.hbm %s3399_s21, 1024  ;;  %s3401_s9 = int_to_ptr.vmem [resolvable:$true] %s550_s9 }
  0xad   : > { %p2964_p10 = scmp.ne.s32.totalorder %s3399_s21, %s2963_s20  ;;  %s2968_s16 = scalar_lea.hbm %s3813_s10, 4096 }
  0xae   : > { %p2969_p9 = scmp.lt.s32.totalorder %s3399_s21, %s3813_s10  ;;  %p2970_p0 = scmp.lt.s32.totalorder %s2968_s16, %s2963_s20 }
  0xaf   : > { %p2966_p12 = pnand %p2964_p10, %p3258_p11 }
  0xb0   : > { %p2971_p1 = por %p2970_p0, %p2969_p9 }
  0xb1   : > { %p2967_p13 = pneg %p2966_p12 }
  0xb3   : > { %p2972_p7 = pnand %p2971_p1, %p2967_p13 }
  0xb5   : > { %2975 = shalt.err (!%p2972_p7)
}
  0xb6   : > { %s2976_s3 = scalar_lea.vmem %s3401_s9, 1024  ;;  %s3106_s1 = smov [#allocation10]  }
  0xb7   : > { %p2977_p2 = scmp.ne.s32.totalorder %s3401_s9, %s2976_s3  ;;  %s2981_s2 = sshll.u32 %s3106_s1, 4  ;;  %s2982_s2 = int_to_ptr.vmem [resolvable:$false] %s2981_s2 }
  0xb8   : > { %s2983_s14 = scalar_lea.vmem %s2982_s2, 2048  ;;  %p2984_p5 = scmp.lt.s32.totalorder %s3401_s9, %s2982_s2 }
  0xb9   : > { %p2979_p3 = pnand %p2977_p2, %p3258_p11  ;;  %p2985_p6 = scmp.lt.s32.totalorder %s2983_s14, %s2976_s3 }
  0xbb   : > { %p2980_p4 = pneg %p2979_p3  ;;  %p2986_p10 = por %p2985_p6, %p2984_p5 }
  0xbd   : > { %p2987_p12 = pnand %p2986_p10, %p2980_p4 }
  0xbf   : > { %2990 = shalt.err (!%p2987_p12)
}
  0xc0   : > { %s3107_s28 = smov 64   ;;  %s3108_s29 = smov 4  }
  0xc1   : > { %s3850_s0 = scalar_lea.sflag [#allocation9], %s3240_s25  ;;  %s585_s6 = scalar_lea.hbm %s3815_s12, %s3243_s26 }
  0xc2   : > { %2674 = dma.hbm_to_vmem [thread:$0]  (!%p3235_p8), %s3399_s21, 1024, %s3401_s9, %s3850_s0, %s3107_s28, %s3107_s28, %s3108_s29  }
  0xc3   : > { %s580_s16 = scalar_lea.vmem [#allocation13], %s3233_s23  ;;  %s2991_s27 = scalar_lea.hbm %s585_s6, 16 }
  0xc4   : > { %s587_s15 = sshll.u32 %s580_s16, 4  ;;  %p2992_p13 = scmp.ne.s32.totalorder %s585_s6, %s2991_s27  ;;  %s588_s15 = int_to_ptr.vmem [resolvable:$true] %s587_s15 }
  0xc5   : > { %s2996_s2 = scalar_lea.hbm %s3815_s12, 64  ;;  %p2997_p1 = scmp.lt.s32.totalorder %s585_s6, %s3815_s12 }
  0xc6   : > { %p2994_p9 = pnand %p2992_p13, %p3258_p11  ;;  %p2998_p7 = scmp.lt.s32.totalorder %s2996_s2, %s2991_s27 }
  0xc8   : > { %p2995_p0 = pneg %p2994_p9  ;;  %p2999_p2 = por %p2998_p7, %p2997_p1 }
  0xca   : > { %p3000_p3 = pnand %p2999_p2, %p2995_p0 }
  0xcc   : > { %3003 = shalt.err (!%p3000_p3)
}
  0xcd   : > { %s3004_s21 = scalar_lea.vmem %s588_s15, 16  ;;  %s3109_s9 = smov [#allocation13]  }
  0xce   : > { %p3005_p4 = scmp.ne.s32.totalorder %s588_s15, %s3004_s21  ;;  %s3009_s28 = sshll.u32 %s3109_s9, 4  ;;  %s3010_s28 = int_to_ptr.vmem [resolvable:$false] %s3009_s28 }
  0xcf   : > { %s3011_s29 = scalar_lea.vmem %s3010_s28, 32  ;;  %p3012_p10 = scmp.lt.s32.totalorder %s588_s15, %s3010_s28 }
  0xd0   : > { %p3007_p5 = pnand %p3005_p4, %p3258_p11  ;;  %p3013_p12 = scmp.lt.s32.totalorder %s3011_s29, %s3004_s21 }
  0xd2   : > { %p3008_p6 = pneg %p3007_p5  ;;  %p3014_p13 = por %p3013_p12, %p3012_p10 }
  0xd4   : > { %p3015_p9 = pnand %p3014_p13, %p3008_p6 }
  0xd6   : > { %3018 = shalt.err (!%p3015_p9)
}
  0xd7   : > { %s3851_s7 = scalar_lea.sflag [#allocation12], %s3240_s25  ;;  %s3448_s19 = scalar_lea.hbm %s3816_s13, %s3243_s26 }
  0xd8   : > { %2680 = dma.hbm_to_vmem [thread:$0]  (!%p3235_p8), %s585_s6, 16, %s588_s15, %s3851_s7  }
  0xd9   : > { %s597_s16 = scalar_lea.vmem [#allocation14], %s3233_s23  ;;  %s595_s3 = scalar_lea.sflag [#allocation15], %s3233_s23 }
  0xda   : > { %s604_s27 = sshll.u32 %s597_s16, 4  ;;  %s3019_s1 = scalar_lea.hbm %s3448_s19, 16  ;;  %s605_s27 = int_to_ptr.vmem [resolvable:$true] %s604_s27 }
  0xdb   : > { %p3020_p0 = scmp.ne.s32.totalorder %s3448_s19, %s3019_s1  ;;  %s3024_s6 = scalar_lea.hbm %s3816_s13, 64 }
  0xdc   : > { %p3025_p2 = scmp.lt.s32.totalorder %s3448_s19, %s3816_s13  ;;  %p3026_p3 = scmp.lt.s32.totalorder %s3024_s6, %s3019_s1 }
  0xdd   : > { %p3022_p1 = pnand %p3020_p0, %p3258_p11 }
  0xde   : > { %p3027_p4 = por %p3026_p3, %p3025_p2 }
  0xdf   : > { %p3023_p7 = pneg %p3022_p1 }
  0xe1   : > { %p3028_p5 = pnand %p3027_p4, %p3023_p7 }
  0xe3   : > { %3031 = shalt.err (!%p3028_p5)
}
  0xe4   : > { %s3032_s26 = scalar_lea.vmem %s605_s27, 16  ;;  %s3110_s23 = smov [#allocation14]  }
  0xe5   : > { %p3033_p6 = scmp.ne.s32.totalorder %s605_s27, %s3032_s26  ;;  %s3037_s21 = sshll.u32 %s3110_s23, 4  ;;  %s3038_s21 = int_to_ptr.vmem [resolvable:$false] %s3037_s21 }
  0xe6   : > { %s3039_s9 = scalar_lea.vmem %s3038_s21, 32  ;;  %p3040_p13 = scmp.lt.s32.totalorder %s605_s27, %s3038_s21 }
  0xe7   : > { %p3035_p10 = pnand %p3033_p6, %p3258_p11  ;;  %p3041_p9 = scmp.lt.s32.totalorder %s3039_s9, %s3032_s26 }
  0xe9   : > { %p3036_p12 = pneg %p3035_p10  ;;  %p3042_p0 = por %p3041_p9, %p3040_p13 }
  0xeb   : > { %p3043_p1 = pnand %p3042_p0, %p3036_p12 }
  0xed   : > { %3046 = shalt.err (!%p3043_p1)
}
  0xee   : > { %2683 = dma.hbm_to_vmem [thread:$0]  (!%p3235_p8), %s3448_s19, 16, %s605_s27, %s595_s3  }
  0xef   : > { %p3852_p7 = scmp.ne.s32.totalorder %s3844_s8, 0 }
  0xf0   : > { %s3471_s18 = sand.u32 (!%p3852_p7), 1, %s3089_s30   ;;  %p3853_p11 = scmp.ne.s32.totalorder (!%p3852_p7), %s3837_s22, 0 }
  0xf1   : > { %613 = sbr.rel (%p3852_p7) target bundleno = 3810 (0xee2), region = 76  ;;  %s616_s29 = scalar_lea.sflag (!%p3852_p7), [#allocation4], %s3471_s18 }
  0xf2   : > { %s2641_s28 = smul.u32 (!%p3852_p7), 192, %s3471_s18 }
  0xf4   : > { %s3475_s7 = scalar_lea.vmem (!%p3852_p7), [#allocation3], %s2641_s28 }
  0xf6   : > { %3064 = dma.done.wait (%p3853_p11), %s616_s29, 3072  }
  0xf7   : > { %3066 = vsyncadd (%p3853_p11), %s616_s29, 4294964224  ;;  %s624_s24 = sand.u32 1, %s3211_s17  }
  0xf8   : > { %s625_s8 = scalar_lea.sflag [#allocation6], %s624_s24 }
  0xf9   : > { %3068 = dma.done.wait (%p3853_p11), %s625_s8, 32  }
  0xfa   : > { %3070 = vsyncadd (%p3853_p11), %s625_s8, 4294967264  ;;  %s641_s19 = scalar_lea.sflag [#allocation9], %s624_s24 }
  0xfb   : > { %3072 = dma.done.wait (%p3853_p11), %s641_s19, 1040  }
  0xfc   : > { %3074 = vsyncadd (%p3853_p11), %s641_s19, 4294966256  ;;  %s2365_s27 = sshll.u32 %s3471_s18, 6  ;;  %s658_s1 = scalar_lea.sflag [#allocation12], %s624_s24 }
  0xfd   : > { %s3494_s3 = scalar_lea.vmem [#allocation10], %s2365_s27 }
  0xfe   : > { %3076 = dma.done.wait (%p3853_p11), %s658_s1, 32  }
  0xff   : > { %3078 = vsyncadd (%p3853_p11), %s658_s1, 4294967264  ;;  %s674_s6 = scalar_lea.sflag [#allocation15], %s3471_s18 }
 0x100   : > { %3080 = dma.done.wait (%p3853_p11), %s674_s6, 16  }
 0x101   : > { %3082 = vsyncadd (%p3853_p11), %s674_s6, 4294967280  ;;  %p762_p8 = scmp.lt.s32.totalorder %s3211_s17, 3  ;;  %s3854_s27 = sld [smem:[#allocation27_spill]] }
 0x102   : > { %s3855_s2 = sld [smem:[#allocation30_spill]]  ;;  %p2370_p2 = scmp.ne.s32.totalorder %s3211_s17, 0 }
 0x103   : > { %s3510_s14 = scalar_select %p762_p8, %s3211_s17, 3 }
 0x104   : > { %783 = sbr.rel (%p2370_p2) target bundleno = 269 (0x10d), region = 112  ;;  %s3856_s16 = sld [smem:[#allocation24_spill]] (!%p2370_p2) }
 0x105   : > { %s2642_s26 = smul.u32 3, %s3510_s14  ;;  %s2442_s23 = sshll.u32 %s3510_s14, 6 }
 0x106   : > { %s3517_s28 = scalar_lea.vmem %s3807_s4, %s2442_s23  ;;  %s773_s22 = scalar_lea.vmem %s3808_s5, %s3510_s14 }
 0x107   : > { %s3526_s1 = scalar_lea.vmem %s3854_s27, %s2642_s26 }
 0x108   : > { %s3531_s25 = scalar_lea.vmem %s3855_s2, %s2442_s23 }
 0x10a   : > { %s3857_s20 = smov %s3856_s16  ;;  %v784_v0 = vld [vmem:[%s3856_s16] sm:$0xff] }
 0x10b   : > { %v785_v1 = vld [vmem:[%s3857_s20 + $0x8] sm:$0xff]  ;;  %786 = vst [vmem:[#allocation2] sm:$0xff] %v784_v0 }
 0x10c   : > { %787 = vst [vmem:[#allocation2 + $0x8] sm:$0xff] %v785_v1 }
 0x10d PF: > { %v2727_v2 = vld [vmem:[%s3475_s7 + $0xac] ss:$12 sps:$4 sm:$0xff]   ;;  %v2729_v3 = vld [vmem:[%s3475_s7 + $0xa8] ss:$12 sps:$4 sm:$0xff]   ;;  %v3111_v4 = vmov 0   ;;  %v3112_v22 = vmov 0.0   ;;  %v827_v23 = vlaneseq }
 0x10e   : > { %1002 = vmatprep.mubr.bf16.mxu0 %v3111_v4  ;;  %970 = vmatprep.subr.bf16.mxu0 %v2727_v2  ;;  %v2730_v5 = vld [vmem:[%s3475_s7 + $0x94] ss:$12 sps:$4 sm:$0xff]   ;;  %v2732_v6 = vld [vmem:[%s3475_s7 + $0x90] ss:$12 sps:$4 sm:$0xff]   ;;  %v2735_v8 = vld [vmem:[%s3475_s7 + $0x78] ss:$12 sps:$4 sm:$0xff]  }
 0x10f   : > { %971 = vmatpush1.bf16.msra.mxu0 %v2729_v3  ;;  %v2733_v7 = vld [vmem:[%s3475_s7 + $0x7c] ss:$12 sps:$4 sm:$0xff]   ;;  %v2736_v9 = vld [vmem:[%s3475_s7 + $0x64] ss:$12 sps:$4 sm:$0xff]   ;;  %v2738_v10 = vld [vmem:[%s3475_s7 + $0x60] ss:$12 sps:$4 sm:$0xff]   ;;  %2499 = vmatprep.subr.bf16.mxu1 %v3112_v22 }
 0x110   : > { %972 = vmatprep.subr.bf16.mxu0 %v2730_v5  ;;  %v2739_v11 = vld [vmem:[%s3475_s7 + $0x4c] ss:$12 sps:$4 sm:$0xff]   ;;  %v2741_v12 = vld [vmem:[%s3475_s7 + $0x48] ss:$12 sps:$4 sm:$0xff]   ;;  %v2744_v14 = vld [vmem:[%s3475_s7 + $0x30] ss:$12 sps:$4 sm:$0xff]  }
 0x111   : > { %v2742_v13 = vld [vmem:[%s3475_s7 + $0x34] ss:$12 sps:$4 sm:$0xff]   ;;  %v2745_v15 = vld [vmem:[%s3475_s7 + $0x1c] ss:$12 sps:$4 sm:$0xff]   ;;  %v2747_v16 = vld [vmem:[%s3475_s7 + $0x18] ss:$12 sps:$4 sm:$0xff]  }
 0x112   : > { %v2748_v17 = vld [vmem:[%s3475_s7 + $0x4] ss:$12 sps:$4 sm:$0xff]   ;;  %v2750_v18 = vld [vmem:[%s3475_s7] ss:$12 sps:$4 sm:$0xff]   ;;  %vm3113_vm0 = vmmov 0   ;;  %v3568_v24 = vshrl.u32 %v827_v23, 7 }
 0x113   : > { %973 = vmatpush1.bf16.msra.mxu0 %v2732_v6  ;;  %v3556_v19 = vld [vmem:[#allocation2] sm:$0xff]  ;;  %v3558_v20 = vld [vmem:[#allocation2 + $0x8] sm:$0xff]  ;;  %2515 = vmatprep.mubr.msk.bf16.mxu1 %vm3113_vm0, %v3112_v22  ;;  %vm1073_vm1 = vcmask 261120   ;;  %s3114_s0 = smov 96   ;;  %v2753_v43 = vld [vmem:[%s3475_s7 + $0x80] ss:$12 sps:$4 sm:$0xff]  }
 0x114   : > { %974 = vmatprep.subr.bf16.mxu0 %v2733_v7  ;;  %v824_v21 = vpack.c.bf16 %v3558_v20, %v3556_v19  ;;  %v833_v25 = vsub.s32 1, %v3568_v24  ;;  %v3572_v27 = vld [vmem:[%s3526_s1] sm:$0x7]  ;;  %v829_v29 = vsub.s32 0, %v3568_v24  ;;  %v2752_v42 = vld [vmem:[%s3475_s7 + $0x98] ss:$12 sps:$4 sm:$0xff]  }
 0x115   : > { %v2751_v41 = vld [vmem:[%s3475_s7 + $0xb0] ss:$12 sps:$4 sm:$0xff]   ;;  %v2754_v44 = vld [vmem:[%s3475_s7 + $0x68] ss:$12 sps:$4 sm:$0xff]   ;;  %v2756_v46 = vld [vmem:[%s3475_s7 + $0x38] ss:$12 sps:$4 sm:$0xff]  }
 0x116   : > { %v834_v30 = vrot.slane %v3572_v27, %v833_v25  ;;  %v830_v33 = vrot.slane %v3572_v27, %v829_v29  ;;  %2500 = vmatpush3.bf16.msra.mxu1 %v2751_v41  ;;  %v2755_v45 = vld [vmem:[%s3475_s7 + $0x50] ss:$12 sps:$4 sm:$0xff]   ;;  %v2757_v47 = vld [vmem:[%s3475_s7 + $0x20] ss:$12 sps:$4 sm:$0xff]   ;;  %v2758_v48 = vld [vmem:[%s3475_s7 + $0x8] ss:$12 sps:$4 sm:$0xff]  }
 0x117   : > { %975 = vmatpush1.bf16.msra.mxu0 %v2735_v8  ;;  %2501 = vmatprep.subr.bf16.mxu1 %v3112_v22  ;;  %s3858_s2 = sld [smem:[#allocation25_spill]]  ;;  %vm1125_vm2 = vcmask 130048   ;;  %s3115_s23 = smov 64  }
 0x118   : > { %976 = vmatprep.subr.bf16.mxu0 %v2736_v9  ;;  %s3116_s24 = smov 32   ;;  %s3860_s14 = scalar_lea.vmem [#allocation7], %s3471_s18 }
 0x119   : > { %s3864_s27 = scalar_lea.vmem [#allocation14], %s3471_s18  ;;  %p2438_p3 = scmp.ne.s32.totalorder %s3211_s17, 3 }
 0x11a   : > { %2502 = vmatpush3.bf16.msra.mxu1 %v2752_v42  ;;  %s3865_s21 = sld [smem:[#allocation32_spill]] (!%p2438_p3) }
 0x11b   : > { %977 = vmatpush1.bf16.msra.mxu0 %v2738_v10  ;;  %2503 = vmatprep.subr.bf16.mxu1 %v3112_v22 }
 0x11c   : > { %978 = vmatprep.subr.bf16.mxu0 %v2739_v11 }
 0x11d   : > { %v3618_v53 = vld [vmem:[%s3858_s2] sm:$0xff]  ;;  %v3624_v58 = vld [vmem:[%s3858_s2 + $0x8] sm:$0xff] }
 0x11e   : > { %2504 = vmatpush3.bf16.msra.mxu1 %v2753_v43 }
 0x11f   : > { %979 = vmatpush1.bf16.msra.mxu0 %v2741_v12  ;;  %2505 = vmatprep.subr.bf16.mxu1 %v3112_v22 }
 0x120   : > { %980 = vmatprep.subr.bf16.mxu0 %v2742_v13 }
 0x122   : > { %2506 = vmatpush3.bf16.msra.mxu1 %v2754_v44 }
 0x123   : > { %981 = vmatpush1.bf16.msra.mxu0 %v2744_v14  ;;  %2507 = vmatprep.subr.bf16.mxu1 %v3112_v22 }
 0x124   : > { %982 = vmatprep.subr.bf16.mxu0 %v2745_v15 }
 0x126   : > { %2508 = vmatpush3.bf16.msra.mxu1 %v2755_v45 }
 0x127   : > { %983 = vmatpush1.bf16.msra.mxu0 %v2747_v16  ;;  %2509 = vmatprep.subr.bf16.mxu1 %v3112_v22  ;;  %v837_v16 = vsub.s32 2, %v3568_v24 }
 0x128   : > { %984 = vmatprep.subr.bf16.mxu0 %v2748_v17 }
 0x12a   : > { %2510 = vmatpush3.bf16.msra.mxu1 %v2756_v46 }
 0x12b   : > { %985 = vmatpush1.bf16.msra.mxu0 %v2750_v18  ;;  %2511 = vmatprep.subr.bf16.mxu1 %v3112_v22  ;;  %v838_v18 = vrot.slane %v3572_v27, %v837_v16 }
 0x12c   : > { %2519 = vmatprep.subr.bf16.mxu0 %v3112_v22 }
 0x12e   : > { %1003 = vmatmul.mubr.bf16.vlgmr.msra.gmra.mxu0 %v824_v21  ;;  %2512 = vmatpush3.bf16.msra.mxu1 %v2757_v47 }
 0x12f   : > { %2521 = vmatprep.mubr.msk.bf16.mxu0 %vm3113_vm0, %v3112_v22  ;;  %2513 = vmatprep.subr.bf16.mxu1 %v3112_v22 }
 0x132   : > { %2514 = vmatpush3.bf16.msra.mxu1 %v2758_v48 }
 0x133   : > { %2525 = vmatprep.subr.bf16.mxu1 %v3112_v22 }
 0x135   : > { %2516 = vmatmul.mubr.bf16.vlgmr.msra.gmra.mxu1 %v824_v21 }
 0x136   : > { %2527 = vmatprep.mubr.msk.bf16.mxu1 %vm3113_vm0, %v3112_v22 }
 0x1ee   : > { %v1004_v26 = vpop.f32.mrf.mxu0 }
 0x1ef   : > { %v1005_v38 = vadd.f32 %v1004_v26, %v830_v33 }
 0x1f0   : > { %v1006_v28 = vpop.f32.mrf.mxu0 }
 0x1f1   : > { %v1007_v34 = vadd.f32 %v1006_v28, %v834_v30 }
 0x1f2   : > { %v1008_v31 = vpop.f32.mrf.mxu0 }
 0x1f3   : > { %v1009_v36 = vadd.f32 %v1008_v31, %v830_v33 }
 0x1f4   : > { %v1010_v32 = vpop.f32.mrf.mxu0 }
 0x1f5   : > { %v1011_v35 = vadd.f32 %v1010_v32, %v834_v30  ;;  %v3583_v40 = vpack.c.bf16 %v1009_v36, %v1005_v38  ;;  %v1047_v17 = vpop.f32.mrf.mxu1 }
 0x1f6   : > { %v1048_v23 = vadd.f32 %v1047_v17, %v838_v18 }
 0x1f7   : > { %v3577_v37 = vpack.c.bf16 %v1011_v35, %v1007_v34  ;;  %v2517_v21 = vpop.f32.mrf.mxu1 }
 0x1f9   : > { %1199 = vrot.lane.b32.xlu0 %v3577_v37, %s3114_s0  ;;  %v1078_v39 = vsel %vm1073_vm1, %v3577_v37, 0  ;;  %v1050_v25 = vpop.f32.mrf.mxu1 }
 0x1fa   : > { %2520 = vmatpush3.bf16.xpose.msra.mxu0 %v1078_v39  ;;  %v1051_v26 = vadd.f32 %v1050_v25, %v838_v18 }
 0x1fb   : > { %2531 = vmatprep.subr.bf16.mxu0 %v3112_v22  ;;  %v2518_v28 = vpop.f32.mrf.mxu1 }
 0x1fc   : > { %v3637_v30 = vpack.c.bf16 %v1051_v26, %v1048_v23 }
 0x1fd   : > { %1196 = vrot.lane.b32.xlu0 %v3583_v40, %s3114_s0 }
 0x1fe   : > { %2526 = vmatpush3.bf16.msra.mxu1 %v3637_v30 }
 0x1ff   : > { %2537 = vmatprep.subr.bf16.mxu1 %v3112_v22 }
 0x201   : > { %2522 = vmatmul.mubr.msk.bf16.vlgmr.msra.gmra.mxu0 %vm1073_vm1, %v3583_v40 }
 0x202   : > { %2533 = vmatprep.mubr.msk.bf16.mxu0 %vm3113_vm0, %v3112_v22 }
 0x26b   : > { %v1200_v49 = vpop.permute.xlu0 %1199 }
 0x26c   : > { %v1205_v50 = vsel %vm1073_vm1, %v1200_v49, 0 }
 0x26d   : > { %2532 = vmatpush3.bf16.xpose.msra.mxu0 %v1205_v50 }
 0x26e   : > { %2543 = vmatprep.subr.bf16.mxu0 %v3112_v22 }
 0x26f   : > { %v1197_v51 = vpop.permute.xlu0 %1196 }
 0x274   : > { %2534 = vmatmul.mubr.msk.bf16.vlgmr.msra.gmra.mxu0 %vm1073_vm1, %v1197_v51  ;;  %v2761_v51 = vld [vmem:[%s3517_s28 + $0x18] sm:$0xff]  }
 0x275   : > { %2547 = vmatprep.mubr.msk.bf16.mxu0 %vm3113_vm0, %v3112_v22  ;;  %2544 = vmatpush3.bf16.msra.mxu0 %v2761_v51 }
 0x276   : > { %2545 = vmatprep.subr.bf16.mxu0 %v3112_v22 }
 0x2c1   : > { %v1114_v52 = vpop.f32.mrf.mxu0 }
 0x2c2   : > { %v1121_v54 = vmul.f32 0.17677669, %v1114_v52 }
 0x2c3   : > { %v2523_v55 = vpop.f32.mrf.mxu0 }
 0x2c4   : > { %v1123_v56 = vadd.f32 %v1121_v54, %v3618_v53 }
 0x2c5   : > { %v1117_v57 = vpop.f32.mrf.mxu0 }
 0x2c6   : > { %v1122_v59 = vmul.f32 0.17677669, %v1117_v57  ;;  %v1126_v60 = vsel %vm1125_vm2, %v1123_v56, -inf }
 0x2c7   : > { %1127 = vmax.xlane.f32.xlu1 %v1126_v60  ;;  %v2524_v61 = vpop.f32.mrf.mxu0 }
 0x2c8   : > { %v1124_v62 = vadd.f32 %v1122_v59, %v3624_v58  ;;  %v2759_v61 = vld [vmem:[%s3517_s28 + $0x8] sm:$0xff]  }
 0x2ca   : > { %v1129_v63 = vsel %vm1125_vm2, %v1124_v62, -inf }
 0x2cb   : > { %1130 = vmax.xlane.f32.xlu1 %v1129_v63  ;;  %v2760_v63 = vld [vmem:[%s3517_s28] sm:$0xff]  }
 0x334   : > { %v1241_v0 = vpop.f32.mrf.mxu0 }
 0x335   : > { %v1248_v1 = vmul.f32 0.17677669, %v1241_v0  ;;  %v2762_v0 = vld [vmem:[%s3517_s28 + $0x10] sm:$0xff]  }
 0x336   : > { %v2535_v2 = vpop.f32.mrf.mxu0  ;;  %2546 = vmatpush3.bf16.msra.mxu0 %v2762_v0 }
 0x337   : > { %v1250_v3 = vadd.f32 %v1248_v1, %v3618_v53  ;;  %2559 = vmatprep.subr.bf16.mxu0 %v3112_v22 }
 0x338   : > { %v1244_v4 = vpop.f32.mrf.mxu0 }
 0x339   : > { %v1249_v5 = vmul.f32 0.17677669, %v1244_v4  ;;  %v1252_v6 = vsel %vm1125_vm2, %v1250_v3, -inf }
 0x33a   : > { %1253 = vmax.xlane.f32.xlu0 %v1252_v6  ;;  %v2536_v7 = vpop.f32.mrf.mxu0 }
 0x33b   : > { %v1251_v8 = vadd.f32 %v1249_v5, %v3624_v58 }
 0x33d   : > { %v1255_v9 = vsel %vm1125_vm2, %v1251_v8, -inf }
 0x33e   : > { %1256 = vmax.xlane.f32.xlu1 %v1255_v9 }
 0x350   : > { %v1128_v10 = vpop.xlane.xlu1 %1127  ;;  %1438 = vrot.lane.b32.xlu0 %v3577_v37, %s3115_s23 }
 0x351   : > { %v1132_v11 = vsub.f32 %v1123_v56, %v1128_v10 }
 0x353   : > { %v1134_v12 = vmul.f32 1.442695, %v1132_v11 }
 0x354   : > { %v1131_v13 = vpop.xlane.xlu1 %1130 }
 0x355   : > { %2783 = vpow2.f32 %v1134_v12  ;;  %v1133_v14 = vsub.f32 %v1124_v62, %v1131_v13 }
 0x357   : > { %v1136_v15 = vmul.f32 1.442695, %v1133_v14 }
 0x359   : > { %2785 = vpow2.f32 %v1136_v15 }
 0x362   : > { %v2784_v29 = vpop.eup %2783 }
 0x363   : > { %v1138_v31 = vsel %vm1125_vm2, %v2784_v29, 0.0 }
 0x364   : > { %1139 = vadd.xlane.f32.xlu1 %v1138_v31 }
 0x366   : > { %v2786_v32 = vpop.eup %2785 }
 0x367   : > { %v1141_v24 = vsel %vm1125_vm2, %v2786_v32, 0.0 }
 0x368   : > { %1142 = vadd.xlane.f32.xlu1 %v1141_v24 }
 0x3c3   : > { %v1254_v27 = vpop.xlane.xlu0 %1253 }
 0x3c4   : > { %v1258_v33 = vsub.f32 %v1250_v3, %v1254_v27 }
 0x3c6   : > { %v1260_v34 = vmul.f32 1.442695, %v1258_v33 }
 0x3c7   : > { %v1257_v35 = vpop.xlane.xlu1 %1256 }
 0x3c8   : > { %2787 = vpow2.f32 %v1260_v34  ;;  %v1259_v36 = vsub.f32 %v1251_v8, %v1257_v35  ;;  %v1439_v8 = vpop.permute.xlu0 %1438 }
 0x3c9   : > { %v1444_v12 = vsel %vm1073_vm1, %v1439_v8, 0 }
 0x3ca   : > { %v1262_v38 = vmul.f32 1.442695, %v1259_v36 }
 0x3cc   : > { %2789 = vpow2.f32 %v1262_v38 }
 0x3d5   : > { %v2788_v39 = vpop.eup %2787 }
 0x3d6   : > { %v1264_v41 = vsel %vm1125_vm2, %v2788_v39, 0.0 }
 0x3d7   : > { %1265 = vadd.xlane.f32.xlu1 %v1264_v41 }
 0x3d9   : > { %v2790_v42 = vpop.eup %2789 }
 0x3da   : > { %v1267_v43 = vsel %vm1125_vm2, %v2790_v42, 0.0 }
 0x3db   : > { %1268 = vadd.xlane.f32.xlu1 %v1267_v43 }
 0x3ec   : > { %1276 = vrot.lane.b32.xlu1 %v3637_v30, %s3114_s0 }
 0x3ed   : > { %v1140_v44 = vpop.xlane.xlu1 %1139 }
 0x3ee   : > { %2791 = vrcp.f32 %v1140_v44 }
 0x3f0   : > { %1436 = vrot.lane.b32.xlu1 %v3583_v40, %s3115_s23 }
 0x3f1   : > { %v1143_v45 = vpop.xlane.xlu1 %1142 }
 0x3f2   : > { %2793 = vrcp.f32 %v1143_v45 }
 0x3fb   : > { %v2792_v46 = vpop.eup %2791 }
 0x3fc   : > { %v1146_v48 = vmul.f32 %v2792_v46, %v2784_v29 }
 0x3ff   : > { %v2794_v47 = vpop.eup %2793 }
 0x400   : > { %v1147_v49 = vmul.f32 %v2794_v47, %v2786_v32 }
 0x402   : > { %v1148_v50 = vpack.c.bf16 %v1147_v49, %v1146_v48 }
 0x404   : > { %2528 = vmatmul.mubr.msk.bf16.vlgmr.msra.gmra.mxu1 %vm1125_vm2, %v1148_v50 }
 0x405   : > { %2539 = vmatprep.mubr.msk.bf16.mxu1 %vm3113_vm0, %v3112_v22 }
 0x460   : > { %v1266_v52 = vpop.xlane.xlu1 %1265 }
 0x461   : > { %2795 = vrcp.f32 %v1266_v52 }
 0x464   : > { %v1269_v54 = vpop.xlane.xlu1 %1268 }
 0x465   : > { %2797 = vrcp.f32 %v1269_v54 }
 0x468   : > { %v1277_v55 = vpop.permute.xlu1 %1276 }
 0x469   : > { %2538 = vmatpush3.bf16.msra.mxu1 %v1277_v55 }
 0x46a   : > { %2551 = vmatprep.subr.bf16.mxu1 %v3112_v22 }
 0x46c   : > { %v1437_v13 = vpop.permute.xlu1 %1436 }
 0x46e   : > { %v2796_v56 = vpop.eup %2795 }
 0x46f   : > { %v1272_v59 = vmul.f32 %v2796_v56, %v2788_v39 }
 0x472   : > { %v2798_v57 = vpop.eup %2797 }
 0x473   : > { %v1273_v60 = vmul.f32 %v2798_v57, %v2790_v42 }
 0x475   : > { %v1274_v62 = vpack.c.bf16 %v1273_v60, %v1272_v59  ;;  %v2764_v60 = vld [vmem:[%s3517_s28 + $0x20] sm:$0xff]  }
 0x477   : > { %2540 = vmatmul.mubr.msk.bf16.vlgmr.msra.gmra.mxu1 %vm1125_vm2, %v1274_v62 }
 0x478   : > { %2552 = vmatpush3.bf16.msra.mxu1 %v2759_v61  ;;  %2555 = vmatprep.mubr.msk.bf16.mxu1 %vm3113_vm0, %v3112_v22 }
 0x479   : > { %2553 = vmatprep.subr.bf16.mxu1 %v3112_v22 }
 0x47c   : > { %2554 = vmatpush3.bf16.msra.mxu1 %v2760_v63 }
 0x47d   : > { %2565 = vmatprep.subr.bf16.mxu1 %v3112_v22 }
 0x4c4   : > { %v1187_v1 = vpop.f32.mrf.mxu1 }
 0x4c6   : > { %v2529_v2 = vpop.f32.mrf.mxu1 }
 0x4c8   : > { %v1190_v3 = vpop.f32.mrf.mxu1 }
 0x4c9   : > { %v1194_v4 = vpack.c.bf16 %v1190_v3, %v1187_v1 }
 0x4ca   : > { %v2530_v5 = vpop.f32.mrf.mxu1 }
 0x4cb   : > { %2556 = vmatmul.mubr.msk.bf16.vlgmr.msra.gmra.mxu1 %vm1073_vm1, %v1194_v4 }
 0x4cc   : > { %2567 = vmatprep.mubr.msk.bf16.mxu1 %vm3113_vm0, %v3112_v22 }
 0x537   : > { %v1316_v6 = vpop.f32.mrf.mxu1 }
 0x539   : > { %v2541_v7 = vpop.f32.mrf.mxu1 }
 0x53b   : > { %v1319_v9 = vpop.f32.mrf.mxu1 }
 0x53c   : > { %v1323_v10 = vpack.c.bf16 %v1319_v9, %v1316_v6 }
 0x53d   : > { %v2542_v11 = vpop.f32.mrf.mxu1 }
 0x53e   : > { %2548 = vmatmul.mubr.msk.bf16.vlgmr.msra.gmra.mxu0 %vm1073_vm1, %v1323_v10 }
 0x53f   : > { %2560 = vmatpush3.bf16.xpose.msra.mxu0 %v1444_v12  ;;  %2561 = vmatprep.mubr.msk.bf16.mxu0 %vm3113_vm0, %v3112_v22 }
 0x540   : > { %2571 = vmatprep.subr.bf16.mxu0 %v3112_v22 }
 0x546   : > { %2562 = vmatmul.mubr.msk.bf16.vlgmr.msra.gmra.mxu0 %vm1073_vm1, %v1437_v13 }
 0x547   : > { %2575 = vmatprep.mubr.msk.bf16.mxu0 %vm3113_vm0, %v3112_v22 }
 0x58b   : > { %v3675_v14 = vpop.f32.mrf.mxu1 }
 0x58d   : > { %v2557_v15 = vpop.f32.mrf.mxu1 }
 0x58f   : > { %v3677_v16 = vpop.f32.mrf.mxu1 }
 0x591   : > { %v2558_v17 = vpop.f32.mrf.mxu1 }
 0x5fe   : > { %v3679_v18 = vpop.f32.mrf.mxu0 }
 0x600   : > { %v2549_v21 = vpop.f32.mrf.mxu0 }
 0x602   : > { %v3681_v23 = vpop.f32.mrf.mxu0 }
 0x604   : > { %v2550_v25 = vpop.f32.mrf.mxu0 }
 0x606   : > { %v1480_v26 = vpop.f32.mrf.mxu0 }
 0x607   : > { %v1487_v28 = vmul.f32 0.17677669, %v1480_v26 }
 0x608   : > { %v2563_v29 = vpop.f32.mrf.mxu0 }
 0x609   : > { %v1489_v31 = vadd.f32 %v1487_v28, %v3618_v53 }
 0x60a   : > { %v1483_v32 = vpop.f32.mrf.mxu0 }
 0x60b   : > { %v1488_v24 = vmul.f32 0.17677669, %v1483_v32  ;;  %v1491_v27 = vsel %vm1125_vm2, %v1489_v31, -inf }
 0x60c   : > { %1492 = vmax.xlane.f32.xlu1 %v1491_v27  ;;  %v2564_v33 = vpop.f32.mrf.mxu0  ;;  %v1433_v27 = vadd.f32 %v3677_v16, %v3681_v23  ;;  %v2765_v16 = vld [vmem:[%s3517_s28 + $0x38] sm:$0xff]  }
 0x60d   : > { %v1490_v34 = vadd.f32 %v1488_v24, %v3624_v58 }
 0x60f   : > { %v1494_v35 = vsel %vm1125_vm2, %v1490_v34, -inf }
 0x610   : > { %1495 = vmax.xlane.f32.xlu0 %v1494_v35 }
 0x626   : > { %1514 = vrot.lane.b32.xlu0 %v3637_v30, %s3115_s23 }
 0x695   : > { %v1493_v36 = vpop.xlane.xlu1 %1492 }
 0x696   : > { %v1497_v38 = vsub.f32 %v1489_v31, %v1493_v36 }
 0x698   : > { %v1499_v39 = vmul.f32 1.442695, %v1497_v38 }
 0x699   : > { %v1496_v41 = vpop.xlane.xlu0 %1495 }
 0x69a   : > { %2799 = vpow2.f32 %v1499_v39  ;;  %v1498_v42 = vsub.f32 %v1490_v34, %v1496_v41 }
 0x69c   : > { %v1501_v43 = vmul.f32 1.442695, %v1498_v42 }
 0x69d   : > { %v1515_v44 = vpop.permute.xlu0 %1514 }
 0x69e   : > { %2801 = vpow2.f32 %v1501_v43  ;;  %2566 = vmatpush3.bf16.msra.mxu1 %v1515_v44 }
 0x69f   : > { %2579 = vmatprep.subr.bf16.mxu1 %v3112_v22 }
 0x6a7   : > { %v2800_v45 = vpop.eup %2799 }
 0x6a8   : > { %v1503_v46 = vsel %vm1125_vm2, %v2800_v45, 0.0 }
 0x6a9   : > { %1504 = vadd.xlane.f32.xlu1 %v1503_v46 }
 0x6ab   : > { %v2802_v47 = vpop.eup %2801 }
 0x6ac   : > { %v1506_v48 = vsel %vm1125_vm2, %v2802_v47, 0.0 }
 0x6ad   : > { %1507 = vadd.xlane.f32.xlu1 %v1506_v48  ;;  %v2415_v48 = vld [vmem:[%s773_s22] ss:$0 sm:$0xff]  ;;  %s3862_s22 = scalar_lea.vmem [#allocation11], %s3471_s18 }
 0x6be   : > { %1622 = vrot.lane.b32.xlu1 %v3577_v37, %s3116_s24 }
 0x6c2   : > { %1620 = vrot.lane.b32.xlu1 %v3583_v40, %s3116_s24  ;;  %v2763_v40 = vld [vmem:[%s3517_s28 + $0x28] sm:$0xff]  }
 0x6c3   : > { %2572 = vmatpush3.bf16.msra.mxu0 %v2763_v40  ;;  %v2767_v40 = vld [vmem:[%s3531_s25 + $0x38] sm:$0xff]  }
 0x6c4   : > { %2573 = vmatprep.subr.bf16.mxu0 %v3112_v22 }
 0x6c7   : > { %2574 = vmatpush3.bf16.msra.mxu0 %v2764_v60 }
 0x6c8   : > { %2585 = vmatprep.subr.bf16.mxu0 %v3112_v22 }
 0x732   : > { %v1505_v49 = vpop.xlane.xlu1 %1504 }
 0x733   : > { %2803 = vrcp.f32 %v1505_v49 }
 0x736   : > { %v1508_v50 = vpop.xlane.xlu1 %1507 }
 0x737   : > { %2805 = vrcp.f32 %v1508_v50 }
 0x73a   : > { %v1623_v56 = vpop.permute.xlu1 %1622 }
 0x73b   : > { %v1628_v59 = vsel %vm1073_vm1, %v1623_v56, 0 }
 0x73e   : > { %v1621_v37 = vpop.permute.xlu1 %1620 }
 0x740   : > { %v2804_v51 = vpop.eup %2803 }
 0x741   : > { %v1511_v54 = vmul.f32 %v2804_v51, %v2800_v45 }
 0x744   : > { %v2806_v52 = vpop.eup %2805 }
 0x745   : > { %v1512_v55 = vmul.f32 %v2806_v52, %v2802_v47 }
 0x747   : > { %v1513_v57 = vpack.c.bf16 %v1512_v55, %v1511_v54 }
 0x749   : > { %2568 = vmatmul.mubr.msk.bf16.vlgmr.msra.gmra.mxu1 %vm1125_vm2, %v1513_v57 }
 0x74a   : > { %2580 = vmatpush3.bf16.xpose.msra.mxu1 %v1628_v59  ;;  %2581 = vmatprep.mubr.msk.bf16.mxu1 %vm3113_vm0, %v3112_v22 }
 0x74b   : > { %2591 = vmatprep.subr.bf16.mxu1 %v3112_v22 }
 0x751   : > { %2582 = vmatmul.mubr.msk.bf16.vlgmr.msra.gmra.mxu1 %vm1073_vm1, %v1621_v37 }
 0x752   : > { %2595 = vmatprep.mubr.msk.bf16.mxu1 %vm3113_vm0, %v3112_v22  ;;  %2592 = vmatpush3.bf16.msra.mxu1 %v2765_v16 }
 0x753   : > { %2593 = vmatprep.subr.bf16.mxu1 %v3112_v22 }
 0x809   : > { %v1554_v61 = vpop.f32.mrf.mxu1 }
 0x80b   : > { %v2569_v62 = vpop.f32.mrf.mxu1 }
 0x80d   : > { %v1557_v63 = vpop.f32.mrf.mxu1 }
 0x80e   : > { %v1561_v0 = vpack.c.bf16 %v1557_v63, %v1554_v61 }
 0x80f   : > { %v2570_v1 = vpop.f32.mrf.mxu1 }
 0x810   : > { %2576 = vmatmul.mubr.msk.bf16.vlgmr.msra.gmra.mxu0 %vm1073_vm1, %v1561_v0 }
 0x811   : > { %v1664_v2 = vpop.f32.mrf.mxu1  ;;  %2587 = vmatprep.mubr.msk.bf16.mxu0 %vm3113_vm0, %v3112_v22 }
 0x812   : > { %v1671_v3 = vmul.f32 0.17677669, %v1664_v2 }
 0x813   : > { %v2583_v4 = vpop.f32.mrf.mxu1 }
 0x814   : > { %v1673_v5 = vadd.f32 %v1671_v3, %v3618_v53  ;;  %v2769_v3 = vld [vmem:[%s3531_s25 + $0x28] sm:$0xff]   ;;  %v2770_v4 = vld [vmem:[%s3531_s25 + $0x20] sm:$0xff]  }
 0x815   : > { %v1667_v6 = vpop.f32.mrf.mxu1 }
 0x816   : > { %v1672_v7 = vmul.f32 0.17677669, %v1667_v6  ;;  %v1675_v8 = vsel %vm1125_vm2, %v1673_v5, -inf  ;;  %v2772_v6 = vld [vmem:[%s3531_s25 + $0x10] sm:$0xff]  }
 0x817   : > { %1676 = vmax.xlane.f32.xlu0 %v1675_v8  ;;  %v2584_v9 = vpop.f32.mrf.mxu1  ;;  %v2774_v8 = vld [vmem:[%s3531_s25] sm:$0xff]  }
 0x818   : > { %v1674_v10 = vadd.f32 %v1672_v7, %v3624_v58  ;;  %v2773_v7 = vld [vmem:[%s3531_s25 + $0x8] sm:$0xff]  }
 0x819   : > { %v2775_v9 = vld [vmem:[%s3494_s3 + $0x38] sm:$0xff]  }
 0x81a   : > { %v1678_v11 = vsel %vm1125_vm2, %v1674_v10, -inf }
 0x81b   : > { %1679 = vmax.xlane.f32.xlu1 %v1678_v11  ;;  %v2777_v11 = vld [vmem:[%s3494_s3 + $0x28] sm:$0xff]  }
 0x82c   : > { %1698 = vrot.lane.b32.xlu1 %v3637_v30, %s3116_s24  ;;  %v1430_v30 = vadd.f32 %v3675_v14, %v3679_v18  ;;  %v2766_v18 = vld [vmem:[%s3517_s28 + $0x30] sm:$0xff]   ;;  %s3861_s28 = scalar_lea.vmem [#allocation8], %s3471_s18 }
 0x82d   : > { %2594 = vmatpush3.bf16.msra.mxu1 %v2766_v18 }
 0x82e   : > { %2619 = vmatprep.subr.bf16.mxu1 %v3112_v22 }
 0x8a0   : > { %v1677_v12 = vpop.xlane.xlu0 %1676 }
 0x8a1   : > { %v1681_v13 = vsub.f32 %v1673_v5, %v1677_v12  ;;  %v2771_v5 = vld [vmem:[%s3531_s25 + $0x18] sm:$0xff]  }
 0x8a2   : > { %v2778_v12 = vld [vmem:[%s3494_s3 + $0x20] sm:$0xff]  }
 0x8a3   : > { %v1683_v15 = vmul.f32 1.442695, %v1681_v13  ;;  %v2779_v13 = vld [vmem:[%s3494_s3 + $0x18] sm:$0xff]  }
 0x8a4   : > { %v1680_v17 = vpop.xlane.xlu1 %1679 }
 0x8a5   : > { %2807 = vpow2.f32 %v1683_v15  ;;  %v1682_v53 = vsub.f32 %v1674_v10, %v1680_v17  ;;  %v2776_v10 = vld [vmem:[%s3494_s3 + $0x30] sm:$0xff]  }
 0x8a7   : > { %v1685_v21 = vmul.f32 1.442695, %v1682_v53 }
 0x8a8   : > { %v1699_v25 = vpop.permute.xlu1 %1698 }
 0x8a9   : > { %2809 = vpow2.f32 %v1685_v21  ;;  %2586 = vmatpush3.bf16.msra.mxu0 %v1699_v25 }
 0x8aa   : > { %2599 = vmatprep.subr.bf16.mxu0 %v3112_v22 }
 0x8b2   : > { %v2808_v26 = vpop.eup %2807 }
 0x8b3   : > { %v1687_v58 = vsel %vm1125_vm2, %v2808_v26, 0.0 }
 0x8b4   : > { %1688 = vadd.xlane.f32.xlu0 %v1687_v58 }
 0x8b6   : > { %v2810_v28 = vpop.eup %2809 }
 0x8b7   : > { %v1690_v29 = vsel %vm1125_vm2, %v2810_v28, 0.0 }
 0x8b8   : > { %1691 = vadd.xlane.f32.xlu0 %v1690_v29 }
 0x8d0   : > { %v1611_v31 = vpop.f32.mrf.mxu0 }
 0x8d1   : > { %v1618_v32 = vadd.f32 %v1611_v31, %v1430_v30 }
 0x8d2   : > { %v2577_v24 = vpop.f32.mrf.mxu0 }
 0x8d3   : > { %v2417_v24 = vld [vmem:[%s3860_s14] ss:$0 sm:$0xff] }
 0x8d4   : > { %v1614_v33 = vpop.f32.mrf.mxu0 }
 0x8d5   : > { %v1619_v34 = vadd.f32 %v1614_v33, %v1433_v27 }
 0x8d6   : > { %v2578_v35 = vpop.f32.mrf.mxu0 }
 0x93d   : > { %v1689_v36 = vpop.xlane.xlu0 %1688 }
 0x93e   : > { %2811 = vrcp.f32 %v1689_v36  ;;  %v2780_v36 = vld [vmem:[%s3494_s3 + $0x10] sm:$0xff]  }
 0x941   : > { %v1692_v38 = vpop.xlane.xlu0 %1691 }
 0x942   : > { %2813 = vrcp.f32 %v1692_v38  ;;  %v2781_v38 = vld [vmem:[%s3494_s3 + $0x8] sm:$0xff]  }
 0x94b   : > { %v2812_v39 = vpop.eup %2811 }
 0x94c   : > { %v1695_v42 = vmul.f32 %v2812_v39, %v2808_v26  ;;  %v2782_v39 = vld [vmem:[%s3494_s3] sm:$0xff]   ;;  %s3863_s3 = scalar_lea.vmem [#allocation13], %s3471_s18 }
 0x94f   : > { %v2814_v41 = vpop.eup %2813 }
 0x950   : > { %v1696_v43 = vmul.f32 %v2814_v41, %v2810_v28  ;;  %v2418_v41 = vld [vmem:[%s3861_s28] ss:$0 sm:$0xff] }
 0x952   : > { %v1697_v14 = vpack.c.bf16 %v1696_v43, %v1695_v42 }
 0x954   : > { %2588 = vmatmul.mubr.msk.bf16.vlgmr.msra.gmra.mxu0 %vm1125_vm2, %v1697_v14 }
 0x955   : > { %2615 = vmatprep.mubr.msk.bf16.mxu0 %vm3113_vm0, %v3112_v22  ;;  %2600 = vmatpush3.bf16.msra.mxu0 %v2767_v40 }
 0x956   : > { %2601 = vmatprep.subr.bf16.mxu0 %v3112_v22 }
 0xa14   : > { %v1738_v23 = vpop.f32.mrf.mxu0 }
 0xa16   : > { %v2589_v44 = vpop.f32.mrf.mxu0 }
 0xa18   : > { %v1741_v45 = vpop.f32.mrf.mxu0 }
 0xa19   : > { %v1745_v46 = vpack.c.bf16 %v1741_v45, %v1738_v23 }
 0xa1a   : > { %v2590_v47 = vpop.f32.mrf.mxu0 }
 0xa1b   : > { %2596 = vmatmul.mubr.msk.bf16.vlgmr.msra.gmra.mxu1 %vm1073_vm1, %v1745_v46  ;;  %v2427_v47 = vld [vmem:[%s3862_s22] ss:$0 sm:$0xff] }
 0xa1c   : > { %2635 = vmatprep.mubr.msk.bf16.mxu1 %vm3113_vm0, %v3112_v22  ;;  %2620 = vmatpush3.bf16.msra.mxu1 %v2775_v9 }
 0xa1d   : > { %2621 = vmatprep.subr.bf16.mxu1 %v3112_v22 }
 0xa20   : > { %2622 = vmatpush3.bf16.msra.mxu1 %v2776_v10 }
 0xa21   : > { %2623 = vmatprep.subr.bf16.mxu1 %v3112_v22 }
 0xa24   : > { %2624 = vmatpush3.bf16.msra.mxu1 %v2777_v11 }
 0xa25   : > { %2625 = vmatprep.subr.bf16.mxu1 %v3112_v22 }
 0xa28   : > { %2626 = vmatpush3.bf16.msra.mxu1 %v2778_v12 }
 0xa29   : > { %2627 = vmatprep.subr.bf16.mxu1 %v3112_v22 }
 0xa2c   : > { %2628 = vmatpush3.bf16.msra.mxu1 %v2779_v13 }
 0xa2d   : > { %2629 = vmatprep.subr.bf16.mxu1 %v3112_v22 }
 0xa30   : > { %2630 = vmatpush3.bf16.msra.mxu1 %v2780_v36 }
 0xa31   : > { %2631 = vmatprep.subr.bf16.mxu1 %v3112_v22 }
 0xa34   : > { %2632 = vmatpush3.bf16.msra.mxu1 %v2781_v38 }
 0xa35   : > { %2633 = vmatprep.subr.bf16.mxu1 %v3112_v22 }
 0xa38   : > { %2634 = vmatpush3.bf16.msra.mxu1 %v2782_v39 }
 0xadb   : > { %v1795_v49 = vpop.f32.mrf.mxu1 }
 0xadc   : > { %v1802_v50 = vadd.f32 %v1795_v49, %v1618_v32 }
 0xadd   : > { %v2597_v51 = vpop.f32.mrf.mxu1 }
 0xade   : > { %v1810_v52 = vadd.f32 %v2415_v48, %v1802_v50 }
 0xadf   : > { %v1798_v54 = vpop.f32.mrf.mxu1 }
 0xae0   : > { %v1803_v55 = vadd.f32 %v1798_v54, %v1619_v34  ;;  %v1814_v56 = vadd.f32 %v1810_v52, %v3556_v19 }
 0xae1   : > { %v2598_v57 = vpop.f32.mrf.mxu1 }
 0xae2   : > { %v1811_v59 = vadd.f32 %v2415_v48, %v1803_v55  ;;  %1816 = vadd.xlane.f32.xlu0 %v1814_v56 }
 0xae4   : > { %v1815_v37 = vadd.f32 %v1811_v59, %v3558_v20  ;;  %v2768_v20 = vld [vmem:[%s3531_s25 + $0x30] sm:$0xff]   ;;  %s3859_s25 = scalar_lea.vmem [#allocation5], %s3471_s18 }
 0xae5   : > { %2602 = vmatpush3.bf16.msra.mxu0 %v2768_v20  ;;  %v2416_v29 = vld [vmem:[%s3859_s25] ss:$0 sm:$0xff] }
 0xae6   : > { %1818 = vadd.xlane.f32.xlu0 %v1815_v37  ;;  %2603 = vmatprep.subr.bf16.mxu0 %v3112_v22 }
 0xae9   : > { %2604 = vmatpush3.bf16.msra.mxu0 %v2769_v3 }
 0xaea   : > { %2605 = vmatprep.subr.bf16.mxu0 %v3112_v22 }
 0xaed   : > { %2606 = vmatpush3.bf16.msra.mxu0 %v2770_v4  ;;  %v2436_v4 = vld [vmem:[%s3863_s3] ss:$0 sm:$0xff] }
 0xaee   : > { %2607 = vmatprep.subr.bf16.mxu0 %v3112_v22 }
 0xaf1   : > { %2608 = vmatpush3.bf16.msra.mxu0 %v2771_v5 }
 0xaf2   : > { %2609 = vmatprep.subr.bf16.mxu0 %v3112_v22 }
 0xaf5   : > { %2610 = vmatpush3.bf16.msra.mxu0 %v2772_v6  ;;  %v2437_v6 = vld [vmem:[%s3864_s27] ss:$0 sm:$0xff] }
 0xaf6   : > { %2611 = vmatprep.subr.bf16.mxu0 %v3112_v22 }
 0xaf9   : > { %2612 = vmatpush3.bf16.msra.mxu0 %v2773_v7 }
 0xafa   : > { %2613 = vmatprep.subr.bf16.mxu0 %v3112_v22 }
 0xafd   : > { %2614 = vmatpush3.bf16.msra.mxu0 %v2774_v8 }
 0xb6b   : > { %v1817_v60 = vpop.xlane.xlu0 %1816 }
 0xb6c   : > { %v1821_v61 = vmul.f32 0.0078125, %v1817_v60 }
 0xb6e   : > { %v1823_v62 = vsub.f32 %v1814_v56, %v1821_v61 }
 0xb6f   : > { %v1819_v63 = vpop.xlane.xlu0 %1818 }
 0xb70   : > { %v1822_v0 = vmul.f32 0.0078125, %v1819_v63  ;;  %v1825_v19 = vmul.f32 %v1823_v62, %v1823_v62 }
 0xb72   : > { %v1824_v1 = vsub.f32 %v1815_v37, %v1822_v0  ;;  %1827 = vadd.xlane.f32.xlu0 %v1825_v19 }
 0xb74   : > { %v1826_v2 = vmul.f32 %v1824_v1, %v1824_v1 }
 0xb76   : > { %1829 = vadd.xlane.f32.xlu0 %v1826_v2 }
 0xbfb   : > { %v1828_v15 = vpop.xlane.xlu0 %1827 }
 0xbfc   : > { %v1831_v17 = vmul.f32 0.0078125, %v1828_v15 }
 0xbfe   : > { %v1833_v53 = vadd.f32 1e-05, %v1831_v17 }
 0xbff   : > { %v1830_v21 = vpop.xlane.xlu0 %1829 }
 0xc00   : > { %2815 = vrsqrt.f32 %v1833_v53  ;;  %v1832_v25 = vmul.f32 0.0078125, %v1830_v21 }
 0xc02   : > { %v1834_v26 = vadd.f32 1e-05, %v1832_v25 }
 0xc04   : > { %2817 = vrsqrt.f32 %v1834_v26 }
 0xc0d   : > { %v2816_v58 = vpop.eup %2815 }
 0xc0e   : > { %v1837_v28 = vmul.f32 %v2816_v58, %v1823_v62 }
 0xc10   : > { %v1845_v32 = vmul.f32 %v2416_v29, %v1837_v28 }
 0xc11   : > { %v2818_v30 = vpop.eup %2817 }
 0xc12   : > { %v1838_v31 = vmul.f32 %v2818_v30, %v1824_v1  ;;  %v1853_v33 = vadd.f32 %v2417_v24, %v1845_v32 }
 0xc14   : > { %v1846_v27 = vmul.f32 %v2416_v29, %v1838_v31 }
 0xc16   : > { %v1854_v34 = vadd.f32 %v2417_v24, %v1846_v27 }
 0xc18   : > { %v1871_v35 = vpack.c.bf16 %v1854_v34, %v1853_v33 }
 0xc1a   : > { %2616 = vmatmul.mubr.bf16.vlgmr.msra.gmra.mxu0 %v1871_v35 }
 0xcda   : > { %v1961_v42 = vpop.f32.mrf.mxu0 }
 0xcdb   : > { %v1962_v14 = vadd.f32 %v2418_v41, %v1961_v42 }
 0xcdc   : > { %v2617_v43 = vpop.f32.mrf.mxu0 }
 0xcdd   : > { %v1968_v44 = vmax.f32 %v1962_v14, 0.0 }
 0xcde   : > { %v1964_v16 = vpop.f32.mrf.mxu0 }
 0xcdf   : > { %v1965_v18 = vadd.f32 %v2418_v41, %v1964_v16 }
 0xce0   : > { %v2618_v23 = vpop.f32.mrf.mxu0 }
 0xce1   : > { %v1969_v45 = vmax.f32 %v1965_v18, 0.0 }
 0xce3   : > { %v1986_v46 = vpack.c.bf16 %v1969_v45, %v1968_v44 }
 0xce5   : > { %2636 = vmatmul.mubr.bf16.vlgmr.msra.gmra.mxu1 %v1986_v46 }
 0xda5   : > { %v2076_v48 = vpop.f32.mrf.mxu1 }
 0xda6   : > { %v2077_v49 = vadd.f32 %v2427_v47, %v2076_v48 }
 0xda7   : > { %v2637_v50 = vpop.f32.mrf.mxu1 }
 0xda8   : > { %v2085_v22 = vadd.f32 %v2077_v49, %v1853_v33 }
 0xda9   : > { %v2079_v51 = vpop.f32.mrf.mxu1 }
 0xdaa   : > { %v2080_v52 = vadd.f32 %v2427_v47, %v2079_v51  ;;  %2087 = vadd.xlane.f32.xlu1 %v2085_v22 }
 0xdab   : > { %v2638_v54 = vpop.f32.mrf.mxu1 }
 0xdac   : > { %v2086_v55 = vadd.f32 %v2080_v52, %v1854_v34 }
 0xdae   : > { %2089 = vadd.xlane.f32.xlu0 %v2086_v55 }
 0xe33   : > { %v2088_v56 = vpop.xlane.xlu1 %2087 }
 0xe34   : > { %v2091_v57 = vmul.f32 0.0078125, %v2088_v56 }
 0xe36   : > { %v2093_v59 = vsub.f32 %v2085_v22, %v2091_v57 }
 0xe37   : > { %v2090_v37 = vpop.xlane.xlu0 %2089 }
 0xe38   : > { %v2092_v40 = vmul.f32 0.0078125, %v2090_v37  ;;  %v2095_v60 = vmul.f32 %v2093_v59, %v2093_v59 }
 0xe3a   : > { %v2094_v61 = vsub.f32 %v2086_v55, %v2092_v40  ;;  %2097 = vadd.xlane.f32.xlu0 %v2095_v60 }
 0xe3c   : > { %v2096_v62 = vmul.f32 %v2094_v61, %v2094_v61 }
 0xe3e   : > { %2099 = vadd.xlane.f32.xlu0 %v2096_v62 }
 0xec3   : > { %v2098_v63 = vpop.xlane.xlu0 %2097 }
 0xec4   : > { %v2101_v0 = vmul.f32 0.0078125, %v2098_v63 }
 0xec6   : > { %v2103_v19 = vadd.f32 1e-05, %v2101_v0 }
 0xec7   : > { %v2100_v1 = vpop.xlane.xlu0 %2099 }
 0xec8   : > { %2819 = vrsqrt.f32 %v2103_v19  ;;  %v2102_v2 = vmul.f32 0.0078125, %v2100_v1 }
 0xeca   : > { %v2104_v20 = vadd.f32 1e-05, %v2102_v2 }
 0xecc   : > { %2821 = vrsqrt.f32 %v2104_v20 }
 0xed5   : > { %v2820_v3 = vpop.eup %2819 }
 0xed6   : > { %v2107_v5 = vmul.f32 %v2820_v3, %v2093_v59 }
 0xed8   : > { %v2115_v7 = vmul.f32 %v2436_v4, %v2107_v5 }
 0xed9   : > { %v2822_v8 = vpop.eup %2821 }
 0xeda   : > { %v2123_v9 = vadd.f32 %v2437_v6, %v2115_v7  ;;  %v2108_v10 = vmul.f32 %v2822_v8, %v2094_v61 }
 0xedc   : > { %2125 = vst [vmem:[#allocation2] sm:$0xff] %v2123_v9  ;;  %v2116_v11 = vmul.f32 %v2436_v4, %v2108_v10  ;;  %2130 = sbr.rel (%p2438_p3) target bundleno = 3810 (0xee2), region = 116 }
 0xede   : > { %v2124_v12 = vadd.f32 %v2437_v6, %v2116_v11 }
 0xee0   : > { %2126 = vst [vmem:[#allocation2 + $0x8] sm:$0xff] %v2124_v12 }
 0xee1   : > { %2131 = vst [vmem:[%s3865_s21] sm:$0xff] %v2123_v9  ;;  %2132 = vst [vmem:[%s3865_s21 + $0x8] sm:$0xff] %v2124_v12 }
 0xee2 PF: > { %s3866_s16 = sld [smem:[#allocation22_spill]]  ;;  %s3869_s29 = smov %s3089_s30 }
 0xee3   : > { %s3867_s18 = sld [smem:[#allocation21_spill]] }
 0xee4   : > { %s3868_s15 = sld [smem:[#allocation23_spill]] }
 0xee8   : > { %p36_p4 = scmp.ge.s32.totalorder %s3866_s16, 6  }
 0xee9   : > { %s3870_s30 = smov %s3867_s18 }
 0xeea   :  { %38 = sbr.rel (!%p36_p4) target bundleno = 21 (0x15), region = 217 }
 0xeef   :  { %2144 = vsyncpa [#allocation4], 1 }
 0xef0   :  { %2146 = vsyncpa [#allocation4 + $0x1], 1 }
 0xef1   :  { %2147 = vsyncpa [#allocation6], 1 }
 0xef2   :  { %2149 = vsyncpa [#allocation6 + $0x1], 1 }
 0xef3   :  { %2150 = vsyncpa [#allocation9], 1 }
 0xef4   :  { %2152 = vsyncpa [#allocation9 + $0x1], 1 }
 0xef5   :  { %2153 = vsyncpa [#allocation12], 1 }
 0xef6   :  { %2155 = vsyncpa [#allocation12 + $0x1], 1 }
 0xef7   :  { %2156 = vsyncpa [#allocation15], 1 }
 0xef8   :  { %2158 = vsyncpa [#allocation15 + $0x1], 1 }

// kernel: transformer_forward.3
= control target key start
LH: loop header
LB: loop body
LE: loop exit
PB: predicated region body
PF: predicated region fallthrough
CT: control target
= control target key end

     0   :  { %s6665_s0 = inlined_call_operand.vmem [shape: f32[16,128], index: 0, kind: input, shape index: {}]   ;;  %s6666_s1 = inlined_call_operand.vmem [shape: f32[16,128], index: 1, kind: input, shape index: {}]   ;;  %s6667_s2 = inlined_call_operand.vmem [shape: f32[16,16], index: 2, kind: input, shape index: {}]   ;;  %s6668_s3 = inlined_call_operand.vmem [shape: f32[16,16], index: 3, kind: input, shape index: {}]   ;;  %s6669_s4 = inlined_call_operand.vmem [shape: bf16[4,128,384], index: 4, kind: input, shape index: {}]   ;;  %s6670_s5 = inlined_call_operand.vmem [shape: f32[4,1,384], index: 5, kind: input, shape index: {}]   ;;  %s6671_s6 = inlined_call_operand.vmem [shape: bf16[4,128,128], index: 6, kind: input, shape index: {}]   ;;  %s6672_s7 = inlined_call_operand.vmem [shape: f32[4,1,128], index: 7, kind: input, shape index: {}]   ;;  %s6673_s8 = inlined_call_operand.hbm [shape: f32[4,1,128], index: 8, kind: input, shape index: {}]   ;;  %s6674_s9 = inlined_call_operand.hbm [shape: f32[4,1,128], index: 9, kind: input, shape index: {}]   ;;  %s6675_s10 = inlined_call_operand.hbm [shape: bf16[4,128,128], index: 10, kind: input, shape index: {}]   ;;  %s6676_s11 = inlined_call_operand.hbm [shape: f32[4,1,128], index: 11, kind: input, shape index: {}]   ;;  %s6677_s12 = inlined_call_operand.vmem [shape: bf16[4,128,256], index: 12, kind: input, shape index: {}]   ;;  %s6678_s13 = inlined_call_operand.vmem [shape: f32[4,1,256], index: 13, kind: input, shape index: {}]   ;;  %s6679_s14 = inlined_call_operand.hbm [shape: bf16[4,128,128], index: 14, kind: input, shape index: {}]   ;;  %s6680_s15 = inlined_call_operand.hbm [shape: f32[4,1,128], index: 15, kind: input, shape index: {}]   ;;  %s6681_s16 = inlined_call_operand.hbm [shape: f32[4,1,128], index: 16, kind: input, shape index: {}]   ;;  %s6682_s17 = inlined_call_operand.hbm [shape: f32[4,1,128], index: 17, kind: input, shape index: {}]   ;;  %s6683_s18 = inlined_call_operand.hbm [shape: bf16[4,128,128], index: 18, kind: input, shape index: {}]   ;;  %s6684_s19 = inlined_call_operand.hbm [shape: f32[4,1,128], index: 19, kind: input, shape index: {}]   ;;  %s6685_s20 = inlined_call_operand.hbm [shape: bf16[4,128,128], index: 20, kind: input, shape index: {}]   ;;  %s6686_s21 = inlined_call_operand.hbm [shape: f32[4,1,128], index: 21, kind: input, shape index: {}]   ;;  %s6687_s22 = inlined_call_operand.hbm [shape: f32[4,1,128], index: 22, kind: input, shape index: {}]   ;;  %s6688_s23 = inlined_call_operand.hbm [shape: f32[4,1,128], index: 23, kind: input, shape index: {}]   ;;  %s6689_s24 = inlined_call_operand.vmem [shape: bf16[128,128], index: 24, kind: input, shape index: {}]   ;;  %s6690_s25 = inlined_call_operand.vmem [shape: f32[1,128], index: 25, kind: input, shape index: {}]   ;;  %s6691_s26 = inlined_call_operand.vmem [shape: f32[16,128], index: 26, kind: output, shape index: {}]  }
   0x1   :  { %6709 = sst [smem:[#allocation37_spill]] %s6665_s0 }
   0x2   :  { %6710 = sst [smem:[#allocation38_spill]] %s6666_s1 }
   0x3   :  { %6711 = sst [smem:[#allocation39_spill]] %s6667_s2 }
   0x4   :  { %6712 = sst [smem:[#allocation40_spill]] %s6668_s3 }
   0x5   :  { %6713 = sst [smem:[#allocation41_spill]] %s6669_s4 }
   0x6   :  { %6714 = sst [smem:[#allocation42_spill]] %s6670_s5 }
   0x7   :  { %6715 = sst [smem:[#allocation43_spill]] %s6671_s6 }
   0x8   :  { %6716 = sst [smem:[#allocation44_spill]] %s6672_s7 }
   0x9   :  { %6717 = sst [smem:[#allocation45_spill]] %s6673_s8 }
   0xa   :  { %6718 = sst [smem:[#allocation46_spill]] %s6674_s9 }
   0xb   :  { %6719 = sst [smem:[#allocation47_spill]] %s6675_s10 }
   0xc   :  { %6720 = sst [smem:[#allocation48_spill]] %s6676_s11 }
   0xd   :  { %6721 = sst [smem:[#allocation49_spill]] %s6677_s12 }
   0xe   :  { %6722 = sst [smem:[#allocation50_spill]] %s6678_s13 }
   0xf   :  { %6723 = sst [smem:[#allocation51_spill]] %s6679_s14 }
  0x10   :  { %6724 = sst [smem:[#allocation52_spill]] %s6680_s15 }
  0x11   :  { %6725 = sst [smem:[#allocation53_spill]] %s6681_s16 }
  0x12   :  { %6726 = sst [smem:[#allocation54_spill]] %s6682_s17 }
  0x13   :  { %6727 = sst [smem:[#allocation55_spill]] %s6683_s18 }
  0x14   :  { %6728 = sst [smem:[#allocation56_spill]] %s6684_s19 }
  0x15   :  { %6729 = sst [smem:[#allocation57_spill]] %s6685_s20 }
  0x16   :  { %6730 = sst [smem:[#allocation58_spill]] %s6686_s21 }
  0x17   :  { %6731 = sst [smem:[#allocation59_spill]] %s6687_s22 }
  0x18   :  { %6732 = sst [smem:[#allocation60_spill]] %s6689_s24 }
  0x19   :  { %6733 = sst [smem:[#allocation61_spill]] %s6690_s25 }
  0x1a   :  { %6734 = sst [smem:[#allocation62_spill]] %s6691_s26 }
  0x1b   :  { %31 = vsyncpa [#allocation4], 0 }
  0x1c   :  { %33 = vsyncpa [#allocation4 + $0x1], 0 }
  0x1d   :  { %34 = vsyncpa [#allocation6], 0 }
  0x1e   :  { %36 = vsyncpa [#allocation6 + $0x1], 0 }
  0x1f   :  { %37 = vsyncpa [#allocation9], 0 }
  0x20   :  { %39 = vsyncpa [#allocation9 + $0x1], 0 }
  0x21   :  { %40 = vsyncpa [#allocation12], 0 }
  0x22   :  { %42 = vsyncpa [#allocation12 + $0x1], 0 }
  0x23   :  { %43 = vsyncpa [#allocation15], 0 }
  0x24   :  { %45 = vsyncpa [#allocation15 + $0x1], 0 }
  0x25   :  { %46 = vsyncpa [#allocation18], 0 }
  0x26   :  { %48 = vsyncpa [#allocation18 + $0x1], 0 }
  0x27   :  { %49 = vsyncpa [#allocation21], 0 }
  0x28   :  { %51 = vsyncpa [#allocation21 + $0x1], 0 }
  0x29   :  { %52 = vsyncpa [#allocation24], 0 }
  0x2a   :  { %54 = vsyncpa [#allocation24 + $0x1], 0  ;;  %s5610_s27 = smov 0   ;;  %s5612_s3 = smov 0  }
  0x2b   :  { %s5614_s7 = smov 0   ;;  %s5616_s28 = smov 0  }
  0x2c LB: > { %6735 = sst [smem:[#allocation33_spill]] %s5445_s7  ;;  %s5629_s8 = sadd.s32 4294967295, %s5449_s28   ;;  %s5449_s28 = sphi %s5616_s28, %s6794_s28   ;;  %s5445_s7 = sphi %s5614_s7, %s6796_s7   ;;  %s5441_s3 = sphi %s5612_s3, %s6798_s3   ;;  %s5437_s27 = sphi %s5610_s27, %s6797_s27  }
  0x2d   : > { %6736 = sst [smem:[#allocation34_spill]] %s5629_s8  ;;  %s5632_s4 = sadd.s32 1, %s5449_s28  }
  0x2e   : > { %6737 = sst [smem:[#allocation35_spill]] %s5632_s4  ;;  %s252_s29 = ssub.s32 %s5449_s28, %s5632_s4 }
  0x2f   : > { %s255_s0 = sadd.s32 1, %s5445_s7  ;;  %p253_p0 = scmp.eq.s32.totalorder %s252_s29, 0 }
  0x30   : > { %p262_p1 = scmp.ne.s32.totalorder %s5445_s7, %s5441_s3  ;;  %p263_p2 = scmp.eq.s32.totalorder %s5449_s28, 0 }
  0x31   : > { %p268_p3 = scmp.ne.s32.totalorder %s5441_s3, %s5437_s27  ;;  %p269_p5 = scmp.eq.s32.totalorder %s5629_s8, 0 }
  0x32   : > { %s5642_s9 = scalar_select %p253_p0, %s5445_s7, %s255_s0  }
  0x33   : > { %p5644_p4 = por %p263_p2, %p262_p1  ;;  %p5649_p6 = por %p269_p5, %p268_p3 }
  0x34   : > { %6738 = sst [smem:[#allocation36_spill]] %s5642_s9  ;;  %p4242_p7 = scmp.ge.s32.totalorder %s5449_s28, 4 }
  0x35   : > { %s5655_s5 = sand.u32 (!%p4242_p7), 1, %s5445_s7   ;;  %s5658_s10 = sshll.u32 (!%p4242_p7), %s5449_s28, 4 }
  0x36   : > { %759 = sbr.rel (%p4242_p7) target bundleno = 416 (0x1a0), region = 40  ;;  %s5661_s6 = sand.u32 (!%p4242_p7), 1, %s5449_s28  }
  0x37   : > { %s6741_s29 = sld [smem:[#allocation46_spill]] (!%p4242_p7)  ;;  %s812_s9 = scalar_lea.vmem (!%p4242_p7), [#allocation5], %s5655_s5 }
  0x38   : > { %s819_s4 = sshll.u32 (!%p4242_p7), %s812_s9, 4  ;;  %s820_s4 = int_to_ptr.vmem [resolvable:$true] %s819_s4 }
  0x3d   : > { %s5667_s0 = scalar_lea.hbm %s6741_s29, %s5658_s10  ;;  %s5027_s13 = scalar_lea.hbm %s6741_s29, 64 }
  0x3e   : > { %s5023_s26 = scalar_lea.hbm %s5667_s0, 16  ;;  %p5028_p11 = scmp.lt.s32.totalorder %s5667_s0, %s6741_s29 }
  0x3f   : > { %p5024_p8 = scmp.ne.s32.totalorder %s5667_s0, %s5023_s26  ;;  %p5029_p12 = scmp.lt.s32.totalorder %s5027_s13, %s5023_s26 }
  0x41   : > { %p5025_p9 = pnand %p5024_p8, %p5644_p4  ;;  %p5030_p13 = por %p5029_p12, %p5028_p11 }
  0x43   : > { %p5026_p10 = pneg %p5025_p9 }
  0x45   : > { %p5031_p0 = pnand %p5030_p13, %p5026_p10 }
  0x47   : > { %5034 = shalt.err (!%p5031_p0)
}
  0x48   : > { %s5035_s9 = scalar_lea.vmem %s820_s4, 16  ;;  %s5451_s7 = smov [#allocation5]  }
  0x49   : > { %p5036_p1 = scmp.ne.s32.totalorder %s820_s4, %s5035_s9  ;;  %s5039_s12 = sshll.u32 %s5451_s7, 4  ;;  %s5040_s12 = int_to_ptr.vmem [resolvable:$false] %s5039_s12 }
  0x4a   : > { %s5041_s8 = scalar_lea.vmem %s5040_s12, 32  ;;  %p5042_p5 = scmp.lt.s32.totalorder %s820_s4, %s5040_s12 }
  0x4b   : > { %p5037_p2 = pnand %p5036_p1, %p5644_p4  ;;  %p5043_p7 = scmp.lt.s32.totalorder %s5041_s8, %s5035_s9 }
  0x4d   : > { %p5038_p3 = pneg %p5037_p2  ;;  %p5044_p8 = por %p5043_p7, %p5042_p5 }
  0x4f   : > { %p5045_p9 = pnand %p5044_p8, %p5038_p3 }
  0x51   : > { %5048 = shalt.err (!%p5045_p9)
}
  0x52   : > { %s6742_s13 = scalar_lea.sflag [#allocation6], %s5661_s6  ;;  %s6743_s11 = sld [smem:[#allocation48_spill]] }
  0x53   : > { %4774 = dma.hbm_to_vmem [thread:$0]  (%p5644_p4), %s5667_s0, 16, %s820_s4, %s6742_s13  }
  0x54   : > { %s850_s12 = scalar_lea.vmem [#allocation8], %s5655_s5 }
  0x55   : > { %s857_s7 = sshll.u32 %s850_s12, 4  ;;  %s858_s7 = int_to_ptr.vmem [resolvable:$true] %s857_s7 }
  0x58   : > { %s5693_s26 = scalar_lea.hbm %s6743_s11, %s5658_s10  ;;  %s5053_s4 = scalar_lea.hbm %s6743_s11, 64 }
  0x59   : > { %s5049_s1 = scalar_lea.hbm %s5693_s26, 16  ;;  %p5054_p13 = scmp.lt.s32.totalorder %s5693_s26, %s6743_s11 }
  0x5a   : > { %p5050_p10 = scmp.ne.s32.totalorder %s5693_s26, %s5049_s1  ;;  %p5055_p0 = scmp.lt.s32.totalorder %s5053_s4, %s5049_s1 }
  0x5c   : > { %p5051_p11 = pnand %p5050_p10, %p5644_p4  ;;  %p5056_p1 = por %p5055_p0, %p5054_p13 }
  0x5e   : > { %p5052_p12 = pneg %p5051_p11 }
  0x60   : > { %p5057_p2 = pnand %p5056_p1, %p5052_p12 }
  0x62   : > { %5060 = shalt.err (!%p5057_p2)
}
  0x63   : > { %s5061_s24 = scalar_lea.vmem %s858_s7, 16  ;;  %s5452_s25 = smov [#allocation8]  }
  0x64   : > { %p5062_p3 = scmp.ne.s32.totalorder %s858_s7, %s5061_s24  ;;  %s5065_s12 = sshll.u32 %s5452_s25, 4  ;;  %s5066_s12 = int_to_ptr.vmem [resolvable:$false] %s5065_s12 }
  0x65   : > { %s5067_s8 = scalar_lea.vmem %s5066_s12, 32  ;;  %p5068_p8 = scmp.lt.s32.totalorder %s858_s7, %s5066_s12 }
  0x66   : > { %p5063_p5 = pnand %p5062_p3, %p5644_p4  ;;  %p5069_p9 = scmp.lt.s32.totalorder %s5067_s8, %s5061_s24 }
  0x68   : > { %p5064_p7 = pneg %p5063_p5  ;;  %p5070_p10 = por %p5069_p9, %p5068_p8 }
  0x6a   : > { %p5071_p11 = pnand %p5070_p10, %p5064_p7 }
  0x6c   : > { %5074 = shalt.err (!%p5071_p11)
}
  0x6d   : > { %s6744_s1 = scalar_lea.sflag [#allocation9], %s5661_s6  ;;  %s6745_s15 = sld [smem:[#allocation52_spill]] }
  0x6e   : > { %4776 = dma.hbm_to_vmem [thread:$0]  (%p5644_p4), %s5693_s26, 16, %s858_s7, %s6744_s1  }
  0x6f   : > { %s903_s8 = scalar_lea.vmem [#allocation11], %s5655_s5 }
  0x70   : > { %s910_s0 = sshll.u32 %s903_s8, 4  ;;  %s911_s0 = int_to_ptr.vmem [resolvable:$true] %s910_s0 }
  0x73   : > { %s5719_s4 = scalar_lea.hbm %s6745_s15, %s5658_s10  ;;  %s5079_s26 = scalar_lea.hbm %s6745_s15, 64 }
  0x74   : > { %s5075_s24 = scalar_lea.hbm %s5719_s4, 16  ;;  %p5080_p1 = scmp.lt.s32.totalorder %s5719_s4, %s6745_s15 }
  0x75   : > { %p5076_p12 = scmp.ne.s32.totalorder %s5719_s4, %s5075_s24  ;;  %p5081_p2 = scmp.lt.s32.totalorder %s5079_s26, %s5075_s24 }
  0x77   : > { %p5077_p13 = pnand %p5076_p12, %p5644_p4  ;;  %p5082_p3 = por %p5081_p2, %p5080_p1 }
  0x79   : > { %p5078_p0 = pneg %p5077_p13 }
  0x7b   : > { %p5083_p5 = pnand %p5082_p3, %p5078_p0 }
  0x7d   : > { %5086 = shalt.err (!%p5083_p5)
}
  0x7e   : > { %s5087_s27 = scalar_lea.vmem %s911_s0, 16  ;;  %s5453_s9 = smov [#allocation11]  }
  0x7f   : > { %p5088_p7 = scmp.ne.s32.totalorder %s911_s0, %s5087_s27  ;;  %s5091_s8 = sshll.u32 %s5453_s9, 4  ;;  %s5092_s8 = int_to_ptr.vmem [resolvable:$false] %s5091_s8 }
  0x80   : > { %s5093_s13 = scalar_lea.vmem %s5092_s8, 32  ;;  %p5094_p10 = scmp.lt.s32.totalorder %s911_s0, %s5092_s8 }
  0x81   : > { %p5089_p8 = pnand %p5088_p7, %p5644_p4  ;;  %p5095_p11 = scmp.lt.s32.totalorder %s5093_s13, %s5087_s27 }
  0x83   : > { %p5090_p9 = pneg %p5089_p8  ;;  %p5096_p12 = por %p5095_p11, %p5094_p10 }
  0x85   : > { %p5097_p13 = pnand %p5096_p12, %p5090_p9 }
  0x87   : > { %5100 = shalt.err (!%p5097_p13)
}
  0x88   : > { %s6746_s24 = scalar_lea.sflag [#allocation12], %s5661_s6  ;;  %s6747_s17 = sld [smem:[#allocation54_spill]] }
  0x89   : > { %4778 = dma.hbm_to_vmem [thread:$0]  (%p5644_p4), %s5719_s4, 16, %s911_s0, %s6746_s24  }
  0x8a   : > { %s937_s13 = scalar_lea.vmem [#allocation14], %s5655_s5 }
  0x8b   : > { %s944_s7 = sshll.u32 %s937_s13, 4  ;;  %s945_s7 = int_to_ptr.vmem [resolvable:$true] %s944_s7 }
  0x8e   : > { %s5745_s26 = scalar_lea.hbm %s6747_s17, %s5658_s10  ;;  %s5105_s4 = scalar_lea.hbm %s6747_s17, 64 }
  0x8f   : > { %s5101_s27 = scalar_lea.hbm %s5745_s26, 16  ;;  %p5106_p3 = scmp.lt.s32.totalorder %s5745_s26, %s6747_s17 }
  0x90   : > { %p5102_p0 = scmp.ne.s32.totalorder %s5745_s26, %s5101_s27  ;;  %p5107_p5 = scmp.lt.s32.totalorder %s5105_s4, %s5101_s27 }
  0x92   : > { %p5103_p1 = pnand %p5102_p0, %p5644_p4  ;;  %p5108_p7 = por %p5107_p5, %p5106_p3 }
  0x94   : > { %p5104_p2 = pneg %p5103_p1 }
  0x96   : > { %p5109_p8 = pnand %p5108_p7, %p5104_p2 }
  0x98   : > { %5112 = shalt.err (!%p5109_p8)
}
  0x99   : > { %s5113_s25 = scalar_lea.vmem %s945_s7, 16  ;;  %s5454_s12 = smov [#allocation14]  }
  0x9a   : > { %p5114_p9 = scmp.ne.s32.totalorder %s945_s7, %s5113_s25  ;;  %s5117_s13 = sshll.u32 %s5454_s12, 4  ;;  %s5118_s13 = int_to_ptr.vmem [resolvable:$false] %s5117_s13 }
  0x9b   : > { %s5119_s1 = scalar_lea.vmem %s5118_s13, 32  ;;  %p5120_p12 = scmp.lt.s32.totalorder %s945_s7, %s5118_s13 }
  0x9c   : > { %p5115_p10 = pnand %p5114_p9, %p5644_p4  ;;  %p5121_p13 = scmp.lt.s32.totalorder %s5119_s1, %s5113_s25 }
  0x9e   : > { %p5116_p11 = pneg %p5115_p10  ;;  %p5122_p0 = por %p5121_p13, %p5120_p12 }
  0xa0   : > { %p5123_p1 = pnand %p5122_p0, %p5116_p11 }
  0xa2   : > { %5126 = shalt.err (!%p5123_p1)
}
  0xa3   : > { %s6748_s27 = scalar_lea.sflag [#allocation15], %s5661_s6  ;;  %s6749_s19 = sld [smem:[#allocation56_spill]] }
  0xa4   : > { %4780 = dma.hbm_to_vmem [thread:$0]  (%p5644_p4), %s5745_s26, 16, %s945_s7, %s6748_s27  }
  0xa5   : > { %s975_s1 = scalar_lea.vmem [#allocation17], %s5655_s5 }
  0xa6   : > { %s982_s0 = sshll.u32 %s975_s1, 4  ;;  %s983_s0 = int_to_ptr.vmem [resolvable:$true] %s982_s0 }
  0xa9   : > { %s5771_s4 = scalar_lea.hbm %s6749_s19, %s5658_s10  ;;  %s5131_s26 = scalar_lea.hbm %s6749_s19, 64 }
  0xaa   : > { %s5127_s25 = scalar_lea.hbm %s5771_s4, 16  ;;  %p5132_p7 = scmp.lt.s32.totalorder %s5771_s4, %s6749_s19 }
  0xab   : > { %p5128_p2 = scmp.ne.s32.totalorder %s5771_s4, %s5127_s25  ;;  %p5133_p8 = scmp.lt.s32.totalorder %s5131_s26, %s5127_s25 }
  0xad   : > { %p5129_p3 = pnand %p5128_p2, %p5644_p4  ;;  %p5134_p9 = por %p5133_p8, %p5132_p7 }
  0xaf   : > { %p5130_p5 = pneg %p5129_p3 }
  0xb1   : > { %p5135_p10 = pnand %p5134_p9, %p5130_p5 }
  0xb3   : > { %5138 = shalt.err (!%p5135_p10)
}
  0xb4   : > { %s5139_s9 = scalar_lea.vmem %s983_s0, 16  ;;  %s5455_s8 = smov [#allocation17]  }
  0xb5   : > { %p5140_p11 = scmp.ne.s32.totalorder %s983_s0, %s5139_s9  ;;  %s5143_s1 = sshll.u32 %s5455_s8, 4  ;;  %s5144_s1 = int_to_ptr.vmem [resolvable:$false] %s5143_s1 }
  0xb6   : > { %s5145_s24 = scalar_lea.vmem %s5144_s1, 32  ;;  %p5146_p0 = scmp.lt.s32.totalorder %s983_s0, %s5144_s1 }
  0xb7   : > { %p5141_p12 = pnand %p5140_p11, %p5644_p4  ;;  %p5147_p1 = scmp.lt.s32.totalorder %s5145_s24, %s5139_s9 }
  0xb9   : > { %p5142_p13 = pneg %p5141_p12  ;;  %p5148_p2 = por %p5147_p1, %p5146_p0 }
  0xbb   : > { %p5149_p3 = pnand %p5148_p2, %p5142_p13 }
  0xbd   : > { %5152 = shalt.err (!%p5149_p3)
}
  0xbe   : > { %s6750_s25 = scalar_lea.sflag [#allocation18], %s5661_s6  ;;  %s6751_s21 = sld [smem:[#allocation58_spill]] }
  0xbf   : > { %4782 = dma.hbm_to_vmem [thread:$0]  (%p5644_p4), %s5771_s4, 16, %s983_s0, %s6750_s25  }
  0xc0   : > { %s1013_s24 = scalar_lea.vmem [#allocation20], %s5655_s5 }
  0xc1   : > { %s1020_s7 = sshll.u32 %s1013_s24, 4  ;;  %s1021_s7 = int_to_ptr.vmem [resolvable:$true] %s1020_s7 }
  0xc4   : > { %s5797_s26 = scalar_lea.hbm %s6751_s21, %s5658_s10  ;;  %s5157_s4 = scalar_lea.hbm %s6751_s21, 64 }
  0xc5   : > { %s5153_s9 = scalar_lea.hbm %s5797_s26, 16  ;;  %p5158_p9 = scmp.lt.s32.totalorder %s5797_s26, %s6751_s21 }
  0xc6   : > { %p5154_p5 = scmp.ne.s32.totalorder %s5797_s26, %s5153_s9  ;;  %p5159_p10 = scmp.lt.s32.totalorder %s5157_s4, %s5153_s9 }
  0xc8   : > { %p5155_p7 = pnand %p5154_p5, %p5644_p4  ;;  %p5160_p11 = por %p5159_p10, %p5158_p9 }
  0xca   : > { %p5156_p8 = pneg %p5155_p7 }
  0xcc   : > { %p5161_p12 = pnand %p5160_p11, %p5156_p8 }
  0xce   : > { %5164 = shalt.err (!%p5161_p12)
}
  0xcf   : > { %s5165_s12 = scalar_lea.vmem %s1021_s7, 16  ;;  %s5456_s13 = smov [#allocation20]  }
  0xd0   : > { %p5166_p13 = scmp.ne.s32.totalorder %s1021_s7, %s5165_s12  ;;  %s5169_s24 = sshll.u32 %s5456_s13, 4  ;;  %s5170_s24 = int_to_ptr.vmem [resolvable:$false] %s5169_s24 }
  0xd1   : > { %s5171_s27 = scalar_lea.vmem %s5170_s24, 32  ;;  %p5172_p2 = scmp.lt.s32.totalorder %s1021_s7, %s5170_s24 }
  0xd2   : > { %p5167_p0 = pnand %p5166_p13, %p5644_p4  ;;  %p5173_p3 = scmp.lt.s32.totalorder %s5171_s27, %s5165_s12 }
  0xd4   : > { %p5168_p1 = pneg %p5167_p0  ;;  %p5174_p5 = por %p5173_p3, %p5172_p2 }
  0xd6   : > { %p5175_p7 = pnand %p5174_p5, %p5168_p1 }
  0xd8   : > { %5178 = shalt.err (!%p5175_p7)
}
  0xd9   : > { %s6752_s9 = scalar_lea.sflag [#allocation21], %s5661_s6  ;;  %s6753_s4 = sld [smem:[#allocation45_spill]] }
  0xda   : > { %4784 = dma.hbm_to_vmem [thread:$0]  (%p5644_p4), %s5797_s26, 16, %s1021_s7, %s6752_s9  }
  0xdb   : > { %s795_s27 = scalar_lea.vmem [#allocation3], %s5655_s5  ;;  %s5827_s12 = sshll.u32 %s5655_s5, 6 }
  0xdc   : > { %s802_s25 = sshll.u32 %s795_s27, 4  ;;  %s793_s13 = scalar_lea.sflag [#allocation4], %s5655_s5  ;;  %s803_s25 = int_to_ptr.vmem [resolvable:$true] %s802_s25 }
  0xdf   : > { %s5823_s0 = scalar_lea.hbm %s6753_s4, %s5658_s10  ;;  %s5183_s9 = scalar_lea.hbm %s6753_s4, 64 }
  0xe0   : > { %s5179_s24 = scalar_lea.hbm %s5823_s0, 16  ;;  %p5184_p11 = scmp.lt.s32.totalorder %s5823_s0, %s6753_s4 }
  0xe1   : > { %p5180_p8 = scmp.ne.s32.totalorder %s5823_s0, %s5179_s24  ;;  %p5185_p12 = scmp.lt.s32.totalorder %s5183_s9, %s5179_s24 }
  0xe3   : > { %p5181_p9 = pnand %p5180_p8, %p5644_p4  ;;  %p5186_p13 = por %p5185_p12, %p5184_p11 }
  0xe5   : > { %p5182_p10 = pneg %p5181_p9 }
  0xe7   : > { %p5187_p0 = pnand %p5186_p13, %p5182_p10 }
  0xe9   : > { %5190 = shalt.err (!%p5187_p0)
}
  0xea   : > { %s5191_s27 = scalar_lea.vmem %s803_s25, 16  ;;  %s5457_s11 = smov [#allocation3]  }
  0xeb   : > { %p5192_p1 = scmp.ne.s32.totalorder %s803_s25, %s5191_s27  ;;  %s5195_s15 = sshll.u32 %s5457_s11, 4  ;;  %s5196_s15 = int_to_ptr.vmem [resolvable:$false] %s5195_s15 }
  0xec   : > { %s5197_s17 = scalar_lea.vmem %s5196_s15, 32  ;;  %p5198_p5 = scmp.lt.s32.totalorder %s803_s25, %s5196_s15 }
  0xed   : > { %p5193_p2 = pnand %p5192_p1, %p5644_p4  ;;  %p5199_p7 = scmp.lt.s32.totalorder %s5197_s17, %s5191_s27 }
  0xef   : > { %p5194_p3 = pneg %p5193_p2  ;;  %p5200_p8 = por %p5199_p7, %p5198_p5 }
  0xf1   : > { %p5201_p9 = pnand %p5200_p8, %p5194_p3 }
  0xf3   : > { %5204 = shalt.err (!%p5201_p9)
}
  0xf4   : > { %4773 = dma.hbm_to_vmem [thread:$0]  (%p5644_p4), %s5823_s0, 16, %s803_s25, %s793_s13  }
  0xf5   : > { %s5847_s24 = sshll.u32 %s5449_s28, 10  ;;  %s830_s26 = scalar_lea.vmem [#allocation7], %s5827_s12 }
  0xf6   : > { %s837_s7 = sshll.u32 %s830_s26, 4  ;;  %s6754_s8 = sld [smem:[#allocation47_spill]]  ;;  %s5856_s7 = int_to_ptr.vmem [resolvable:$true] %s837_s7 }
  0xfc   : > { %s5854_s15 = scalar_lea.hbm %s6754_s8, %s5847_s24  ;;  %s5209_s13 = scalar_lea.hbm %s6754_s8, 4096 }
  0xfd   : > { %s5205_s17 = scalar_lea.hbm %s5854_s15, 1024  ;;  %p5210_p13 = scmp.lt.s32.totalorder %s5854_s15, %s6754_s8 }
  0xfe   : > { %p5206_p10 = scmp.ne.s32.totalorder %s5854_s15, %s5205_s17  ;;  %p5211_p0 = scmp.lt.s32.totalorder %s5209_s13, %s5205_s17 }
 0x100   : > { %p5207_p11 = pnand %p5206_p10, %p5644_p4  ;;  %p5212_p1 = por %p5211_p0, %p5210_p13 }
 0x102   : > { %p5208_p12 = pneg %p5207_p11 }
 0x104   : > { %p5213_p2 = pnand %p5212_p1, %p5208_p12 }
 0x106   : > { %5216 = shalt.err (!%p5213_p2)
}
 0x107   : > { %s5217_s26 = scalar_lea.vmem %s5856_s7, 1024  ;;  %s5458_s11 = smov [#allocation7]  }
 0x108   : > { %p5218_p3 = scmp.ne.s32.totalorder %s5856_s7, %s5217_s26  ;;  %s5221_s9 = sshll.u32 %s5458_s11, 4  ;;  %s5222_s9 = int_to_ptr.vmem [resolvable:$false] %s5221_s9 }
 0x109   : > { %s5223_s0 = scalar_lea.vmem %s5222_s9, 2048  ;;  %p5224_p8 = scmp.lt.s32.totalorder %s5856_s7, %s5222_s9 }
 0x10a   : > { %p5219_p5 = pnand %p5218_p3, %p5644_p4  ;;  %p5225_p9 = scmp.lt.s32.totalorder %s5223_s0, %s5217_s26 }
 0x10c   : > { %p5220_p7 = pneg %p5219_p5  ;;  %p5226_p10 = por %p5225_p9, %p5224_p8 }
 0x10e   : > { %p5227_p11 = pnand %p5226_p10, %p5220_p7 }
 0x110   : > { %5230 = shalt.err (!%p5227_p11)
}
 0x111   : > { %s5459_s17 = smov 64   ;;  %s5460_s25 = smov 4  }
 0x112   : > { %s6755_s13 = scalar_lea.sflag [#allocation6], %s5661_s6  ;;  %s6756_s14 = sld [smem:[#allocation51_spill]] }
 0x113   : > { %4775 = dma.hbm_to_vmem [thread:$0]  (%p5644_p4), %s5854_s15, 1024, %s5856_s7, %s6755_s13, %s5459_s17, %s5459_s17, %s5460_s25  }
 0x114   : > { %s883_s11 = scalar_lea.vmem [#allocation10], %s5827_s12  ;;  %s6757_s16 = sld [smem:[#allocation53_spill]] }
 0x115   : > { %s890_s9 = sshll.u32 %s883_s11, 4  ;;  %s5890_s9 = int_to_ptr.vmem [resolvable:$true] %s890_s9 }
 0x118   : > { %s5887_s26 = scalar_lea.hbm %s6756_s14, %s5847_s24  ;;  %s5235_s13 = scalar_lea.hbm %s6756_s14, 4096 }
 0x119   : > { %s5231_s19 = scalar_lea.hbm %s5887_s26, 1024  ;;  %p5236_p1 = scmp.lt.s32.totalorder %s5887_s26, %s6756_s14 }
 0x11a   : > { %s5896_s8 = scalar_lea.hbm %s6757_s16, %s5658_s10  ;;  %p5232_p12 = scmp.ne.s32.totalorder %s5887_s26, %s5231_s19 }
 0x11b   : > { %p5237_p2 = scmp.lt.s32.totalorder %s5235_s13, %s5231_s19 }
 0x11c   : > { %p5233_p13 = pnand %p5232_p12, %p5644_p4 }
 0x11d   : > { %p5238_p3 = por %p5237_p2, %p5236_p1 }
 0x11e   : > { %p5234_p0 = pneg %p5233_p13 }
 0x120   : > { %p5239_p5 = pnand %p5238_p3, %p5234_p0 }
 0x122   : > { %5242 = shalt.err (!%p5239_p5)
}
 0x123   : > { %s5243_s4 = scalar_lea.vmem %s5890_s9, 1024  ;;  %s5461_s11 = smov [#allocation10]  }
 0x124   : > { %p5244_p7 = scmp.ne.s32.totalorder %s5890_s9, %s5243_s4  ;;  %s5247_s0 = sshll.u32 %s5461_s11, 4  ;;  %s5248_s0 = int_to_ptr.vmem [resolvable:$false] %s5247_s0 }
 0x125   : > { %s5249_s7 = scalar_lea.vmem %s5248_s0, 2048  ;;  %p5250_p10 = scmp.lt.s32.totalorder %s5890_s9, %s5248_s0 }
 0x126   : > { %p5245_p8 = pnand %p5244_p7, %p5644_p4  ;;  %p5251_p11 = scmp.lt.s32.totalorder %s5249_s7, %s5243_s4 }
 0x128   : > { %p5246_p9 = pneg %p5245_p8  ;;  %p5252_p12 = por %p5251_p11, %p5250_p10 }
 0x12a   : > { %p5253_p13 = pnand %p5252_p12, %p5246_p9 }
 0x12c   : > { %5256 = shalt.err (!%p5253_p13)
}
 0x12d   : > { %s6758_s19 = scalar_lea.sflag [#allocation9], %s5661_s6  ;;  %s920_s15 = scalar_lea.vmem [#allocation13], %s5655_s5 }
 0x12e   : > { %4777 = dma.hbm_to_vmem [thread:$0]  (%p5644_p4), %s5887_s26, 1024, %s5890_s9, %s6758_s19, %s5459_s17, %s5459_s17, %s5460_s25  }
 0x12f   : > { %s927_s13 = sshll.u32 %s920_s15, 4  ;;  %s6759_s18 = sld [smem:[#allocation55_spill]]  ;;  %s928_s13 = int_to_ptr.vmem [resolvable:$true] %s927_s13 }
 0x130   : > { %s5257_s11 = scalar_lea.hbm %s5896_s8, 16  ;;  %s5261_s14 = scalar_lea.hbm %s6757_s16, 64 }
 0x131   : > { %p5258_p0 = scmp.ne.s32.totalorder %s5896_s8, %s5257_s11  ;;  %p5262_p3 = scmp.lt.s32.totalorder %s5896_s8, %s6757_s16 }
 0x132   : > { %p5263_p5 = scmp.lt.s32.totalorder %s5261_s14, %s5257_s11 }
 0x133   : > { %p5259_p1 = pnand %p5258_p0, %p5644_p4 }
 0x134   : > { %p5264_p7 = por %p5263_p5, %p5262_p3 }
 0x135   : > { %s5928_s4 = scalar_lea.hbm %s6759_s18, %s5847_s24  ;;  %p5260_p2 = pneg %p5259_p1 }
 0x137   : > { %p5265_p8 = pnand %p5264_p7, %p5260_p2 }
 0x139   : > { %5268 = shalt.err (!%p5265_p8)
}
 0x13a   : > { %s5269_s26 = scalar_lea.vmem %s928_s13, 16  ;;  %s5462_s9 = smov [#allocation13]  }
 0x13b   : > { %p5270_p9 = scmp.ne.s32.totalorder %s928_s13, %s5269_s26  ;;  %s5273_s19 = sshll.u32 %s5462_s9, 4  ;;  %s5274_s19 = int_to_ptr.vmem [resolvable:$false] %s5273_s19 }
 0x13c   : > { %s5275_s15 = scalar_lea.vmem %s5274_s19, 32  ;;  %p5276_p12 = scmp.lt.s32.totalorder %s928_s13, %s5274_s19 }
 0x13d   : > { %p5271_p10 = pnand %p5270_p9, %p5644_p4  ;;  %p5277_p13 = scmp.lt.s32.totalorder %s5275_s15, %s5269_s26 }
 0x13f   : > { %p5272_p11 = pneg %p5271_p10  ;;  %p5278_p0 = por %p5277_p13, %p5276_p12 }
 0x141   : > { %p5279_p1 = pnand %p5278_p0, %p5272_p11 }
 0x143   : > { %5282 = shalt.err (!%p5279_p1)
}
 0x144   : > { %s6760_s14 = scalar_lea.sflag [#allocation12], %s5661_s6  ;;  %s955_s21 = scalar_lea.vmem [#allocation16], %s5827_s12 }
 0x145   : > { %4779 = dma.hbm_to_vmem [thread:$0]  (%p5644_p4), %s5896_s8, 16, %s928_s13, %s6760_s14  }
 0x146   : > { %s962_s29 = sshll.u32 %s955_s21, 4  ;;  %s6761_s20 = sld [smem:[#allocation57_spill]]  ;;  %s5949_s29 = int_to_ptr.vmem [resolvable:$true] %s962_s29 }
 0x147   : > { %s5283_s0 = scalar_lea.hbm %s5928_s4, 1024  ;;  %s5287_s9 = scalar_lea.hbm %s6759_s18, 4096 }
 0x148   : > { %p5284_p2 = scmp.ne.s32.totalorder %s5928_s4, %s5283_s0  ;;  %p5288_p7 = scmp.lt.s32.totalorder %s5928_s4, %s6759_s18 }
 0x149   : > { %p5289_p8 = scmp.lt.s32.totalorder %s5287_s9, %s5283_s0 }
 0x14a   : > { %p5285_p3 = pnand %p5284_p2, %p5644_p4 }
 0x14b   : > { %p5290_p9 = por %p5289_p8, %p5288_p7 }
 0x14c   : > { %s5955_s11 = scalar_lea.hbm %s6761_s20, %s5847_s24  ;;  %p5286_p5 = pneg %p5285_p3 }
 0x14e   : > { %p5291_p10 = pnand %p5290_p9, %p5286_p5 }
 0x150   : > { %5294 = shalt.err (!%p5291_p10)
}
 0x151   : > { %s5295_s24 = scalar_lea.vmem %s5949_s29, 1024  ;;  %s5463_s13 = smov [#allocation16]  }
 0x152   : > { %p5296_p11 = scmp.ne.s32.totalorder %s5949_s29, %s5295_s24  ;;  %s5299_s15 = sshll.u32 %s5463_s13, 4  ;;  %s5300_s15 = int_to_ptr.vmem [resolvable:$false] %s5299_s15 }
 0x153   : > { %s5301_s14 = scalar_lea.vmem %s5300_s15, 2048  ;;  %p5302_p0 = scmp.lt.s32.totalorder %s5949_s29, %s5300_s15 }
 0x154   : > { %p5297_p12 = pnand %p5296_p11, %p5644_p4  ;;  %p5303_p1 = scmp.lt.s32.totalorder %s5301_s14, %s5295_s24 }
 0x156   : > { %p5298_p13 = pneg %p5297_p12  ;;  %p5304_p2 = por %p5303_p1, %p5302_p0 }
 0x158   : > { %p5305_p3 = pnand %p5304_p2, %p5298_p13 }
 0x15a   : > { %5308 = shalt.err (!%p5305_p3)
}
 0x15b   : > { %s6762_s21 = scalar_lea.sflag [#allocation15], %s5661_s6  ;;  %s993_s1 = scalar_lea.vmem [#allocation19], %s5827_s12 }
 0x15c   : > { %4781 = dma.hbm_to_vmem [thread:$0]  (%p5644_p4), %s5928_s4, 1024, %s5949_s29, %s6762_s21, %s5459_s17, %s5459_s17, %s5460_s25  }
 0x15d   : > { %s1000_s27 = sshll.u32 %s993_s1, 4  ;;  %s6763_s22 = sld [smem:[#allocation59_spill]]  ;;  %s5983_s27 = int_to_ptr.vmem [resolvable:$true] %s1000_s27 }
 0x15e   : > { %s5309_s9 = scalar_lea.hbm %s5955_s11, 1024  ;;  %s5313_s24 = scalar_lea.hbm %s6761_s20, 4096 }
 0x15f   : > { %p5310_p5 = scmp.ne.s32.totalorder %s5955_s11, %s5309_s9  ;;  %p5314_p9 = scmp.lt.s32.totalorder %s5955_s11, %s6761_s20 }
 0x160   : > { %p5315_p10 = scmp.lt.s32.totalorder %s5313_s24, %s5309_s9 }
 0x161   : > { %p5311_p7 = pnand %p5310_p5, %p5644_p4 }
 0x162   : > { %p5316_p11 = por %p5315_p10, %p5314_p9 }
 0x163   : > { %s5989_s26 = scalar_lea.hbm %s6763_s22, %s5658_s10  ;;  %p5312_p8 = pneg %p5311_p7 }
 0x165   : > { %p5317_p12 = pnand %p5316_p11, %p5312_p8 }
 0x167   : > { %5320 = shalt.err (!%p5317_p12)
}
 0x168   : > { %s5321_s12 = scalar_lea.vmem %s5983_s27, 1024  ;;  %s5464_s29 = smov [#allocation19]  }
 0x169   : > { %p5322_p13 = scmp.ne.s32.totalorder %s5983_s27, %s5321_s12  ;;  %s5325_s15 = sshll.u32 %s5464_s29, 4  ;;  %s5326_s15 = int_to_ptr.vmem [resolvable:$false] %s5325_s15 }
 0x16a   : > { %s5327_s14 = scalar_lea.vmem %s5326_s15, 2048  ;;  %p5328_p2 = scmp.lt.s32.totalorder %s5983_s27, %s5326_s15 }
 0x16b   : > { %p5323_p0 = pnand %p5322_p13, %p5644_p4  ;;  %p5329_p3 = scmp.lt.s32.totalorder %s5327_s14, %s5321_s12 }
 0x16d   : > { %p5324_p1 = pneg %p5323_p0  ;;  %p5330_p5 = por %p5329_p3, %p5328_p2 }
 0x16f   : > { %p5331_p7 = pnand %p5330_p5, %p5324_p1 }
 0x171   : > { %5334 = shalt.err (!%p5331_p7)
}
 0x172   : > { %s6764_s21 = scalar_lea.sflag [#allocation18], %s5661_s6  ;;  %s1030_s1 = scalar_lea.vmem [#allocation22], %s5655_s5 }
 0x173   : > { %4783 = dma.hbm_to_vmem [thread:$0]  (%p5644_p4), %s5955_s11, 1024, %s5983_s27, %s6764_s21, %s5459_s17, %s5459_s17, %s5460_s25  }
 0x174   : > { %s1037_s0 = sshll.u32 %s1030_s1, 4  ;;  %s5335_s7 = scalar_lea.hbm %s5989_s26, 16  ;;  %s1038_s0 = int_to_ptr.vmem [resolvable:$true] %s1037_s0 }
 0x175   : > { %p5336_p8 = scmp.ne.s32.totalorder %s5989_s26, %s5335_s7  ;;  %s5339_s8 = scalar_lea.hbm %s6763_s22, 64 }
 0x176   : > { %p5340_p11 = scmp.lt.s32.totalorder %s5989_s26, %s6763_s22  ;;  %p5341_p12 = scmp.lt.s32.totalorder %s5339_s8, %s5335_s7 }
 0x177   : > { %p5337_p9 = pnand %p5336_p8, %p5644_p4 }
 0x178   : > { %p5342_p13 = por %p5341_p12, %p5340_p11 }
 0x179   : > { %p5338_p10 = pneg %p5337_p9 }
 0x17b   : > { %p5343_p0 = pnand %p5342_p13, %p5338_p10 }
 0x17d   : > { %5346 = shalt.err (!%p5343_p0)
}
 0x17e   : > { %s5347_s17 = scalar_lea.vmem %s1038_s0, 16  ;;  %s5465_s25 = smov [#allocation22]  }
 0x17f   : > { %p5348_p1 = scmp.ne.s32.totalorder %s1038_s0, %s5347_s17  ;;  %s5351_s11 = sshll.u32 %s5465_s25, 4  ;;  %s5352_s11 = int_to_ptr.vmem [resolvable:$false] %s5351_s11 }
 0x180   : > { %s5353_s27 = scalar_lea.vmem %s5352_s11, 32  ;;  %p5354_p5 = scmp.lt.s32.totalorder %s1038_s0, %s5352_s11 }
 0x181   : > { %p5349_p2 = pnand %p5348_p1, %p5644_p4  ;;  %p5355_p7 = scmp.lt.s32.totalorder %s5353_s27, %s5347_s17 }
 0x183   : > { %p5350_p3 = pneg %p5349_p2  ;;  %p5356_p8 = por %p5355_p7, %p5354_p5 }
 0x185   : > { %p5357_p9 = pnand %p5356_p8, %p5350_p3 }
 0x187   : > { %5360 = shalt.err (!%p5357_p9)
}
 0x188   : > { %s6765_s4 = scalar_lea.sflag [#allocation21], %s5661_s6  ;;  %s6039_s15 = scalar_lea.hbm %s6688_s23, %s5658_s10 }
 0x189   : > { %4785 = dma.hbm_to_vmem [thread:$0]  (%p5644_p4), %s5989_s26, 16, %s1038_s0, %s6765_s4  }
 0x18a   : > { %s1047_s14 = scalar_lea.vmem [#allocation23], %s5655_s5  ;;  %s1045_s1 = scalar_lea.sflag [#allocation24], %s5655_s5 }
 0x18b   : > { %s1054_s21 = sshll.u32 %s1047_s14, 4  ;;  %s5361_s7 = scalar_lea.hbm %s6039_s15, 16  ;;  %s1055_s21 = int_to_ptr.vmem [resolvable:$true] %s1054_s21 }
 0x18c   : > { %p5362_p10 = scmp.ne.s32.totalorder %s6039_s15, %s5361_s7  ;;  %s5365_s26 = scalar_lea.hbm %s6688_s23, 64 }
 0x18d   : > { %p5366_p13 = scmp.lt.s32.totalorder %s6039_s15, %s6688_s23  ;;  %p5367_p0 = scmp.lt.s32.totalorder %s5365_s26, %s5361_s7 }
 0x18e   : > { %p5363_p11 = pnand %p5362_p10, %p5644_p4 }
 0x18f   : > { %p5368_p1 = por %p5367_p0, %p5366_p13 }
 0x190   : > { %p5364_p12 = pneg %p5363_p11 }
 0x192   : > { %p5369_p2 = pnand %p5368_p1, %p5364_p12 }
 0x194   : > { %5372 = shalt.err (!%p5369_p2)
}
 0x195   : > { %s5373_s10 = scalar_lea.vmem %s1055_s21, 16  ;;  %s5466_s5 = smov [#allocation23]  }
 0x196   : > { %p5374_p3 = scmp.ne.s32.totalorder %s1055_s21, %s5373_s10  ;;  %s5377_s8 = sshll.u32 %s5466_s5, 4  ;;  %s5378_s8 = int_to_ptr.vmem [resolvable:$false] %s5377_s8 }
 0x197   : > { %s5379_s24 = scalar_lea.vmem %s5378_s8, 32  ;;  %p5380_p8 = scmp.lt.s32.totalorder %s1055_s21, %s5378_s8 }
 0x198   : > { %p5375_p5 = pnand %p5374_p3, %p5644_p4  ;;  %p5381_p9 = scmp.lt.s32.totalorder %s5379_s24, %s5373_s10 }
 0x19a   : > { %p5376_p7 = pneg %p5375_p5  ;;  %p5382_p10 = por %p5381_p9, %p5380_p8 }
 0x19c   : > { %p5383_p11 = pnand %p5382_p10, %p5376_p7 }
 0x19e   : > { %5386 = shalt.err (!%p5383_p11)
}
 0x19f   : > { %4786 = dma.hbm_to_vmem [thread:$0]  (%p5644_p4), %s6039_s15, 16, %s1055_s21, %s1045_s1  }
 0x1a0 PF: > { %p4265_p12 = scmp.ge.s32.totalorder %s5449_s28, 1  ;;  %p1059_p13 = scmp.lt.s32.totalorder %s5449_s28, 5 }
 0x1a2   : > { %p1060_p0 = pnand %p4265_p12, %p1059_p13 }
 0x1a3   : > { %s6062_s13 = sand.u32 (!%p1060_p0), 1, %s5441_s3  }
 0x1a4   : > { %1063 = sbr.rel (%p1060_p0) target bundleno = 7025 (0x1b71), region = 124  ;;  %s1066_s17 = scalar_lea.sflag (!%p1060_p0), [#allocation4], %s6062_s13 }
 0x1a9   : > { %5404 = dma.done.wait (%p5649_p6), %s1066_s17, 16  }
 0x1aa   : > { %5406 = vsyncadd (%p5649_p6), %s1066_s17, 4294967280  ;;  %s6766_s30 = sld [smem:[#allocation34_spill]] }
 0x1b0   : > { %s6071_s11 = sand.u32 1, %s6766_s30  }
 0x1b1   : > { %s1074_s28 = scalar_lea.sflag [#allocation6], %s6071_s11 }
 0x1b2   : > { %5408 = dma.done.wait (%p5649_p6), %s1074_s28, 1040  }
 0x1b3   : > { %5410 = vsyncadd (%p5649_p6), %s1074_s28, 4294966256  ;;  %s4266_s4 = sshll.u32 %s6062_s13, 6  ;;  %s1091_s29 = scalar_lea.sflag [#allocation9], %s6071_s11 }
 0x1b4   : > { %s6080_s12 = scalar_lea.vmem [#allocation7], %s4266_s4 }
 0x1b5   : > { %5412 = dma.done.wait (%p5649_p6), %s1091_s29, 1040  }
 0x1b6   : > { %5414 = vsyncadd (%p5649_p6), %s1091_s29, 4294966256  ;;  %s6088_s14 = scalar_lea.vmem [#allocation10], %s4266_s4  ;;  %s1108_s21 = scalar_lea.sflag [#allocation12], %s6071_s11 }
 0x1b7   : > { %5416 = dma.done.wait (%p5649_p6), %s1108_s21, 32  }
 0x1b8   : > { %5418 = vsyncadd (%p5649_p6), %s1108_s21, 4294967264  ;;  %s1124_s6 = scalar_lea.sflag [#allocation15], %s6071_s11 }
 0x1b9   : > { %5420 = dma.done.wait (%p5649_p6), %s1124_s6, 1040  }
 0x1ba   : > { %5422 = vsyncadd (%p5649_p6), %s1124_s6, 4294966256  ;;  %s6103_s26 = scalar_lea.vmem [#allocation16], %s4266_s4  ;;  %s1141_s0 = scalar_lea.sflag [#allocation18], %s6071_s11 }
 0x1bb   : > { %5424 = dma.done.wait (%p5649_p6), %s1141_s0, 1040  }
 0x1bc   : > { %5426 = vsyncadd (%p5649_p6), %s1141_s0, 4294966256  ;;  %s6111_s10 = scalar_lea.vmem [#allocation19], %s4266_s4  ;;  %s1158_s5 = scalar_lea.sflag [#allocation21], %s6071_s11 }
 0x1bd   : > { %5428 = dma.done.wait (%p5649_p6), %s1158_s5, 32  }
 0x1be   : > { %5430 = vsyncadd (%p5649_p6), %s1158_s5, 4294967264  ;;  %s1174_s17 = scalar_lea.sflag [#allocation24], %s6062_s13 }
 0x1bf   : > { %5432 = dma.done.wait (%p5649_p6), %s1174_s17, 16  }
 0x1c0   : > { %5434 = vsyncadd (%p5649_p6), %s1174_s17, 4294967280  ;;  %p1321_p4 = scmp.lt.s32.totalorder %s6766_s30, 3  ;;  %s6767_s5 = sld [smem:[#allocation43_spill]] }
 0x1c1   : > { %s6768_s24 = sld [smem:[#allocation41_spill]]  ;;  %p4276_p6 = scmp.ne.s32.totalorder %s6766_s30, 0 }
 0x1c2   : > { %s6128_s11 = scalar_select %p1321_p4, %s6766_s30, 3 }
 0x1c3   : > { %s6769_s7 = sld [smem:[#allocation44_spill]] }
 0x1c4   : > { %s4771_s4 = smul.u32 192, %s6128_s11  ;;  %s4408_s29 = sshll.u32 %s6128_s11, 6 }
 0x1c5   : > { %s4772_s21 = smul.u32 3, %s6128_s11  ;;  %s6770_s25 = sld [smem:[#allocation42_spill]] }
 0x1c6   : > { %s6136_s28 = scalar_lea.vmem %s6767_s5, %s4408_s29  ;;  %s4409_s18 = sshll.u32 %s6128_s11, 7 }
 0x1c7   : > { %s6141_s8 = scalar_lea.vmem %s6768_s24, %s4771_s4  ;;  %s6771_s6 = sld [smem:[#allocation49_spill]] }
 0x1c8   : > { %s4275_s0 = sshll.u32 %s6128_s11, 1  ;;  %s6772_s24 = sld [smem:[#allocation50_spill]] }
 0x1c9   : > { %s1337_s1 = scalar_lea.vmem %s6769_s7, %s6128_s11  ;;  %s6773_s27 = sld [smem:[#allocation37_spill]] (!%p4276_p6) }
 0x1ca   : > { %1351 = sbr.rel (%p4276_p6) target bundleno = 466 (0x1d2), region = 184 }
 0x1cb   : > { %s6150_s16 = scalar_lea.vmem %s6770_s25, %s4772_s21 }
 0x1cd   : > { %s6156_s29 = scalar_lea.vmem %s6771_s6, %s4409_s18 }
 0x1ce   : > { %s6162_s4 = scalar_lea.vmem %s6772_s24, %s4275_s0 }
 0x1cf   : > { %s6774_s15 = smov %s6773_s27  ;;  %v1352_v0 = vld [vmem:[%s6773_s27] sm:$0xff] }
 0x1d0   : > { %v1353_v1 = vld [vmem:[%s6774_s15 + $0x8] sm:$0xff]  ;;  %1354 = vst [vmem:[#allocation2] sm:$0xff] %v1352_v0 }
 0x1d1   : > { %1355 = vst [vmem:[#allocation2 + $0x8] sm:$0xff] %v1353_v1 }
 0x1d2 PF: > { %v4843_v2 = vld [vmem:[%s6141_s8 + $0xac] ss:$12 sps:$4 sm:$0xff]   ;;  %v4845_v3 = vld [vmem:[%s6141_s8 + $0xa8] ss:$12 sps:$4 sm:$0xff]   ;;  %v5467_v4 = vmov 0   ;;  %v5468_v22 = vmov 0.0   ;;  %v1399_v23 = vlaneseq }
 0x1d3   : > { %1574 = vmatprep.mubr.bf16.mxu0 %v5467_v4  ;;  %1542 = vmatprep.subr.bf16.mxu0 %v4843_v2  ;;  %v4846_v5 = vld [vmem:[%s6141_s8 + $0x94] ss:$12 sps:$4 sm:$0xff]   ;;  %v4848_v6 = vld [vmem:[%s6141_s8 + $0x90] ss:$12 sps:$4 sm:$0xff]   ;;  %v4851_v8 = vld [vmem:[%s6141_s8 + $0x78] ss:$12 sps:$4 sm:$0xff]  }
 0x1d4   : > { %1543 = vmatpush1.bf16.msra.mxu0 %v4845_v3  ;;  %v4849_v7 = vld [vmem:[%s6141_s8 + $0x7c] ss:$12 sps:$4 sm:$0xff]   ;;  %v4852_v9 = vld [vmem:[%s6141_s8 + $0x64] ss:$12 sps:$4 sm:$0xff]   ;;  %v4854_v10 = vld [vmem:[%s6141_s8 + $0x60] ss:$12 sps:$4 sm:$0xff]   ;;  %4511 = vmatprep.subr.bf16.mxu1 %v5468_v22 }
 0x1d5   : > { %1544 = vmatprep.subr.bf16.mxu0 %v4846_v5  ;;  %v4855_v11 = vld [vmem:[%s6141_s8 + $0x4c] ss:$12 sps:$4 sm:$0xff]   ;;  %v4857_v12 = vld [vmem:[%s6141_s8 + $0x48] ss:$12 sps:$4 sm:$0xff]   ;;  %v4860_v14 = vld [vmem:[%s6141_s8 + $0x30] ss:$12 sps:$4 sm:$0xff]  }
 0x1d6   : > { %v4858_v13 = vld [vmem:[%s6141_s8 + $0x34] ss:$12 sps:$4 sm:$0xff]   ;;  %v4861_v15 = vld [vmem:[%s6141_s8 + $0x1c] ss:$12 sps:$4 sm:$0xff]   ;;  %v4863_v16 = vld [vmem:[%s6141_s8 + $0x18] ss:$12 sps:$4 sm:$0xff]  }
 0x1d7   : > { %v4864_v17 = vld [vmem:[%s6141_s8 + $0x4] ss:$12 sps:$4 sm:$0xff]   ;;  %v4866_v18 = vld [vmem:[%s6141_s8] ss:$12 sps:$4 sm:$0xff]   ;;  %vm5469_vm0 = vmmov 0   ;;  %v6200_v24 = vshrl.u32 %v1399_v23, 7 }
 0x1d8   : > { %1545 = vmatpush1.bf16.msra.mxu0 %v4848_v6  ;;  %v6188_v19 = vld [vmem:[#allocation2] sm:$0xff]  ;;  %v6190_v20 = vld [vmem:[#allocation2 + $0x8] sm:$0xff]  ;;  %4527 = vmatprep.mubr.msk.bf16.mxu1 %vm5469_vm0, %v5468_v22  ;;  %vm1645_vm1 = vcmask 261120   ;;  %v4867_v41 = vld [vmem:[%s6141_s8 + $0xb0] ss:$12 sps:$4 sm:$0xff]   ;;  %s6775_s22 = sld [smem:[#allocation39_spill]] }
 0x1d9   : > { %1546 = vmatprep.subr.bf16.mxu0 %v4849_v7  ;;  %v1396_v21 = vpack.c.bf16 %v6190_v20, %v6188_v19  ;;  %v1405_v25 = vsub.s32 1, %v6200_v24  ;;  %v6204_v27 = vld [vmem:[%s6150_s16] sm:$0x7]  ;;  %v1401_v29 = vsub.s32 0, %v6200_v24  ;;  %s5470_s16 = smov 96   ;;  %4512 = vmatpush3.bf16.msra.mxu1 %v4867_v41  ;;  %vm1697_vm2 = vcmask 130048  }
 0x1da   : > { %v4868_v42 = vld [vmem:[%s6141_s8 + $0x98] ss:$12 sps:$4 sm:$0xff]   ;;  %4513 = vmatprep.subr.bf16.mxu1 %v5468_v22  ;;  %v4869_v43 = vld [vmem:[%s6141_s8 + $0x80] ss:$12 sps:$4 sm:$0xff]   ;;  %v4870_v44 = vld [vmem:[%s6141_s8 + $0x68] ss:$12 sps:$4 sm:$0xff]  }
 0x1db   : > { %v1406_v30 = vrot.slane %v6204_v27, %v1405_v25  ;;  %v1402_v33 = vrot.slane %v6204_v27, %v1401_v29  ;;  %v4871_v45 = vld [vmem:[%s6141_s8 + $0x50] ss:$12 sps:$4 sm:$0xff]   ;;  %v4872_v46 = vld [vmem:[%s6141_s8 + $0x38] ss:$12 sps:$4 sm:$0xff]   ;;  %v4873_v47 = vld [vmem:[%s6141_s8 + $0x20] ss:$12 sps:$4 sm:$0xff]  }
 0x1dc   : > { %1547 = vmatpush1.bf16.msra.mxu0 %v4851_v8  ;;  %v4874_v48 = vld [vmem:[%s6141_s8 + $0x8] ss:$12 sps:$4 sm:$0xff]   ;;  %s5471_s21 = smov 64   ;;  %s5472_s17 = smov 32  }
 0x1dd   : > { %1548 = vmatprep.subr.bf16.mxu0 %v4852_v9  ;;  %4514 = vmatpush3.bf16.msra.mxu1 %v4868_v42  ;;  %s6777_s11 = sld [smem:[#allocation38_spill]]  ;;  %s6786_s20 = scalar_lea.vmem [#allocation17], %s6062_s13 }
 0x1de   : > { %4515 = vmatprep.subr.bf16.mxu1 %v5468_v22  ;;  %v6254_v53 = vld [vmem:[%s6775_s22] sm:$0xff]  ;;  %v6260_v58 = vld [vmem:[%s6775_s22 + $0x8] sm:$0xff]  ;;  %s6781_s27 = sld [smem:[#allocation40_spill]]  ;;  %s6787_s30 = scalar_lea.vmem [#allocation20], %s6062_s13 }
 0x1df   : > { %s6789_s8 = scalar_lea.vmem [#allocation23], %s6062_s13 }
 0x1e0   : > { %1549 = vmatpush1.bf16.msra.mxu0 %v4854_v10 }
 0x1e1   : > { %1550 = vmatprep.subr.bf16.mxu0 %v4855_v11  ;;  %4516 = vmatpush3.bf16.msra.mxu1 %v4869_v43 }
 0x1e2   : > { %4517 = vmatprep.subr.bf16.mxu1 %v5468_v22 }
 0x1e4   : > { %1551 = vmatpush1.bf16.msra.mxu0 %v4857_v12  ;;  %s6782_s25 = smov %s6781_s27 }
 0x1e5   : > { %1552 = vmatprep.subr.bf16.mxu0 %v4858_v13  ;;  %4518 = vmatpush3.bf16.msra.mxu1 %v4870_v44 }
 0x1e6   : > { %4519 = vmatprep.subr.bf16.mxu1 %v5468_v22 }
 0x1e8   : > { %1553 = vmatpush1.bf16.msra.mxu0 %v4860_v14 }
 0x1e9   : > { %1554 = vmatprep.subr.bf16.mxu0 %v4861_v15  ;;  %4520 = vmatpush3.bf16.msra.mxu1 %v4871_v45 }
 0x1ea   : > { %4521 = vmatprep.subr.bf16.mxu1 %v5468_v22 }
 0x1ec   : > { %1555 = vmatpush1.bf16.msra.mxu0 %v4863_v16 }
 0x1ed   : > { %1556 = vmatprep.subr.bf16.mxu0 %v4864_v17  ;;  %4522 = vmatpush3.bf16.msra.mxu1 %v4872_v46  ;;  %v1409_v17 = vsub.s32 2, %v6200_v24 }
 0x1ee   : > { %4523 = vmatprep.subr.bf16.mxu1 %v5468_v22 }
 0x1f0   : > { %1557 = vmatpush1.bf16.msra.mxu0 %v4866_v18 }
 0x1f1   : > { %4531 = vmatprep.subr.bf16.mxu0 %v5468_v22  ;;  %4524 = vmatpush3.bf16.msra.mxu1 %v4873_v47 }
 0x1f2   : > { %4525 = vmatprep.subr.bf16.mxu1 %v5468_v22 }
 0x1f3   : > { %1575 = vmatmul.mubr.bf16.vlgmr.msra.gmra.mxu0 %v1396_v21 }
 0x1f4   : > { %4533 = vmatprep.mubr.msk.bf16.mxu0 %vm5469_vm0, %v5468_v22 }
 0x1f5   : > { %4526 = vmatpush3.bf16.msra.mxu1 %v4874_v48 }
 0x1f6   : > { %4537 = vmatprep.subr.bf16.mxu1 %v5468_v22 }
 0x1f8   : > { %4528 = vmatmul.mubr.bf16.vlgmr.msra.gmra.mxu1 %v1396_v21  ;;  %v1410_v21 = vrot.slane %v6204_v27, %v1409_v17 }
 0x1f9   : > { %4539 = vmatprep.mubr.msk.bf16.mxu1 %vm5469_vm0, %v5468_v22 }
 0x2b3   : > { %v1576_v26 = vpop.f32.mrf.mxu0 }
 0x2b4   : > { %v1577_v38 = vadd.f32 %v1576_v26, %v1402_v33 }
 0x2b5   : > { %v1578_v28 = vpop.f32.mrf.mxu0 }
 0x2b6   : > { %v1579_v34 = vadd.f32 %v1578_v28, %v1406_v30 }
 0x2b7   : > { %v1580_v31 = vpop.f32.mrf.mxu0 }
 0x2b8   : > { %v1581_v36 = vadd.f32 %v1580_v31, %v1402_v33  ;;  %v1619_v18 = vpop.f32.mrf.mxu1 }
 0x2b9   : > { %v1582_v32 = vpop.f32.mrf.mxu0  ;;  %v1620_v26 = vadd.f32 %v1619_v18, %v1410_v21 }
 0x2ba   : > { %v1583_v35 = vadd.f32 %v1582_v32, %v1406_v30  ;;  %v6219_v40 = vpack.c.bf16 %v1581_v36, %v1577_v38  ;;  %v4529_v23 = vpop.f32.mrf.mxu1 }
 0x2bc   : > { %v6213_v37 = vpack.c.bf16 %v1583_v35, %v1579_v34  ;;  %v1622_v28 = vpop.f32.mrf.mxu1 }
 0x2bd   : > { %v1623_v30 = vadd.f32 %v1622_v28, %v1410_v21 }
 0x2be   : > { %1771 = vrot.lane.b32.xlu0 %v6213_v37, %s5470_s16  ;;  %v1650_v39 = vsel %vm1645_vm1, %v6213_v37, 0  ;;  %v4530_v31 = vpop.f32.mrf.mxu1 }
 0x2bf   : > { %4532 = vmatpush3.bf16.xpose.msra.mxu0 %v1650_v39  ;;  %v6273_v33 = vpack.c.bf16 %v1623_v30, %v1620_v26 }
 0x2c0   : > { %4543 = vmatprep.subr.bf16.mxu0 %v5468_v22 }
 0x2c1   : > { %4538 = vmatpush3.bf16.msra.mxu1 %v6273_v33 }
 0x2c2   : > { %1768 = vrot.lane.b32.xlu0 %v6219_v40, %s5470_s16  ;;  %4549 = vmatprep.subr.bf16.mxu1 %v5468_v22 }
 0x2c6   : > { %4534 = vmatmul.mubr.msk.bf16.vlgmr.msra.gmra.mxu0 %vm1645_vm1, %v6219_v40 }
 0x2c7   : > { %4545 = vmatprep.mubr.msk.bf16.mxu0 %vm5469_vm0, %v5468_v22 }
 0x330   : > { %v1772_v49 = vpop.permute.xlu0 %1771 }
 0x331   : > { %v1777_v50 = vsel %vm1645_vm1, %v1772_v49, 0 }
 0x332   : > { %4544 = vmatpush3.bf16.xpose.msra.mxu0 %v1777_v50 }
 0x333   : > { %4555 = vmatprep.subr.bf16.mxu0 %v5468_v22 }
 0x334   : > { %v1769_v51 = vpop.permute.xlu0 %1768 }
 0x339   : > { %4546 = vmatmul.mubr.msk.bf16.vlgmr.msra.gmra.mxu0 %vm1645_vm1, %v1769_v51 }
 0x33a   : > { %4559 = vmatprep.mubr.msk.bf16.mxu0 %vm5469_vm0, %v5468_v22 }
 0x386   : > { %v1686_v52 = vpop.f32.mrf.mxu0 }
 0x387   : > { %v1693_v54 = vmul.f32 0.17677669, %v1686_v52 }
 0x388   : > { %v4535_v55 = vpop.f32.mrf.mxu0 }
 0x389   : > { %v1695_v56 = vadd.f32 %v1693_v54, %v6254_v53 }
 0x38a   : > { %v1689_v57 = vpop.f32.mrf.mxu0 }
 0x38b   : > { %v1694_v59 = vmul.f32 0.17677669, %v1689_v57  ;;  %v1698_v60 = vsel %vm1697_vm2, %v1695_v56, -inf }
 0x38c   : > { %1699 = vmax.xlane.f32.xlu1 %v1698_v60  ;;  %v4536_v61 = vpop.f32.mrf.mxu0 }
 0x38d   : > { %v1696_v62 = vadd.f32 %v1694_v59, %v6260_v58 }
 0x38f   : > { %v1701_v63 = vsel %vm1697_vm2, %v1696_v62, -inf }
 0x390   : > { %1702 = vmax.xlane.f32.xlu1 %v1701_v63 }
 0x3f9   : > { %v1813_v0 = vpop.f32.mrf.mxu0 }
 0x3fa   : > { %v1820_v1 = vmul.f32 0.17677669, %v1813_v0 }
 0x3fb   : > { %v4547_v2 = vpop.f32.mrf.mxu0 }
 0x3fc   : > { %v1822_v3 = vadd.f32 %v1820_v1, %v6254_v53  ;;  %v4875_v1 = vld [vmem:[%s6136_s28 + $0x8] sm:$0xff]  }
 0x3fd   : > { %v1816_v5 = vpop.f32.mrf.mxu0 }
 0x3fe   : > { %v1821_v6 = vmul.f32 0.17677669, %v1816_v5  ;;  %v1824_v7 = vsel %vm1697_vm2, %v1822_v3, -inf  ;;  %v4878_v5 = vld [vmem:[%s6136_s28 + $0x10] sm:$0xff]  }
 0x3ff   : > { %1825 = vmax.xlane.f32.xlu0 %v1824_v7  ;;  %v4548_v8 = vpop.f32.mrf.mxu0 }
 0x400   : > { %v1823_v9 = vadd.f32 %v1821_v6, %v6260_v58 }
 0x402   : > { %v1827_v10 = vsel %vm1697_vm2, %v1823_v9, -inf }
 0x403   : > { %1828 = vmax.xlane.f32.xlu1 %v1827_v10 }
 0x415   : > { %v1700_v11 = vpop.xlane.xlu1 %1699  ;;  %2010 = vrot.lane.b32.xlu0 %v6213_v37, %s5471_s21 }
 0x416   : > { %v1704_v12 = vsub.f32 %v1695_v56, %v1700_v11  ;;  %v4877_v56 = vld [vmem:[%s6136_s28 + $0x18] sm:$0xff]  }
 0x417   : > { %4556 = vmatpush3.bf16.msra.mxu0 %v4877_v56 }
 0x418   : > { %v1706_v13 = vmul.f32 1.442695, %v1704_v12  ;;  %4557 = vmatprep.subr.bf16.mxu0 %v5468_v22 }
 0x419   : > { %v1703_v14 = vpop.xlane.xlu1 %1702 }
 0x41a   : > { %4939 = vpow2.f32 %v1706_v13  ;;  %v1705_v15 = vsub.f32 %v1696_v62, %v1703_v14 }
 0x41b   : > { %4558 = vmatpush3.bf16.msra.mxu0 %v4878_v5  ;;  %v4880_v5 = vld [vmem:[%s6136_s28 + $0x20] sm:$0xff]  }
 0x41c   : > { %v1708_v16 = vmul.f32 1.442695, %v1705_v15  ;;  %4571 = vmatprep.subr.bf16.mxu0 %v5468_v22 }
 0x41e   : > { %4941 = vpow2.f32 %v1708_v16 }
 0x427   : > { %v4940_v32 = vpop.eup %4939 }
 0x428   : > { %v1710_v34 = vsel %vm1697_vm2, %v4940_v32, 0.0 }
 0x429   : > { %1711 = vadd.xlane.f32.xlu1 %v1710_v34 }
 0x42b   : > { %v4942_v35 = vpop.eup %4941 }
 0x42c   : > { %v1713_v36 = vsel %vm1697_vm2, %v4942_v35, 0.0 }
 0x42d   : > { %1714 = vadd.xlane.f32.xlu1 %v1713_v36 }
 0x488   : > { %v1826_v27 = vpop.xlane.xlu0 %1825 }
 0x489   : > { %v1830_v38 = vsub.f32 %v1822_v3, %v1826_v27  ;;  %v4876_v3 = vld [vmem:[%s6136_s28] sm:$0xff]  }
 0x48b   : > { %v1832_v39 = vmul.f32 1.442695, %v1830_v38 }
 0x48c   : > { %v1829_v41 = vpop.xlane.xlu1 %1828  ;;  %v2011_v13 = vpop.permute.xlu0 %2010 }
 0x48d   : > { %4943 = vpow2.f32 %v1832_v39  ;;  %v1831_v42 = vsub.f32 %v1823_v9, %v1829_v41  ;;  %v2016_v17 = vsel %vm1645_vm1, %v2011_v13, 0 }
 0x48f   : > { %v1834_v43 = vmul.f32 1.442695, %v1831_v42 }
 0x491   : > { %4945 = vpow2.f32 %v1834_v43 }
 0x49a   : > { %v4944_v44 = vpop.eup %4943 }
 0x49b   : > { %v1836_v45 = vsel %vm1697_vm2, %v4944_v44, 0.0 }
 0x49c   : > { %1837 = vadd.xlane.f32.xlu1 %v1836_v45 }
 0x49e   : > { %v4946_v46 = vpop.eup %4945 }
 0x49f   : > { %v1839_v47 = vsel %vm1697_vm2, %v4946_v46, 0.0 }
 0x4a0   : > { %1840 = vadd.xlane.f32.xlu1 %v1839_v47 }
 0x4b1   : > { %1848 = vrot.lane.b32.xlu1 %v6273_v33, %s5470_s16 }
 0x4b2   : > { %v1712_v48 = vpop.xlane.xlu1 %1711 }
 0x4b3   : > { %4947 = vrcp.f32 %v1712_v48 }
 0x4b5   : > { %2008 = vrot.lane.b32.xlu1 %v6219_v40, %s5471_s21 }
 0x4b6   : > { %v1715_v49 = vpop.xlane.xlu1 %1714 }
 0x4b7   : > { %4949 = vrcp.f32 %v1715_v49 }
 0x4c0   : > { %v4948_v50 = vpop.eup %4947 }
 0x4c1   : > { %v1718_v52 = vmul.f32 %v4948_v50, %v4940_v32 }
 0x4c4   : > { %v4950_v51 = vpop.eup %4949 }
 0x4c5   : > { %v1719_v54 = vmul.f32 %v4950_v51, %v4942_v35 }
 0x4c7   : > { %v1720_v55 = vpack.c.bf16 %v1719_v54, %v1718_v52 }
 0x4c9   : > { %4540 = vmatmul.mubr.msk.bf16.vlgmr.msra.gmra.mxu1 %vm1697_vm2, %v1720_v55 }
 0x4ca   : > { %4551 = vmatprep.mubr.msk.bf16.mxu1 %vm5469_vm0, %v5468_v22 }
 0x525   : > { %v1838_v57 = vpop.xlane.xlu1 %1837 }
 0x526   : > { %4951 = vrcp.f32 %v1838_v57 }
 0x529   : > { %v1841_v59 = vpop.xlane.xlu1 %1840 }
 0x52a   : > { %4953 = vrcp.f32 %v1841_v59 }
 0x52d   : > { %v1849_v60 = vpop.permute.xlu1 %1848 }
 0x52e   : > { %4550 = vmatpush3.bf16.msra.mxu1 %v1849_v60 }
 0x52f   : > { %4563 = vmatprep.subr.bf16.mxu1 %v5468_v22 }
 0x531   : > { %v2009_v18 = vpop.permute.xlu1 %2008 }
 0x533   : > { %v4952_v61 = vpop.eup %4951 }
 0x534   : > { %v1844_v63 = vmul.f32 %v4952_v61, %v4944_v44 }
 0x537   : > { %v4954_v62 = vpop.eup %4953 }
 0x538   : > { %v1845_v0 = vmul.f32 %v4954_v62, %v4946_v46 }
 0x53a   : > { %v1846_v2 = vpack.c.bf16 %v1845_v0, %v1844_v63 }
 0x53c   : > { %4552 = vmatmul.mubr.msk.bf16.vlgmr.msra.gmra.mxu1 %vm1697_vm2, %v1846_v2 }
 0x53d   : > { %4564 = vmatpush3.bf16.msra.mxu1 %v4875_v1  ;;  %4567 = vmatprep.mubr.msk.bf16.mxu1 %vm5469_vm0, %v5468_v22 }
 0x53e   : > { %4565 = vmatprep.subr.bf16.mxu1 %v5468_v22 }
 0x541   : > { %4566 = vmatpush3.bf16.msra.mxu1 %v4876_v3 }
 0x542   : > { %4577 = vmatprep.subr.bf16.mxu1 %v5468_v22 }
 0x589   : > { %v1759_v6 = vpop.f32.mrf.mxu1 }
 0x58b   : > { %v4541_v7 = vpop.f32.mrf.mxu1 }
 0x58d   : > { %v1762_v8 = vpop.f32.mrf.mxu1 }
 0x58e   : > { %v1766_v9 = vpack.c.bf16 %v1762_v8, %v1759_v6 }
 0x58f   : > { %v4542_v10 = vpop.f32.mrf.mxu1 }
 0x590   : > { %4568 = vmatmul.mubr.msk.bf16.vlgmr.msra.gmra.mxu1 %vm1645_vm1, %v1766_v9 }
 0x591   : > { %4579 = vmatprep.mubr.msk.bf16.mxu1 %vm5469_vm0, %v5468_v22 }
 0x5fc   : > { %v1888_v11 = vpop.f32.mrf.mxu1 }
 0x5fe   : > { %v4553_v12 = vpop.f32.mrf.mxu1 }
 0x600   : > { %v1891_v14 = vpop.f32.mrf.mxu1 }
 0x601   : > { %v1895_v15 = vpack.c.bf16 %v1891_v14, %v1888_v11 }
 0x602   : > { %v4554_v16 = vpop.f32.mrf.mxu1 }
 0x603   : > { %4560 = vmatmul.mubr.msk.bf16.vlgmr.msra.gmra.mxu0 %vm1645_vm1, %v1895_v15 }
 0x604   : > { %4572 = vmatpush3.bf16.xpose.msra.mxu0 %v2016_v17  ;;  %4573 = vmatprep.mubr.msk.bf16.mxu0 %vm5469_vm0, %v5468_v22 }
 0x605   : > { %4583 = vmatprep.subr.bf16.mxu0 %v5468_v22 }
 0x60b   : > { %4574 = vmatmul.mubr.msk.bf16.vlgmr.msra.gmra.mxu0 %vm1645_vm1, %v2009_v18 }
 0x60c   : > { %4587 = vmatprep.mubr.msk.bf16.mxu0 %vm5469_vm0, %v5468_v22 }
 0x650   : > { %v6311_v21 = vpop.f32.mrf.mxu1 }
 0x652   : > { %v4569_v23 = vpop.f32.mrf.mxu1 }
 0x654   : > { %v6313_v26 = vpop.f32.mrf.mxu1 }
 0x656   : > { %v4570_v28 = vpop.f32.mrf.mxu1 }
 0x6c3   : > { %v6315_v30 = vpop.f32.mrf.mxu0 }
 0x6c5   : > { %v4561_v31 = vpop.f32.mrf.mxu0 }
 0x6c7   : > { %v6317_v32 = vpop.f32.mrf.mxu0 }
 0x6c9   : > { %v4562_v34 = vpop.f32.mrf.mxu0 }
 0x6cb   : > { %v2052_v35 = vpop.f32.mrf.mxu0 }
 0x6cc   : > { %v2059_v36 = vmul.f32 0.17677669, %v2052_v35 }
 0x6cd   : > { %v4575_v27 = vpop.f32.mrf.mxu0 }
 0x6ce   : > { %v2061_v38 = vadd.f32 %v2059_v36, %v6254_v53 }
 0x6cf   : > { %v2055_v39 = vpop.f32.mrf.mxu0 }
 0x6d0   : > { %v2060_v41 = vmul.f32 0.17677669, %v2055_v39  ;;  %v2063_v42 = vsel %vm1697_vm2, %v2061_v38, -inf }
 0x6d1   : > { %2064 = vmax.xlane.f32.xlu1 %v2063_v42  ;;  %v4576_v43 = vpop.f32.mrf.mxu0 }
 0x6d2   : > { %v2062_v44 = vadd.f32 %v2060_v41, %v6260_v58 }
 0x6d4   : > { %v2066_v45 = vsel %vm1697_vm2, %v2062_v44, -inf }
 0x6d5   : > { %2067 = vmax.xlane.f32.xlu0 %v2066_v45 }
 0x6eb   : > { %2086 = vrot.lane.b32.xlu0 %v6273_v33, %s5471_s21 }
 0x75a   : > { %v2065_v46 = vpop.xlane.xlu1 %2064 }
 0x75b   : > { %v2069_v47 = vsub.f32 %v2061_v38, %v2065_v46  ;;  %v2005_v46 = vadd.f32 %v6313_v26, %v6317_v32  ;;  %v4881_v26 = vld [vmem:[%s6136_s28 + $0x38] sm:$0xff]  }
 0x75d   : > { %v2071_v48 = vmul.f32 1.442695, %v2069_v47 }
 0x75e   : > { %v2068_v49 = vpop.xlane.xlu0 %2067 }
 0x75f   : > { %4955 = vpow2.f32 %v2071_v48  ;;  %v2070_v50 = vsub.f32 %v2062_v44, %v2068_v49 }
 0x761   : > { %v2073_v51 = vmul.f32 1.442695, %v2070_v50 }
 0x762   : > { %v2087_v52 = vpop.permute.xlu0 %2086 }
 0x763   : > { %4957 = vpow2.f32 %v2073_v51  ;;  %4578 = vmatpush3.bf16.msra.mxu1 %v2087_v52 }
 0x764   : > { %4591 = vmatprep.subr.bf16.mxu1 %v5468_v22 }
 0x76c   : > { %v4956_v54 = vpop.eup %4955 }
 0x76d   : > { %v2075_v55 = vsel %vm1697_vm2, %v4956_v54, 0.0 }
 0x76e   : > { %2076 = vadd.xlane.f32.xlu1 %v2075_v55 }
 0x770   : > { %v4958_v56 = vpop.eup %4957 }
 0x771   : > { %v2078_v57 = vsel %vm1697_vm2, %v4958_v56, 0.0 }
 0x772   : > { %2079 = vadd.xlane.f32.xlu1 %v2078_v57 }
 0x783   : > { %2194 = vrot.lane.b32.xlu1 %v6213_v37, %s5472_s17 }
 0x787   : > { %2192 = vrot.lane.b32.xlu1 %v6219_v40, %s5472_s17  ;;  %v4879_v40 = vld [vmem:[%s6136_s28 + $0x28] sm:$0xff]  }
 0x788   : > { %4584 = vmatpush3.bf16.msra.mxu0 %v4879_v40 }
 0x789   : > { %4585 = vmatprep.subr.bf16.mxu0 %v5468_v22 }
 0x78c   : > { %4586 = vmatpush3.bf16.msra.mxu0 %v4880_v5 }
 0x78d   : > { %4597 = vmatprep.subr.bf16.mxu0 %v5468_v22 }
 0x7f7   : > { %v2077_v59 = vpop.xlane.xlu1 %2076 }
 0x7f8   : > { %4959 = vrcp.f32 %v2077_v59 }
 0x7fb   : > { %v2080_v60 = vpop.xlane.xlu1 %2079 }
 0x7fc   : > { %4961 = vrcp.f32 %v2080_v60 }
 0x7ff   : > { %v2195_v1 = vpop.permute.xlu1 %2194 }
 0x800   : > { %v2200_v3 = vsel %vm1645_vm1, %v2195_v1, 0 }
 0x803   : > { %v2193_v37 = vpop.permute.xlu1 %2192 }
 0x805   : > { %v4960_v61 = vpop.eup %4959 }
 0x806   : > { %v2083_v63 = vmul.f32 %v4960_v61, %v4956_v54 }
 0x809   : > { %v4962_v62 = vpop.eup %4961 }
 0x80a   : > { %v2084_v0 = vmul.f32 %v4962_v62, %v4958_v56  ;;  %v4321_v62 = vld [vmem:[%s1337_s1] ss:$0 sm:$0xff] }
 0x80c   : > { %v2085_v2 = vpack.c.bf16 %v2084_v0, %v2083_v63 }
 0x80e   : > { %4580 = vmatmul.mubr.msk.bf16.vlgmr.msra.gmra.mxu1 %vm1697_vm2, %v2085_v2 }
 0x80f   : > { %4592 = vmatpush3.bf16.xpose.msra.mxu1 %v2200_v3  ;;  %4593 = vmatprep.mubr.msk.bf16.mxu1 %vm5469_vm0, %v5468_v22 }
 0x810   : > { %4603 = vmatprep.subr.bf16.mxu1 %v5468_v22 }
 0x816   : > { %4594 = vmatmul.mubr.msk.bf16.vlgmr.msra.gmra.mxu1 %vm1645_vm1, %v2193_v37 }
 0x817   : > { %4607 = vmatprep.mubr.msk.bf16.mxu1 %vm5469_vm0, %v5468_v22  ;;  %4604 = vmatpush3.bf16.msra.mxu1 %v4881_v26 }
 0x818   : > { %4605 = vmatprep.subr.bf16.mxu1 %v5468_v22 }
 0x8ce   : > { %v2126_v6 = vpop.f32.mrf.mxu1 }
 0x8d0   : > { %v4581_v7 = vpop.f32.mrf.mxu1 }
 0x8d1   : > { %v4883_v7 = vld [vmem:[%s6156_s29 + $0x70] ss:$8 sps:$4 sm:$0xff]  }
 0x8d2   : > { %v2129_v8 = vpop.f32.mrf.mxu1 }
 0x8d3   : > { %v2133_v9 = vpack.c.bf16 %v2129_v8, %v2126_v6  ;;  %v4885_v8 = vld [vmem:[%s6156_s29 + $0x74] ss:$8 sps:$4 sm:$0xff]  }
 0x8d4   : > { %v4582_v10 = vpop.f32.mrf.mxu1 }
 0x8d5   : > { %4588 = vmatmul.mubr.msk.bf16.vlgmr.msra.gmra.mxu0 %vm1645_vm1, %v2133_v9  ;;  %v4888_v9 = vld [vmem:[%s6156_s29 + $0x64] ss:$8 sps:$4 sm:$0xff]  }
 0x8d6   : > { %v2236_v11 = vpop.f32.mrf.mxu1  ;;  %4599 = vmatprep.mubr.msk.bf16.mxu0 %vm5469_vm0, %v5468_v22  ;;  %v4895_v10 = vld [vmem:[%s6080_s12 + $0x38] sm:$0xff]  }
 0x8d7   : > { %v2243_v12 = vmul.f32 0.17677669, %v2236_v11  ;;  %v4886_v11 = vld [vmem:[%s6156_s29 + $0x60] ss:$8 sps:$4 sm:$0xff]  }
 0x8d8   : > { %v4595_v13 = vpop.f32.mrf.mxu1 }
 0x8d9   : > { %v2245_v14 = vadd.f32 %v2243_v12, %v6254_v53  ;;  %v4891_v12 = vld [vmem:[%s6156_s29 + $0x54] ss:$8 sps:$4 sm:$0xff]   ;;  %v4892_v13 = vld [vmem:[%s6156_s29 + $0x40] ss:$8 sps:$4 sm:$0xff]  }
 0x8da   : > { %v2239_v15 = vpop.f32.mrf.mxu1 }
 0x8db   : > { %v2244_v16 = vmul.f32 0.17677669, %v2239_v15  ;;  %v2247_v17 = vsel %vm1697_vm2, %v2245_v14, -inf }
 0x8dc   : > { %2248 = vmax.xlane.f32.xlu0 %v2247_v17  ;;  %v4596_v18 = vpop.f32.mrf.mxu1 }
 0x8dd   : > { %v2246_v23 = vadd.f32 %v2244_v16, %v6260_v58 }
 0x8df   : > { %v2250_v28 = vsel %vm1697_vm2, %v2246_v23, -inf }
 0x8e0   : > { %2251 = vmax.xlane.f32.xlu1 %v2250_v28 }
 0x8f1   : > { %2270 = vrot.lane.b32.xlu1 %v6273_v33, %s5472_s17  ;;  %v2002_v33 = vadd.f32 %v6311_v21, %v6315_v30  ;;  %v4882_v30 = vld [vmem:[%s6136_s28 + $0x30] sm:$0xff]  }
 0x8f2   : > { %4606 = vmatpush3.bf16.msra.mxu1 %v4882_v30 }
 0x8f3   : > { %2649 = vmatprep.subr.bf16.mxu1 %v4885_v8 }
 0x965   : > { %v2249_v31 = vpop.xlane.xlu0 %2248 }
 0x966   : > { %v2253_v34 = vsub.f32 %v2245_v14, %v2249_v31 }
 0x968   : > { %v2255_v35 = vmul.f32 1.442695, %v2253_v34  ;;  %v4898_v34 = vld [vmem:[%s6156_s29 + $0x34] ss:$8 sps:$4 sm:$0xff]  }
 0x969   : > { %v2252_v36 = vpop.xlane.xlu1 %2251 }
 0x96a   : > { %4963 = vpow2.f32 %v2255_v35  ;;  %v2254_v53 = vsub.f32 %v2246_v23, %v2252_v36  ;;  %v4896_v35 = vld [vmem:[%s6156_s29 + $0x30] ss:$8 sps:$4 sm:$0xff]   ;;  %v4899_v36 = vld [vmem:[%s6080_s12 + $0x30] sm:$0xff]  }
 0x96c   : > { %v2257_v27 = vmul.f32 1.442695, %v2254_v53  ;;  %v4902_v53 = vld [vmem:[%s6156_s29 + $0x24] ss:$8 sps:$4 sm:$0xff]  }
 0x96d   : > { %v2271_v38 = vpop.permute.xlu1 %2270 }
 0x96e   : > { %4965 = vpow2.f32 %v2257_v27  ;;  %4598 = vmatpush3.bf16.msra.mxu0 %v2271_v38  ;;  %v4900_v27 = vld [vmem:[%s6156_s29 + $0x20] ss:$8 sps:$4 sm:$0xff]  }
 0x96f   : > { %4611 = vmatprep.subr.bf16.mxu0 %v5468_v22  ;;  %v4903_v38 = vld [vmem:[%s6080_s12 + $0x28] sm:$0xff]  }
 0x977   : > { %v4964_v39 = vpop.eup %4963 }
 0x978   : > { %v2259_v58 = vsel %vm1697_vm2, %v4964_v39, 0.0 }
 0x979   : > { %2260 = vadd.xlane.f32.xlu0 %v2259_v58  ;;  %v4904_v58 = vld [vmem:[%s6156_s29 + $0x10] ss:$8 sps:$4 sm:$0xff]  }
 0x97b   : > { %v4966_v41 = vpop.eup %4965 }
 0x97c   : > { %v2262_v42 = vsel %vm1697_vm2, %v4966_v41, 0.0 }
 0x97d   : > { %2263 = vadd.xlane.f32.xlu0 %v2262_v42  ;;  %v4910_v42 = vld [vmem:[%s6156_s29 + $0x4] ss:$8 sps:$4 sm:$0xff]  }
 0x995   : > { %v2183_v43 = vpop.f32.mrf.mxu0 }
 0x996   : > { %v2190_v44 = vadd.f32 %v2183_v43, %v2002_v33  ;;  %v4908_v33 = vld [vmem:[%s6156_s29] ss:$8 sps:$4 sm:$0xff]  }
 0x997   : > { %v4589_v45 = vpop.f32.mrf.mxu0  ;;  %v1358_v43 = vld [vmem:[%s6777_s11] sm:$0xff] }
 0x998   : > { %v4911_v45 = vld [vmem:[%s6080_s12 + $0x18] sm:$0xff]  }
 0x999   : > { %v2186_v47 = vpop.f32.mrf.mxu0 }
 0x99a   : > { %v2191_v48 = vadd.f32 %v2186_v47, %v2005_v46  ;;  %v4912_v47 = vld [vmem:[%s6080_s12 + $0x10] sm:$0xff]  }
 0x99b   : > { %v4590_v49 = vpop.f32.mrf.mxu0 }
 0x99c   : > { %v4914_v49 = vld [vmem:[%s6080_s12] sm:$0xff]  }
 0xa02   : > { %v2261_v50 = vpop.xlane.xlu0 %2260 }
 0xa03   : > { %4967 = vrcp.f32 %v2261_v50 }
 0xa06   : > { %v2264_v51 = vpop.xlane.xlu0 %2263 }
 0xa07   : > { %4969 = vrcp.f32 %v2264_v51 }
 0xa10   : > { %v4968_v52 = vpop.eup %4967 }
 0xa11   : > { %v2267_v55 = vmul.f32 %v4968_v52, %v4964_v39  ;;  %v4906_v39 = vld [vmem:[%s6156_s29 + $0x14] ss:$8 sps:$4 sm:$0xff]  }
 0xa14   : > { %v4970_v54 = vpop.eup %4969 }
 0xa15   : > { %v2268_v56 = vmul.f32 %v4970_v54, %v4966_v41  ;;  %v4907_v41 = vld [vmem:[%s6080_s12 + $0x20] sm:$0xff]  }
 0xa17   : > { %v2269_v21 = vpack.c.bf16 %v2268_v56, %v2267_v55 }
 0xa19   : > { %4600 = vmatmul.mubr.msk.bf16.vlgmr.msra.gmra.mxu0 %vm1697_vm2, %v2269_v21 }
 0xa1a   : > { %4627 = vmatprep.mubr.msk.bf16.mxu0 %vm5469_vm0, %v5468_v22  ;;  %4612 = vmatpush3.bf16.msra.mxu0 %v4895_v10 }
 0xa1b   : > { %4613 = vmatprep.subr.bf16.mxu0 %v5468_v22 }
 0xa1e   : > { %4614 = vmatpush3.bf16.msra.mxu0 %v4899_v36 }
 0xa1f   : > { %4615 = vmatprep.subr.bf16.mxu0 %v5468_v22 }
 0xa22   : > { %4616 = vmatpush3.bf16.msra.mxu0 %v4903_v38 }
 0xa23   : > { %4617 = vmatprep.subr.bf16.mxu0 %v5468_v22 }
 0xa26   : > { %4618 = vmatpush3.bf16.msra.mxu0 %v4907_v41 }
 0xa27   : > { %4619 = vmatprep.subr.bf16.mxu0 %v5468_v22 }
 0xa2a   : > { %4620 = vmatpush3.bf16.msra.mxu0 %v4911_v45 }
 0xa2b   : > { %4621 = vmatprep.subr.bf16.mxu0 %v5468_v22 }
 0xa2e   : > { %4622 = vmatpush3.bf16.msra.mxu0 %v4912_v47 }
 0xa2f   : > { %4623 = vmatprep.subr.bf16.mxu0 %v5468_v22 }
 0xad9   : > { %v2310_v32 = vpop.f32.mrf.mxu0 }
 0xadb   : > { %v4601_v57 = vpop.f32.mrf.mxu0 }
 0xadd   : > { %v2313_v59 = vpop.f32.mrf.mxu0 }
 0xade   : > { %v2317_v60 = vpack.c.bf16 %v2313_v59, %v2310_v32 }
 0xadf   : > { %v4602_v61 = vpop.f32.mrf.mxu0 }
 0xae0   : > { %4608 = vmatmul.mubr.msk.bf16.vlgmr.msra.gmra.mxu1 %vm1645_vm1, %v2317_v60 }
 0xae1   : > { %2681 = vmatprep.mubr.bf16.mxu1 %v5467_v4  ;;  %2650 = vmatpush1.bf16.msra.mxu1 %v4883_v7 }
 0xae2   : > { %2651 = vmatprep.subr.bf16.mxu1 %v4888_v9 }
 0xae5   : > { %2652 = vmatpush1.bf16.msra.mxu1 %v4886_v11 }
 0xae6   : > { %2653 = vmatprep.subr.bf16.mxu1 %v4891_v12 }
 0xba0   : > { %v2367_v63 = vpop.f32.mrf.mxu1 }
 0xba1   : > { %v2374_v0 = vadd.f32 %v2367_v63, %v2190_v44  ;;  %v1359_v44 = vld [vmem:[%s6777_s11 + $0x8] sm:$0xff] }
 0xba2   : > { %v4609_v1 = vpop.f32.mrf.mxu1  ;;  %v2556_v46 = vpack.c.bf16 %v1359_v44, %v1358_v43 }
 0xba3   : > { %v2382_v2 = vadd.f32 %v4321_v62, %v2374_v0  ;;  %v2557_v1 = vld [vmem:[%s6162_s4] sm:$0x3]  ;;  %s6780_s4 = scalar_lea.vmem [#allocation8], %s6062_s13 }
 0xba4   : > { %v2370_v3 = vpop.f32.mrf.mxu1 }
 0xba5   : > { %v2375_v37 = vadd.f32 %v2370_v3, %v2191_v48  ;;  %v2386_v40 = vadd.f32 %v2382_v2, %v6188_v19  ;;  %v4889_v19 = vld [vmem:[%s6156_s29 + $0x50] ss:$8 sps:$4 sm:$0xff]   ;;  %v4913_v48 = vld [vmem:[%s6080_s12 + $0x8] sm:$0xff]   ;;  %s6779_s12 = scalar_lea.vmem [#allocation5], %s6062_s13  ;;  %v2562_v2 = vrot.slane %v2557_v1, %v1401_v29 }
 0xba6   : > { %v4610_v5 = vpop.f32.mrf.mxu1  ;;  %2654 = vmatpush1.bf16.msra.mxu1 %v4889_v19  ;;  %4624 = vmatpush3.bf16.msra.mxu0 %v4913_v48  ;;  %v4323_v60 = vld [vmem:[%s6779_s12] ss:$0 sm:$0xff] }
 0xba7   : > { %v2383_v6 = vadd.f32 %v4321_v62, %v2375_v37  ;;  %2388 = vadd.xlane.f32.xlu0 %v2386_v40  ;;  %4625 = vmatprep.subr.bf16.mxu0 %v5468_v22  ;;  %v2566_v37 = vrot.slane %v2557_v1, %v1405_v25  ;;  %v4324_v25 = vld [vmem:[%s6780_s4] ss:$0 sm:$0xff] }
 0xba9   : > { %v2387_v4 = vadd.f32 %v2383_v6, %v6190_v20  ;;  %v4894_v20 = vld [vmem:[%s6156_s29 + $0x44] ss:$8 sps:$4 sm:$0xff]   ;;  %s6778_s29 = scalar_lea.vmem [#allocation3], %s6062_s13 }
 0xbaa   : > { %2655 = vmatprep.subr.bf16.mxu1 %v4894_v20  ;;  %4626 = vmatpush3.bf16.msra.mxu0 %v4914_v49  ;;  %v4322_v30 = vld [vmem:[%s6778_s29] ss:$0 sm:$0xff] }
 0xbab   : > { %2390 = vadd.xlane.f32.xlu0 %v2387_v4  ;;  %2656 = vmatpush1.bf16.msra.mxu1 %v4892_v13 }
 0xbac   : > { %2657 = vmatprep.subr.bf16.mxu1 %v4898_v34  ;;  %4631 = vmatprep.subr.bf16.mxu0 %v5468_v22 }
 0xbaf   : > { %2658 = vmatpush1.bf16.msra.mxu1 %v4896_v35 }
 0xbb0   : > { %2659 = vmatprep.subr.bf16.mxu1 %v4902_v53  ;;  %v6468_v53 = vld [vmem:[%s6782_s25 + $0x8] sm:$0xff] }
 0xbb3   : > { %2660 = vmatpush1.bf16.msra.mxu1 %v4900_v27 }
 0xbb4   : > { %2661 = vmatprep.subr.bf16.mxu1 %v4906_v39 }
 0xbb7   : > { %2662 = vmatpush1.bf16.msra.mxu1 %v4904_v58 }
 0xbb8   : > { %2663 = vmatprep.subr.bf16.mxu1 %v4910_v42 }
 0xbbb   : > { %2664 = vmatpush1.bf16.msra.mxu1 %v4908_v33 }
 0xbbc   : > { %4637 = vmatprep.subr.bf16.mxu1 %v5468_v22 }
 0xbbe   : > { %2682 = vmatmul.mubr.bf16.vlgmr.msra.gmra.mxu1 %v2556_v46 }
 0xbbf   : > { %4639 = vmatprep.mubr.msk.bf16.mxu1 %vm5469_vm0, %v5468_v22 }
 0xc30   : > { %v2389_v14 = vpop.xlane.xlu0 %2388 }
 0xc31   : > { %v2393_v15 = vmul.f32 0.0078125, %v2389_v14 }
 0xc33   : > { %v2395_v16 = vsub.f32 %v2386_v40, %v2393_v15 }
 0xc34   : > { %v2391_v17 = vpop.xlane.xlu0 %2390 }
 0xc35   : > { %v2394_v18 = vmul.f32 0.0078125, %v2391_v17  ;;  %v2397_v23 = vmul.f32 %v2395_v16, %v2395_v16 }
 0xc37   : > { %v2396_v28 = vsub.f32 %v2387_v4, %v2394_v18  ;;  %2399 = vadd.xlane.f32.xlu0 %v2397_v23 }
 0xc39   : > { %v2398_v31 = vmul.f32 %v2396_v28, %v2396_v28 }
 0xc3b   : > { %2401 = vadd.xlane.f32.xlu0 %v2398_v31 }
 0xc7e   : > { %v2683_v3 = vpop.f32.mrf.mxu1 }
 0xc7f   : > { %v2684_v5 = vadd.f32 %v2683_v3, %v2562_v2 }
 0xc80   : > { %v2685_v40 = vpop.f32.mrf.mxu1 }
 0xc81   : > { %v2686_v4 = vadd.f32 %v2685_v40, %v2566_v37 }
 0xc82   : > { %v2687_v6 = vpop.f32.mrf.mxu1 }
 0xc83   : > { %v2688_v7 = vadd.f32 %v2687_v6, %v2562_v2 }
 0xc84   : > { %v2689_v8 = vpop.f32.mrf.mxu1 }
 0xc85   : > { %v6433_v9 = vpack.c.bf16 %v2688_v7, %v2684_v5  ;;  %v2690_v10 = vadd.f32 %v2689_v8, %v2566_v37 }
 0xc87   : > { %v6435_v11 = vpack.c.bf16 %v2690_v10, %v2686_v4  ;;  %2835 = vrot.lane.b32.xlu1 %v6433_v9, %s5470_s16  ;;  %v2715_v29 = vsel %vm1645_vm1, %v6433_v9, 0 }
 0xc89   : > { %4638 = vmatpush3.bf16.msra.mxu1 %v6435_v11 }
 0xc8a   : > { %4649 = vmatprep.subr.bf16.mxu1 %v5468_v22 }
 0xcc0   : > { %v2400_v50 = vpop.xlane.xlu0 %2399 }
 0xcc1   : > { %v2403_v51 = vmul.f32 0.0078125, %v2400_v50 }
 0xcc3   : > { %v2405_v52 = vadd.f32 1e-05, %v2403_v51 }
 0xcc4   : > { %v2402_v54 = vpop.xlane.xlu0 %2401 }
 0xcc5   : > { %4971 = vrsqrt.f32 %v2405_v52  ;;  %v2404_v55 = vmul.f32 0.0078125, %v2402_v54 }
 0xcc7   : > { %v2406_v56 = vadd.f32 1e-05, %v2404_v55 }
 0xcc9   : > { %4973 = vrsqrt.f32 %v2406_v56 }
 0xcd2   : > { %v4972_v21 = vpop.eup %4971 }
 0xcd3   : > { %v2409_v26 = vmul.f32 %v4972_v21, %v2395_v16 }
 0xcd5   : > { %v2417_v59 = vmul.f32 %v4322_v30, %v2409_v26 }
 0xcd6   : > { %v4974_v32 = vpop.eup %4973 }
 0xcd7   : > { %v2410_v57 = vmul.f32 %v4974_v32, %v2396_v28  ;;  %v6420_v62 = vadd.f32 %v4323_v60, %v2417_v59  ;;  %v6462_v28 = vld [vmem:[%s6781_s27] sm:$0xff] }
 0xcd9   : > { %v2418_v61 = vmul.f32 %v4322_v30, %v2410_v57 }
 0xcdb   : > { %v6422_v63 = vadd.f32 %v4323_v60, %v2418_v61 }
 0xcdd   : > { %v2443_v0 = vpack.c.bf16 %v6422_v63, %v6420_v62 }
 0xcdf   : > { %4628 = vmatmul.mubr.bf16.vlgmr.msra.gmra.mxu0 %v2443_v0 }
 0xce0   : > { %4633 = vmatprep.mubr.msk.bf16.mxu0 %vm5469_vm0, %v5468_v22  ;;  %4632 = vmatpush3.bf16.xpose.msra.mxu0 %v2715_v29 }
 0xce1   : > { %4643 = vmatprep.subr.bf16.mxu0 %v5468_v22 }
 0xcf9   : > { %v2836_v20 = vpop.permute.xlu1 %2835 }
 0xcfa   : > { %v2841_v17 = vsel %vm1645_vm1, %v2836_v20, 0 }
 0xd9f   : > { %v2533_v24 = vpop.f32.mrf.mxu0 }
 0xda0   : > { %v2534_v13 = vadd.f32 %v4324_v25, %v2533_v24 }
 0xda1   : > { %v4629_v12 = vpop.f32.mrf.mxu0 }
 0xda3   : > { %v2536_v19 = vpop.f32.mrf.mxu0 }
 0xda4   : > { %v2537_v14 = vadd.f32 %v4324_v25, %v2536_v19  ;;  %v4917_v25 = vld [vmem:[%s6088_s14 + $0x18] sm:$0xff]  }
 0xda5   : > { %v4630_v15 = vpop.f32.mrf.mxu0 }
 0xda6   : > { %v6446_v16 = vpack.c.bf16 %v2537_v14, %v2534_v13 }
 0xda8   : > { %2832 = vrot.lane.b32.xlu0 %v6446_v16, %s5470_s16  ;;  %4634 = vmatmul.mubr.msk.bf16.vlgmr.msra.gmra.mxu0 %vm1645_vm1, %v6446_v16 }
 0xda9   : > { %4644 = vmatpush3.bf16.xpose.msra.mxu0 %v2841_v17  ;;  %4645 = vmatprep.mubr.msk.bf16.mxu0 %vm5469_vm0, %v5468_v22 }
 0xdaa   : > { %4655 = vmatprep.subr.bf16.mxu0 %v5468_v22 }
 0xe1a   : > { %v2833_v18 = vpop.permute.xlu0 %2832 }
 0xe1b   : > { %4646 = vmatmul.mubr.msk.bf16.vlgmr.msra.gmra.mxu0 %vm1645_vm1, %v2833_v18  ;;  %v4915_v18 = vld [vmem:[%s6088_s14 + $0x8] sm:$0xff]  }
 0xe1c   : > { %4659 = vmatprep.mubr.msk.bf16.mxu0 %vm5469_vm0, %v5468_v22  ;;  %4656 = vmatpush3.bf16.msra.mxu0 %v4917_v25 }
 0xe1d   : > { %4657 = vmatprep.subr.bf16.mxu0 %v5468_v22 }
 0xe68   : > { %v2751_v23 = vpop.f32.mrf.mxu0 }
 0xe69   : > { %v2758_v31 = vmul.f32 0.17677669, %v2751_v23 }
 0xe6a   : > { %v4635_v34 = vpop.f32.mrf.mxu0 }
 0xe6b   : > { %v2760_v35 = vadd.f32 %v2758_v31, %v6462_v28  ;;  %v4916_v31 = vld [vmem:[%s6088_s14] sm:$0xff]   ;;  %v4918_v34 = vld [vmem:[%s6088_s14 + $0x10] sm:$0xff]  }
 0xe6c   : > { %v2754_v36 = vpop.f32.mrf.mxu0  ;;  %4658 = vmatpush3.bf16.msra.mxu0 %v4918_v34 }
 0xe6d   : > { %v2759_v27 = vmul.f32 0.17677669, %v2754_v36  ;;  %v2762_v38 = vsel %vm1697_vm2, %v2760_v35, -inf  ;;  %4671 = vmatprep.subr.bf16.mxu0 %v5468_v22 }
 0xe6e   : > { %2763 = vmax.xlane.f32.xlu1 %v2762_v38  ;;  %v4636_v39 = vpop.f32.mrf.mxu0 }
 0xe6f   : > { %v2761_v58 = vadd.f32 %v2759_v27, %v6468_v53 }
 0xe71   : > { %v2765_v41 = vsel %vm1697_vm2, %v2761_v58, -inf }
 0xe72   : > { %2766 = vmax.xlane.f32.xlu0 %v2765_v41 }
 0xedb   : > { %v2877_v42 = vpop.f32.mrf.mxu0 }
 0xedc   : > { %v2884_v33 = vmul.f32 0.17677669, %v2877_v42 }
 0xedd   : > { %v4647_v43 = vpop.f32.mrf.mxu0 }
 0xede   : > { %v2886_v44 = vadd.f32 %v2884_v33, %v6462_v28 }
 0xedf   : > { %v2880_v45 = vpop.f32.mrf.mxu0 }
 0xee0   : > { %v2885_v46 = vmul.f32 0.17677669, %v2880_v45  ;;  %v2888_v47 = vsel %vm1697_vm2, %v2886_v44, -inf }
 0xee1   : > { %2889 = vmax.xlane.f32.xlu1 %v2888_v47  ;;  %v4648_v48 = vpop.f32.mrf.mxu0 }
 0xee2   : > { %v2887_v49 = vadd.f32 %v2885_v46, %v6468_v53 }
 0xee4   : > { %v2891_v50 = vsel %vm1697_vm2, %v2887_v49, -inf }
 0xee5   : > { %2892 = vmax.xlane.f32.xlu1 %v2891_v50 }
 0xef7   : > { %v2764_v51 = vpop.xlane.xlu1 %2763 }
 0xef8   : > { %v2768_v52 = vsub.f32 %v2760_v35, %v2764_v51 }
 0xefa   : > { %v2770_v54 = vmul.f32 1.442695, %v2768_v52 }
 0xefb   : > { %v2767_v55 = vpop.xlane.xlu0 %2766 }
 0xefc   : > { %4975 = vpow2.f32 %v2770_v54  ;;  %v2769_v56 = vsub.f32 %v2761_v58, %v2767_v55 }
 0xefe   : > { %v2772_v21 = vmul.f32 1.442695, %v2769_v56 }
 0xf00   : > { %4977 = vpow2.f32 %v2772_v21 }
 0xf09   : > { %v4976_v26 = vpop.eup %4975 }
 0xf0a   : > { %v2774_v30 = vsel %vm1697_vm2, %v4976_v26, 0.0 }
 0xf0b   : > { %2775 = vadd.xlane.f32.xlu1 %v2774_v30 }
 0xf0d   : > { %v4978_v32 = vpop.eup %4977 }
 0xf0e   : > { %v2777_v57 = vsel %vm1697_vm2, %v4978_v32, 0.0 }
 0xf0f   : > { %2778 = vadd.xlane.f32.xlu1 %v2777_v57 }
 0xf6a   : > { %v2890_v59 = vpop.xlane.xlu1 %2889 }
 0xf6b   : > { %v2894_v60 = vsub.f32 %v2886_v44, %v2890_v59 }
 0xf6d   : > { %v2896_v61 = vmul.f32 1.442695, %v2894_v60 }
 0xf6e   : > { %v2893_v0 = vpop.xlane.xlu1 %2892 }
 0xf6f   : > { %4979 = vpow2.f32 %v2896_v61  ;;  %v2895_v1 = vsub.f32 %v2887_v49, %v2893_v0 }
 0xf71   : > { %v2898_v2 = vmul.f32 1.442695, %v2895_v1 }
 0xf73   : > { %4981 = vpow2.f32 %v2898_v2 }
 0xf7c   : > { %v4980_v3 = vpop.eup %4979 }
 0xf7d   : > { %v2900_v37 = vsel %vm1697_vm2, %v4980_v3, 0.0 }
 0xf7e   : > { %2901 = vadd.xlane.f32.xlu0 %v2900_v37 }
 0xf80   : > { %v4982_v40 = vpop.eup %4981 }
 0xf81   : > { %v2903_v5 = vsel %vm1697_vm2, %v4982_v40, 0.0 }
 0xf82   : > { %2904 = vadd.xlane.f32.xlu1 %v2903_v5 }
 0xf93   : > { %3074 = vrot.lane.b32.xlu1 %v6433_v9, %s5471_s21 }
 0xf94   : > { %2912 = vrot.lane.b32.xlu0 %v6435_v11, %s5470_s16  ;;  %v2776_v6 = vpop.xlane.xlu1 %2775  ;;  %s6783_s16 = scalar_lea.vmem [#allocation11], %s6062_s13 }
 0xf95   : > { %4983 = vrcp.f32 %v2776_v6 }
 0xf97   : > { %3072 = vrot.lane.b32.xlu1 %v6446_v16, %s5471_s21 }
 0xf98   : > { %v2779_v4 = vpop.xlane.xlu1 %2778 }
 0xf99   : > { %4985 = vrcp.f32 %v2779_v4 }
 0xfa2   : > { %v4984_v7 = vpop.eup %4983 }
 0xfa3   : > { %v2782_v10 = vmul.f32 %v4984_v7, %v4976_v26 }
 0xfa6   : > { %v4986_v8 = vpop.eup %4985 }
 0xfa7   : > { %v2783_v29 = vmul.f32 %v4986_v8, %v4978_v32 }
 0xfa9   : > { %v2784_v24 = vpack.c.bf16 %v2783_v29, %v2782_v10 }
 0xfab   : > { %4640 = vmatmul.mubr.msk.bf16.vlgmr.msra.gmra.mxu1 %vm1697_vm2, %v2784_v24 }
 0xfac   : > { %4651 = vmatprep.mubr.msk.bf16.mxu1 %vm5469_vm0, %v5468_v22 }
0x1007   : > { %v2902_v12 = vpop.xlane.xlu0 %2901 }
0x1008   : > { %4987 = vrcp.f32 %v2902_v12 }
0x100b   : > { %v2913_v19 = vpop.permute.xlu0 %2912  ;;  %v2905_v20 = vpop.xlane.xlu1 %2904 }
0x100c   : > { %4989 = vrcp.f32 %v2905_v20  ;;  %4650 = vmatpush3.bf16.msra.mxu1 %v2913_v19 }
0x100d   : > { %4663 = vmatprep.subr.bf16.mxu1 %v5468_v22 }
0x100f   : > { %v3075_v42 = vpop.permute.xlu1 %3074 }
0x1010   : > { %v3080_v45 = vsel %vm1645_vm1, %v3075_v42, 0 }
0x1013   : > { %v3073_v46 = vpop.permute.xlu1 %3072 }
0x1015   : > { %v4988_v13 = vpop.eup %4987 }
0x1016   : > { %v2908_v15 = vmul.f32 %v4988_v13, %v4980_v3 }
0x1019   : > { %v4990_v14 = vpop.eup %4989 }
0x101a   : > { %v2909_v17 = vmul.f32 %v4990_v14, %v4982_v40 }
0x101c   : > { %v2910_v23 = vpack.c.bf16 %v2909_v17, %v2908_v15  ;;  %v4919_v15 = vld [vmem:[%s6088_s14 + $0x28] sm:$0xff]   ;;  %v4920_v17 = vld [vmem:[%s6088_s14 + $0x20] sm:$0xff]  }
0x101e   : > { %4652 = vmatmul.mubr.msk.bf16.vlgmr.msra.gmra.mxu1 %vm1697_vm2, %v2910_v23 }
0x101f   : > { %4664 = vmatpush3.bf16.msra.mxu1 %v4915_v18  ;;  %4667 = vmatprep.mubr.msk.bf16.mxu1 %vm5469_vm0, %v5468_v22 }
0x1020   : > { %4665 = vmatprep.subr.bf16.mxu1 %v5468_v22 }
0x1023   : > { %4666 = vmatpush3.bf16.msra.mxu1 %v4916_v31 }
0x1024   : > { %4677 = vmatprep.subr.bf16.mxu1 %v5468_v22 }
0x106b   : > { %v2823_v35 = vpop.f32.mrf.mxu1 }
0x106d   : > { %v4641_v36 = vpop.f32.mrf.mxu1 }
0x106f   : > { %v2826_v27 = vpop.f32.mrf.mxu1 }
0x1070   : > { %v2830_v38 = vpack.c.bf16 %v2826_v27, %v2823_v35 }
0x1071   : > { %v4642_v39 = vpop.f32.mrf.mxu1 }
0x1072   : > { %4668 = vmatmul.mubr.msk.bf16.vlgmr.msra.gmra.mxu1 %vm1645_vm1, %v2830_v38 }
0x1073   : > { %4679 = vmatprep.mubr.msk.bf16.mxu1 %vm5469_vm0, %v5468_v22 }
0x10de   : > { %v2952_v58 = vpop.f32.mrf.mxu1 }
0x10e0   : > { %v4653_v41 = vpop.f32.mrf.mxu1 }
0x10e2   : > { %v2955_v33 = vpop.f32.mrf.mxu1 }
0x10e3   : > { %v2959_v43 = vpack.c.bf16 %v2955_v33, %v2952_v58 }
0x10e4   : > { %v4654_v44 = vpop.f32.mrf.mxu1 }
0x10e5   : > { %4660 = vmatmul.mubr.msk.bf16.vlgmr.msra.gmra.mxu0 %vm1645_vm1, %v2959_v43 }
0x10e6   : > { %4672 = vmatpush3.bf16.xpose.msra.mxu0 %v3080_v45  ;;  %4673 = vmatprep.mubr.msk.bf16.mxu0 %vm5469_vm0, %v5468_v22 }
0x10e7   : > { %4683 = vmatprep.subr.bf16.mxu0 %v5468_v22 }
0x10ed   : > { %4674 = vmatmul.mubr.msk.bf16.vlgmr.msra.gmra.mxu0 %vm1645_vm1, %v3073_v46 }
0x10ee   : > { %4687 = vmatprep.mubr.msk.bf16.mxu0 %vm5469_vm0, %v5468_v22  ;;  %4684 = vmatpush3.bf16.msra.mxu0 %v4919_v15  ;;  %v4923_v15 = vld [vmem:[%s6103_s26 + $0x38] sm:$0xff]  }
0x10ef   : > { %4685 = vmatprep.subr.bf16.mxu0 %v5468_v22 }
0x10f2   : > { %4686 = vmatpush3.bf16.msra.mxu0 %v4920_v17 }
0x10f3   : > { %4697 = vmatprep.subr.bf16.mxu0 %v5468_v22 }
0x1132   : > { %v6513_v47 = vpop.f32.mrf.mxu1 }
0x1134   : > { %v4669_v48 = vpop.f32.mrf.mxu1 }
0x1136   : > { %v6515_v49 = vpop.f32.mrf.mxu1 }
0x1138   : > { %v4670_v50 = vpop.f32.mrf.mxu1 }
0x11a5   : > { %v6517_v51 = vpop.f32.mrf.mxu0 }
0x11a7   : > { %v4661_v52 = vpop.f32.mrf.mxu0 }
0x11a9   : > { %v6519_v54 = vpop.f32.mrf.mxu0 }
0x11ab   : > { %v4662_v55 = vpop.f32.mrf.mxu0 }
0x11ad   : > { %v3116_v56 = vpop.f32.mrf.mxu0 }
0x11ae   : > { %v3123_v21 = vmul.f32 0.17677669, %v3116_v56 }
0x11af   : > { %v4675_v26 = vpop.f32.mrf.mxu0 }
0x11b0   : > { %v3125_v30 = vadd.f32 %v3123_v21, %v6462_v28 }
0x11b1   : > { %v3119_v32 = vpop.f32.mrf.mxu0 }
0x11b2   : > { %v3124_v57 = vmul.f32 0.17677669, %v3119_v32  ;;  %v3127_v59 = vsel %vm1697_vm2, %v3125_v30, -inf }
0x11b3   : > { %3128 = vmax.xlane.f32.xlu0 %v3127_v59  ;;  %v4676_v60 = vpop.f32.mrf.mxu0  ;;  %v3069_v59 = vadd.f32 %v6515_v49, %v6519_v54  ;;  %v4921_v49 = vld [vmem:[%s6088_s14 + $0x38] sm:$0xff]   ;;  %v4922_v54 = vld [vmem:[%s6088_s14 + $0x30] sm:$0xff]   ;;  %s6784_s14 = scalar_lea.vmem [#allocation13], %s6062_s13 }
0x11b4   : > { %v3126_v61 = vadd.f32 %v3124_v57, %v6468_v53 }
0x11b6   : > { %v3130_v0 = vsel %vm1697_vm2, %v3126_v61, -inf }
0x11b7   : > { %3131 = vmax.xlane.f32.xlu1 %v3130_v0 }
0x11c8   : > { %3150 = vrot.lane.b32.xlu1 %v6435_v11, %s5471_s21  ;;  %s6790_s21 = sld [smem:[#allocation34_spill]] }
0x11cc   : > { %3256 = vrot.lane.b32.xlu1 %v6446_v16, %s5472_s17 }
0x11ce   : > { %p4392_p1 = scmp.ne.s32.totalorder %s6790_s21, 3 }
0x11cf   : > { %s6791_s0 = sld [smem:[#allocation60_spill]] (!%p4392_p1) }
0x123c   : > { %v3129_v1 = vpop.xlane.xlu0 %3128 }
0x123d   : > { %v3133_v2 = vsub.f32 %v3125_v30, %v3129_v1 }
0x123f   : > { %v3135_v3 = vmul.f32 1.442695, %v3133_v2 }
0x1240   : > { %v3132_v37 = vpop.xlane.xlu1 %3131 }
0x1241   : > { %4991 = vpow2.f32 %v3135_v3  ;;  %v3134_v40 = vsub.f32 %v3126_v61, %v3132_v37 }
0x1243   : > { %v3137_v5 = vmul.f32 1.442695, %v3134_v40 }
0x1244   : > { %v3151_v6 = vpop.permute.xlu1 %3150 }
0x1245   : > { %4993 = vpow2.f32 %v3137_v5  ;;  %4678 = vmatpush3.bf16.msra.mxu1 %v3151_v6 }
0x1246   : > { %4691 = vmatprep.subr.bf16.mxu1 %v5468_v22 }
0x124e   : > { %v4992_v4 = vpop.eup %4991 }
0x124f   : > { %v3139_v7 = vsel %vm1697_vm2, %v4992_v4, 0.0 }
0x1250   : > { %3140 = vadd.xlane.f32.xlu0 %v3139_v7 }
0x1252   : > { %v4994_v8 = vpop.eup %4993 }
0x1253   : > { %v3142_v10 = vsel %vm1697_vm2, %v4994_v8, 0.0 }
0x1254   : > { %3143 = vadd.xlane.f32.xlu0 %v3142_v10  ;;  %v4369_v10 = vld [vmem:[%s6783_s16] ss:$0 sm:$0xff] }
0x126a   : > { %3258 = vrot.lane.b32.xlu0 %v6433_v9, %s5472_s17  ;;  %v3257_v9 = vpop.permute.xlu1 %3256 }
0x12d9   : > { %v3141_v16 = vpop.xlane.xlu0 %3140 }
0x12da   : > { %4995 = vrcp.f32 %v3141_v16 }
0x12dd   : > { %v3144_v29 = vpop.xlane.xlu0 %3143 }
0x12de   : > { %4997 = vrcp.f32 %v3144_v29 }
0x12e1   : > { %v3259_v20 = vpop.permute.xlu0 %3258 }
0x12e2   : > { %v3264_v14 = vsel %vm1645_vm1, %v3259_v20, 0 }
0x12e7   : > { %v4996_v24 = vpop.eup %4995 }
0x12e8   : > { %v3147_v12 = vmul.f32 %v4996_v24, %v4992_v4 }
0x12eb   : > { %v4998_v25 = vpop.eup %4997 }
0x12ec   : > { %v3148_v19 = vmul.f32 %v4998_v25, %v4994_v8 }
0x12ee   : > { %v3149_v13 = vpack.c.bf16 %v3148_v19, %v3147_v12 }
0x12f0   : > { %4680 = vmatmul.mubr.msk.bf16.vlgmr.msra.gmra.mxu1 %vm1697_vm2, %v3149_v13 }
0x12f1   : > { %4692 = vmatpush3.bf16.xpose.msra.mxu1 %v3264_v14  ;;  %4693 = vmatprep.mubr.msk.bf16.mxu1 %vm5469_vm0, %v5468_v22 }
0x12f2   : > { %4703 = vmatprep.subr.bf16.mxu1 %v5468_v22 }
0x12f8   : > { %4694 = vmatmul.mubr.msk.bf16.vlgmr.msra.gmra.mxu1 %vm1645_vm1, %v3257_v9 }
0x12f9   : > { %4707 = vmatprep.mubr.msk.bf16.mxu1 %vm5469_vm0, %v5468_v22  ;;  %4704 = vmatpush3.bf16.msra.mxu1 %v4921_v49 }
0x12fa   : > { %4705 = vmatprep.subr.bf16.mxu1 %v5468_v22 }
0x12fd   : > { %4706 = vmatpush3.bf16.msra.mxu1 %v4922_v54 }
0x12fe   : > { %4731 = vmatprep.subr.bf16.mxu1 %v5468_v22 }
0x13b0   : > { %v3190_v18 = vpop.f32.mrf.mxu1 }
0x13b2   : > { %v4681_v23 = vpop.f32.mrf.mxu1 }
0x13b4   : > { %v3193_v31 = vpop.f32.mrf.mxu1 }
0x13b5   : > { %v3197_v34 = vpack.c.bf16 %v3193_v31, %v3190_v18 }
0x13b6   : > { %v4682_v35 = vpop.f32.mrf.mxu1 }
0x13b7   : > { %4688 = vmatmul.mubr.msk.bf16.vlgmr.msra.gmra.mxu0 %vm1645_vm1, %v3197_v34 }
0x13b8   : > { %v3300_v36 = vpop.f32.mrf.mxu1  ;;  %4699 = vmatprep.mubr.msk.bf16.mxu0 %vm5469_vm0, %v5468_v22 }
0x13b9   : > { %v3307_v27 = vmul.f32 0.17677669, %v3300_v36 }
0x13ba   : > { %v4695_v38 = vpop.f32.mrf.mxu1 }
0x13bb   : > { %v3309_v39 = vadd.f32 %v3307_v27, %v6462_v28  ;;  %v4925_v27 = vld [vmem:[%s6103_s26 + $0x28] sm:$0xff]   ;;  %v4926_v38 = vld [vmem:[%s6103_s26 + $0x20] sm:$0xff]  }
0x13bc   : > { %v3303_v58 = vpop.f32.mrf.mxu1 }
0x13bd   : > { %v3308_v41 = vmul.f32 0.17677669, %v3303_v58  ;;  %v3311_v42 = vsel %vm1697_vm2, %v3309_v39, -inf  ;;  %v4928_v58 = vld [vmem:[%s6103_s26 + $0x10] sm:$0xff]  }
0x13be   : > { %3312 = vmax.xlane.f32.xlu1 %v3311_v42  ;;  %v4696_v33 = vpop.f32.mrf.mxu1  ;;  %v4930_v42 = vld [vmem:[%s6103_s26] sm:$0xff]  }
0x13bf   : > { %v3310_v43 = vadd.f32 %v3308_v41, %v6468_v53  ;;  %v3066_v53 = vadd.f32 %v6513_v47, %v6517_v51  ;;  %v4929_v41 = vld [vmem:[%s6103_s26 + $0x8] sm:$0xff]   ;;  %v4931_v33 = vld [vmem:[%s6111_s10 + $0x38] sm:$0xff]  }
0x13c1   : > { %v3314_v44 = vsel %vm1697_vm2, %v3310_v43, -inf }
0x13c2   : > { %3315 = vmax.xlane.f32.xlu0 %v3314_v44  ;;  %v4933_v44 = vld [vmem:[%s6111_s10 + $0x28] sm:$0xff]  }
0x1447   : > { %v3313_v45 = vpop.xlane.xlu1 %3312 }
0x1448   : > { %v3317_v46 = vsub.f32 %v3309_v39, %v3313_v45  ;;  %v4927_v39 = vld [vmem:[%s6103_s26 + $0x18] sm:$0xff]   ;;  %v4934_v45 = vld [vmem:[%s6111_s10 + $0x20] sm:$0xff]  }
0x144a   : > { %v3319_v48 = vmul.f32 1.442695, %v3317_v46  ;;  %v4935_v46 = vld [vmem:[%s6111_s10 + $0x18] sm:$0xff]  }
0x144b   : > { %v3316_v50 = vpop.xlane.xlu0 %3315 }
0x144c   : > { %4999 = vpow2.f32 %v3319_v48  ;;  %v3318_v52 = vsub.f32 %v3310_v43, %v3316_v50  ;;  %v4932_v43 = vld [vmem:[%s6111_s10 + $0x30] sm:$0xff]  }
0x144e   : > { %v3321_v55 = vmul.f32 1.442695, %v3318_v52 }
0x1450   : > { %5001 = vpow2.f32 %v3321_v55 }
0x1459   : > { %v5000_v28 = vpop.eup %4999 }
0x145a   : > { %v3323_v56 = vsel %vm1697_vm2, %v5000_v28, 0.0 }
0x145b   : > { %3324 = vadd.xlane.f32.xlu0 %v3323_v56 }
0x145d   : > { %v5002_v21 = vpop.eup %5001 }
0x145e   : > { %v3326_v26 = vsel %vm1697_vm2, %v5002_v21, 0.0 }
0x145f   : > { %3327 = vadd.xlane.f32.xlu1 %v3326_v26 }
0x1471   : > { %3334 = vrot.lane.b32.xlu0 %v6435_v11, %s5472_s17 }
0x1477   : > { %v3247_v30 = vpop.f32.mrf.mxu0 }
0x1478   : > { %v3254_v32 = vadd.f32 %v3247_v30, %v3066_v53  ;;  %v4370_v53 = vld [vmem:[%s6784_s14] ss:$0 sm:$0xff] }
0x1479   : > { %v4689_v57 = vpop.f32.mrf.mxu0 }
0x147b   : > { %v3250_v60 = vpop.f32.mrf.mxu0 }
0x147c   : > { %v3255_v61 = vadd.f32 %v3250_v60, %v3069_v59 }
0x147d   : > { %v4690_v0 = vpop.f32.mrf.mxu0 }
0x14e4   : > { %v3325_v1 = vpop.xlane.xlu0 %3324 }
0x14e5   : > { %5003 = vrcp.f32 %v3325_v1 }
0x14e8   : > { %v3328_v2 = vpop.xlane.xlu1 %3327  ;;  %v3335_v3 = vpop.permute.xlu0 %3334 }
0x14e9   : > { %5005 = vrcp.f32 %v3328_v2  ;;  %4698 = vmatpush3.bf16.msra.mxu0 %v3335_v3  ;;  %v4936_v2 = vld [vmem:[%s6111_s10 + $0x10] sm:$0xff]   ;;  %v4937_v3 = vld [vmem:[%s6111_s10 + $0x8] sm:$0xff]  }
0x14ea   : > { %4711 = vmatprep.subr.bf16.mxu0 %v5468_v22 }
0x14f2   : > { %v5004_v11 = vpop.eup %5003 }
0x14f3   : > { %v3331_v51 = vmul.f32 %v5004_v11, %v5000_v28  ;;  %v4938_v11 = vld [vmem:[%s6111_s10] sm:$0xff]   ;;  %s6788_s10 = scalar_lea.vmem [#allocation22], %s6062_s13 }
0x14f6   : > { %v5006_v47 = vpop.eup %5005 }
0x14f7   : > { %v3332_v37 = vmul.f32 %v5006_v47, %v5002_v21  ;;  %v4372_v47 = vld [vmem:[%s6786_s20] ss:$0 sm:$0xff] }
0x14f9   : > { %v3333_v40 = vpack.c.bf16 %v3332_v37, %v3331_v51 }
0x14fb   : > { %4700 = vmatmul.mubr.msk.bf16.vlgmr.msra.gmra.mxu0 %vm1697_vm2, %v3333_v40 }
0x14fc   : > { %4727 = vmatprep.mubr.msk.bf16.mxu0 %vm5469_vm0, %v5468_v22  ;;  %4712 = vmatpush3.bf16.msra.mxu0 %v4923_v15 }
0x14fd   : > { %4713 = vmatprep.subr.bf16.mxu0 %v5468_v22 }
0x15bb   : > { %v3374_v5 = vpop.f32.mrf.mxu0 }
0x15bd   : > { %v4701_v6 = vpop.f32.mrf.mxu0 }
0x15bf   : > { %v3377_v4 = vpop.f32.mrf.mxu0 }
0x15c0   : > { %v3381_v7 = vpack.c.bf16 %v3377_v4, %v3374_v5 }
0x15c1   : > { %v4702_v8 = vpop.f32.mrf.mxu0 }
0x15c2   : > { %4708 = vmatmul.mubr.msk.bf16.vlgmr.msra.gmra.mxu1 %vm1645_vm1, %v3381_v7  ;;  %v4381_v8 = vld [vmem:[%s6787_s30] ss:$0 sm:$0xff] }
0x15c3   : > { %4747 = vmatprep.mubr.msk.bf16.mxu1 %vm5469_vm0, %v5468_v22  ;;  %4732 = vmatpush3.bf16.msra.mxu1 %v4931_v33 }
0x15c4   : > { %4733 = vmatprep.subr.bf16.mxu1 %v5468_v22 }
0x15c7   : > { %4734 = vmatpush3.bf16.msra.mxu1 %v4932_v43 }
0x15c8   : > { %4735 = vmatprep.subr.bf16.mxu1 %v5468_v22 }
0x15cb   : > { %4736 = vmatpush3.bf16.msra.mxu1 %v4933_v44 }
0x15cc   : > { %4737 = vmatprep.subr.bf16.mxu1 %v5468_v22 }
0x15cf   : > { %4738 = vmatpush3.bf16.msra.mxu1 %v4934_v45 }
0x15d0   : > { %4739 = vmatprep.subr.bf16.mxu1 %v5468_v22 }
0x15d3   : > { %4740 = vmatpush3.bf16.msra.mxu1 %v4935_v46 }
0x15d4   : > { %4741 = vmatprep.subr.bf16.mxu1 %v5468_v22 }
0x15d7   : > { %4742 = vmatpush3.bf16.msra.mxu1 %v4936_v2 }
0x15d8   : > { %4743 = vmatprep.subr.bf16.mxu1 %v5468_v22 }
0x15db   : > { %4744 = vmatpush3.bf16.msra.mxu1 %v4937_v3 }
0x15dc   : > { %4745 = vmatprep.subr.bf16.mxu1 %v5468_v22 }
0x15df   : > { %4746 = vmatpush3.bf16.msra.mxu1 %v4938_v11 }
0x1682   : > { %v3431_v16 = vpop.f32.mrf.mxu1 }
0x1683   : > { %v3438_v29 = vadd.f32 %v3431_v16, %v3254_v32 }
0x1684   : > { %v4709_v24 = vpop.f32.mrf.mxu1 }
0x1685   : > { %v3446_v25 = vadd.f32 %v4369_v10, %v3438_v29 }
0x1686   : > { %v3434_v12 = vpop.f32.mrf.mxu1 }
0x1687   : > { %v3439_v19 = vadd.f32 %v3434_v12, %v3255_v61  ;;  %v3450_v20 = vadd.f32 %v3446_v25, %v6420_v62 }
0x1688   : > { %v4710_v13 = vpop.f32.mrf.mxu1 }
0x1689   : > { %v3447_v14 = vadd.f32 %v4369_v10, %v3439_v19  ;;  %3452 = vadd.xlane.f32.xlu1 %v3450_v20 }
0x168b   : > { %v3451_v9 = vadd.f32 %v3447_v14, %v6422_v63  ;;  %v4924_v63 = vld [vmem:[%s6103_s26 + $0x30] sm:$0xff]   ;;  %s6785_s26 = scalar_lea.vmem [#allocation14], %s6062_s13 }
0x168c   : > { %4714 = vmatpush3.bf16.msra.mxu0 %v4924_v63  ;;  %v4371_v59 = vld [vmem:[%s6785_s26] ss:$0 sm:$0xff]  ;;  %s6792_s26 = sld [smem:[#allocation61_spill]] (!%p4392_p1) }
0x168d   : > { %3454 = vadd.xlane.f32.xlu1 %v3451_v9  ;;  %4715 = vmatprep.subr.bf16.mxu0 %v5468_v22 }
0x1690   : > { %4716 = vmatpush3.bf16.msra.mxu0 %v4925_v27 }
0x1691   : > { %4717 = vmatprep.subr.bf16.mxu0 %v5468_v22 }
0x1694   : > { %4718 = vmatpush3.bf16.msra.mxu0 %v4926_v38  ;;  %v4390_v38 = vld [vmem:[%s6788_s10] ss:$0 sm:$0xff]  ;;  %s6793_s10 = sld [smem:[#allocation62_spill]] (!%p4392_p1) }
0x1695   : > { %4719 = vmatprep.subr.bf16.mxu0 %v5468_v22 }
0x1698   : > { %4720 = vmatpush3.bf16.msra.mxu0 %v4927_v39 }
0x1699   : > { %4721 = vmatprep.subr.bf16.mxu0 %v5468_v22 }
0x169c   : > { %4722 = vmatpush3.bf16.msra.mxu0 %v4928_v58  ;;  %v4391_v58 = vld [vmem:[%s6789_s8] ss:$0 sm:$0xff] }
0x169d   : > { %4723 = vmatprep.subr.bf16.mxu0 %v5468_v22 }
0x16a0   : > { %4724 = vmatpush3.bf16.msra.mxu0 %v4929_v41 }
0x16a1   : > { %4725 = vmatprep.subr.bf16.mxu0 %v5468_v22 }
0x16a4   : > { %4726 = vmatpush3.bf16.msra.mxu0 %v4930_v42 }
0x1712   : > { %v3453_v17 = vpop.xlane.xlu1 %3452 }
0x1713   : > { %v3456_v18 = vmul.f32 0.0078125, %v3453_v17 }
0x1715   : > { %v3458_v23 = vsub.f32 %v3450_v20, %v3456_v18 }
0x1716   : > { %v3455_v31 = vpop.xlane.xlu1 %3454 }
0x1717   : > { %v3457_v34 = vmul.f32 0.0078125, %v3455_v31  ;;  %v3460_v62 = vmul.f32 %v3458_v23, %v3458_v23 }
0x1719   : > { %v3459_v35 = vsub.f32 %v3451_v9, %v3457_v34  ;;  %3462 = vadd.xlane.f32.xlu1 %v3460_v62 }
0x171b   : > { %v3461_v36 = vmul.f32 %v3459_v35, %v3459_v35 }
0x171d   : > { %3464 = vadd.xlane.f32.xlu1 %v3461_v36 }
0x17a2   : > { %v3463_v48 = vpop.xlane.xlu1 %3462 }
0x17a3   : > { %v3466_v50 = vmul.f32 0.0078125, %v3463_v48 }
0x17a5   : > { %v3468_v52 = vadd.f32 1e-05, %v3466_v50 }
0x17a6   : > { %v3465_v55 = vpop.xlane.xlu1 %3464 }
0x17a7   : > { %5007 = vrsqrt.f32 %v3468_v52  ;;  %v3467_v28 = vmul.f32 0.0078125, %v3465_v55 }
0x17a9   : > { %v3469_v56 = vadd.f32 1e-05, %v3467_v28 }
0x17ab   : > { %5009 = vrsqrt.f32 %v3469_v56 }
0x17b4   : > { %v5008_v21 = vpop.eup %5007 }
0x17b5   : > { %v3472_v26 = vmul.f32 %v5008_v21, %v3458_v23 }
0x17b7   : > { %v3480_v57 = vmul.f32 %v4370_v53, %v3472_v26 }
0x17b8   : > { %v5010_v30 = vpop.eup %5009 }
0x17b9   : > { %v3473_v32 = vmul.f32 %v5010_v30, %v3459_v35  ;;  %v3488_v61 = vadd.f32 %v4371_v59, %v3480_v57 }
0x17bb   : > { %v3481_v60 = vmul.f32 %v4370_v53, %v3473_v32 }
0x17bd   : > { %v3489_v0 = vadd.f32 %v4371_v59, %v3481_v60 }
0x17bf   : > { %v3506_v1 = vpack.c.bf16 %v3489_v0, %v3488_v61 }
0x17c1   : > { %4728 = vmatmul.mubr.bf16.vlgmr.msra.gmra.mxu0 %v3506_v1 }
0x1881   : > { %v3596_v51 = vpop.f32.mrf.mxu0 }
0x1882   : > { %v3597_v40 = vadd.f32 %v4372_v47, %v3596_v51 }
0x1883   : > { %v4729_v37 = vpop.f32.mrf.mxu0 }
0x1884   : > { %v3603_v6 = vmax.f32 %v3597_v40, 0.0 }
0x1885   : > { %v3599_v49 = vpop.f32.mrf.mxu0 }
0x1886   : > { %v3600_v54 = vadd.f32 %v4372_v47, %v3599_v49 }
0x1887   : > { %v4730_v5 = vpop.f32.mrf.mxu0 }
0x1888   : > { %v3604_v4 = vmax.f32 %v3600_v54, 0.0 }
0x188a   : > { %v3621_v7 = vpack.c.bf16 %v3604_v4, %v3603_v6 }
0x188c   : > { %4748 = vmatmul.mubr.bf16.vlgmr.msra.gmra.mxu1 %v3621_v7 }
0x194c   : > { %v3711_v10 = vpop.f32.mrf.mxu1 }
0x194d   : > { %v3712_v16 = vadd.f32 %v4381_v8, %v3711_v10 }
0x194e   : > { %v4749_v29 = vpop.f32.mrf.mxu1 }
0x194f   : > { %v3720_v22 = vadd.f32 %v3712_v16, %v3488_v61 }
0x1950   : > { %v3714_v24 = vpop.f32.mrf.mxu1 }
0x1951   : > { %v3715_v25 = vadd.f32 %v4381_v8, %v3714_v24  ;;  %3722 = vadd.xlane.f32.xlu1 %v3720_v22 }
0x1952   : > { %v4750_v12 = vpop.f32.mrf.mxu1 }
0x1953   : > { %v3721_v19 = vadd.f32 %v3715_v25, %v3489_v0 }
0x1955   : > { %3724 = vadd.xlane.f32.xlu1 %v3721_v19 }
0x19da   : > { %v3723_v20 = vpop.xlane.xlu1 %3722 }
0x19db   : > { %v3726_v13 = vmul.f32 0.0078125, %v3723_v20 }
0x19dd   : > { %v3728_v14 = vsub.f32 %v3720_v22, %v3726_v13 }
0x19de   : > { %v3725_v9 = vpop.xlane.xlu1 %3724 }
0x19df   : > { %v3727_v15 = vmul.f32 0.0078125, %v3725_v9  ;;  %v3730_v17 = vmul.f32 %v3728_v14, %v3728_v14 }
0x19e1   : > { %v3729_v18 = vsub.f32 %v3721_v19, %v3727_v15  ;;  %3732 = vadd.xlane.f32.xlu0 %v3730_v17 }
0x19e3   : > { %v3731_v23 = vmul.f32 %v3729_v18, %v3729_v18 }
0x19e5   : > { %3734 = vadd.xlane.f32.xlu1 %v3731_v23 }
0x1a6a   : > { %v3733_v31 = vpop.xlane.xlu0 %3732 }
0x1a6b   : > { %v3736_v34 = vmul.f32 0.0078125, %v3733_v31 }
0x1a6d   : > { %v3738_v62 = vadd.f32 1e-05, %v3736_v34 }
0x1a6e   : > { %v3735_v35 = vpop.xlane.xlu1 %3734 }
0x1a6f   : > { %5011 = vrsqrt.f32 %v3738_v62  ;;  %v3737_v36 = vmul.f32 0.0078125, %v3735_v35 }
0x1a71   : > { %v3739_v63 = vadd.f32 1e-05, %v3737_v36 }
0x1a73   : > { %5013 = vrsqrt.f32 %v3739_v63 }
0x1a7c   : > { %v5012_v27 = vpop.eup %5011 }
0x1a7d   : > { %v3742_v39 = vmul.f32 %v5012_v27, %v3728_v14 }
0x1a7f   : > { %v3750_v41 = vmul.f32 %v4390_v38, %v3742_v39 }
0x1a80   : > { %v5014_v42 = vpop.eup %5013 }
0x1a81   : > { %v3758_v33 = vadd.f32 %v4391_v58, %v3750_v41  ;;  %v3743_v43 = vmul.f32 %v5014_v42, %v3729_v18 }
0x1a83   : > { %3760 = vst [vmem:[#allocation2] sm:$0xff] %v3758_v33  ;;  %v3751_v44 = vmul.f32 %v4390_v38, %v3743_v43  ;;  %3765 = sbr.rel (%p4392_p1) target bundleno = 7025 (0x1b71), region = 188 }
0x1a85   : > { %v3759_v45 = vadd.f32 %v4391_v58, %v3751_v44 }
0x1a87   : > { %3761 = vst [vmem:[#allocation2 + $0x8] sm:$0xff] %v3759_v45 }
0x1a88   : > { %v5015_v46 = vld [vmem:[%s6791_s0 + $0x38] sm:$0xff]   ;;  %v5473_v48 = vmov 0.0   ;;  %v5016_v50 = vld [vmem:[%s6791_s0 + $0x30] sm:$0xff]   ;;  %vm5474_vm3 = vmmov 0   ;;  %v5017_v52 = vld [vmem:[%s6791_s0 + $0x28] sm:$0xff]   ;;  %v3782_v53 = vpack.c.bf16 %v3759_v45, %v3758_v33 }
0x1a89   : > { %4751 = vmatprep.subr.bf16.mxu0 %v5473_v48  ;;  %4767 = vmatprep.mubr.msk.bf16.mxu0 %vm5474_vm3, %v5473_v48  ;;  %v5018_v55 = vld [vmem:[%s6791_s0 + $0x20] sm:$0xff]   ;;  %v5019_v28 = vld [vmem:[%s6791_s0 + $0x18] sm:$0xff]   ;;  %v5020_v56 = vld [vmem:[%s6791_s0 + $0x10] sm:$0xff]  }
0x1a8a   : > { %4752 = vmatpush3.bf16.msra.mxu0 %v5015_v46  ;;  %v5021_v21 = vld [vmem:[%s6791_s0 + $0x8] sm:$0xff]   ;;  %v5022_v26 = vld [vmem:[%s6791_s0] sm:$0xff]  }
0x1a8b   : > { %4753 = vmatprep.subr.bf16.mxu0 %v5473_v48  ;;  %v4393_v30 = vld [vmem:[%s6792_s26] ss:$0 sm:$0xff] }
0x1a8e   : > { %4754 = vmatpush3.bf16.msra.mxu0 %v5016_v50 }
0x1a8f   : > { %4755 = vmatprep.subr.bf16.mxu0 %v5473_v48 }
0x1a92   : > { %4756 = vmatpush3.bf16.msra.mxu0 %v5017_v52 }
0x1a93   : > { %4757 = vmatprep.subr.bf16.mxu0 %v5473_v48 }
0x1a96   : > { %4758 = vmatpush3.bf16.msra.mxu0 %v5018_v55 }
0x1a97   : > { %4759 = vmatprep.subr.bf16.mxu0 %v5473_v48 }
0x1a9a   : > { %4760 = vmatpush3.bf16.msra.mxu0 %v5019_v28 }
0x1a9b   : > { %4761 = vmatprep.subr.bf16.mxu0 %v5473_v48 }
0x1a9e   : > { %4762 = vmatpush3.bf16.msra.mxu0 %v5020_v56 }
0x1a9f   : > { %4763 = vmatprep.subr.bf16.mxu0 %v5473_v48 }
0x1aa2   : > { %4764 = vmatpush3.bf16.msra.mxu0 %v5021_v21 }
0x1aa3   : > { %4765 = vmatprep.subr.bf16.mxu0 %v5473_v48 }
0x1aa6   : > { %4766 = vmatpush3.bf16.msra.mxu0 %v5022_v26 }
0x1aa9   : > { %4768 = vmatmul.mubr.bf16.vlgmr.msra.gmra.mxu0 %v3782_v53 }
0x1b69   : > { %v3872_v32 = vpop.f32.mrf.mxu0 }
0x1b6a   : > { %v3873_v57 = vadd.f32 %v4393_v30, %v3872_v32 }
0x1b6b   : > { %v4769_v59 = vpop.f32.mrf.mxu0 }
0x1b6c   : > { %3879 = vst [vmem:[%s6793_s10] sm:$0xff] %v3873_v57 }
0x1b6d   : > { %v3875_v60 = vpop.f32.mrf.mxu0 }
0x1b6e   : > { %v3876_v61 = vadd.f32 %v4393_v30, %v3875_v60 }
0x1b6f   : > { %v4770_v0 = vpop.f32.mrf.mxu0 }
0x1b70   : > { %3880 = vst [vmem:[%s6793_s10 + $0x8] sm:$0xff] %v3876_v61 }
0x1b71 PF: > { %s6794_s28 = sld [smem:[#allocation35_spill]]  ;;  %s6797_s27 = smov %s5441_s3 }
0x1b72   : > { %s6795_s17 = sld [smem:[#allocation33_spill]] }
0x1b73   : > { %s6796_s7 = sld [smem:[#allocation36_spill]] }
0x1b77   : > { %p57_p2 = scmp.ge.s32.totalorder %s6794_s28, 6  }
0x1b78   : > { %s6798_s3 = smov %s6795_s17 }
0x1b79   :  { %59 = sbr.rel (!%p57_p2) target bundleno = 44 (0x2c), region = 343 }
0x1b7e   :  { %3892 = vsyncpa [#allocation4], 1 }
0x1b7f   :  { %3894 = vsyncpa [#allocation4 + $0x1], 1 }
0x1b80   :  { %3895 = vsyncpa [#allocation6], 1 }
0x1b81   :  { %3897 = vsyncpa [#allocation6 + $0x1], 1 }
0x1b82   :  { %3898 = vsyncpa [#allocation9], 1 }
0x1b83   :  { %3900 = vsyncpa [#allocation9 + $0x1], 1 }
0x1b84   :  { %3901 = vsyncpa [#allocation12], 1 }
0x1b85   :  { %3903 = vsyncpa [#allocation12 + $0x1], 1 }
0x1b86   :  { %3904 = vsyncpa [#allocation15], 1 }
0x1b87   :  { %3906 = vsyncpa [#allocation15 + $0x1], 1 }
0x1b88   :  { %3907 = vsyncpa [#allocation18], 1 }
0x1b89   :  { %3909 = vsyncpa [#allocation18 + $0x1], 1 }
0x1b8a   :  { %3910 = vsyncpa [#allocation21], 1 }
0x1b8b   :  { %3912 = vsyncpa [#allocation21 + $0x1], 1 }
0x1b8c   :  { %3913 = vsyncpa [#allocation24], 1 }
0x1b8d   :  { %3915 = vsyncpa [#allocation24 + $0x1], 1 }

</bundles_post_ra>
